<compile_context>
chip_gen: v5e
topology: v5e:2x2
jax: 0.10.0
libtpu: 0.0.40
codegen_flags: <defaults>
</compile_context>

<pallas_src>
import functools

import jax
import jax.numpy as jnp
from jax.experimental import pallas as pl

RESIZE = (16, 16)       # small stand-in for the module's (224, 224) resize_shape
RGB_FEATURES = 512      # maxvit_tiny_tf_224 num_features (global_pool='avg')


# --------------------------------------------------------------------------- #
# Single fused kernel: DSM branch + rgb stand-in + trait_fc + fc head
# --------------------------------------------------------------------------- #
def _fused_kernel(cols_ref, rgbx_ref, ex_ref,
                  c1w_ref, c1b_ref, c2w_ref, c2b_ref,
                  rgbw_ref, rgbb_ref, wt_ref, bt_ref,
                  w1_ref, w1e_ref, b1_ref, w2_ref, b2_ref, w3_ref, b3_ref,
                  o_ref, *, B, Hp, Wp):
    # cols_ref : (B*4*Hp*Wp, 9)  pooling-phase im2col of the zero-padded DSM
    # rgbx_ref : (B, 3, H*W)     resized rgb with H*W on lanes (global pool = lane reduce)
    # ex_ref   : (B, 1)
    C1 = c1w_ref.shape[1]                     # 16
    C2 = c2w_ref.shape[1]                     # 32
    H4, W4 = Hp // 2, Wp // 2
    n1 = Hp * Wp

    # ---- conv1: ONE MXU matmul, batch + 4 pooling phases folded into M ----
    a1 = jnp.dot(cols_ref[...], c1w_ref[...],
                 preferred_element_type=jnp.float32) + c1b_ref[...]       # (B*4*n1, 16)
    a1 = a1.reshape(B, 4, n1, C1)
    # MaxPool(2) == max over the 4 phases; ReLU commutes with max.
    a1 = jnp.maximum(jnp.maximum(a1[:, 0], a1[:, 1]),
                     jnp.maximum(a1[:, 2], a1[:, 3]))
    a1 = jnp.maximum(a1, 0.0).reshape(B, Hp, Wp, C1)                      # (B, Hp, Wp, 16)

    # ---- zero-pad in registers (no scratch / masked interior store) ----
    zr = jnp.zeros((B, 1, Wp, C1), jnp.float32)
    a1p = jnp.concatenate([zr, a1, zr], axis=1)                           # (B, Hp+2, Wp, 16)
    zc = jnp.zeros((B, Hp + 2, 1, C1), jnp.float32)
    a1p = jnp.concatenate([zc, a1p, zc], axis=2)                          # (B, Hp+2, Wp+2, 16)

    # ---- conv2: lane-dense im2col (B*n1, 144) then a single K=144 matmul ----
    lhs = jnp.concatenate(
        [a1p[:, dy:dy + Hp, dx:dx + Wp, :] for dy in range(3) for dx in range(3)],
        axis=-1).reshape(B * n1, 9 * C1)                                  # (B*Hp*Wp, 144)
    acc = jnp.maximum(
        jnp.dot(lhs, c2w_ref[...], preferred_element_type=jnp.float32) + c2b_ref[...],
        0.0)                                                              # (B*Hp*Wp, 32)

    # ---- MaxPool(2): row-split reshapes + pairwise max, fully in registers ----
    t = acc.reshape(B * Hp * W4, 2, C2)
    t = jnp.maximum(t[:, 0, :], t[:, 1, :])                               # pooled over w
    t = t.reshape(B * H4, 2, W4, C2)
    t = jnp.maximum(t[:, 0], t[:, 1])                                     # pooled over h
    # flatten(1) in (h, w, c) order -> (B, H4*W4*32)
    t = jnp.concatenate([t[:, k, :] for k in range(W4)], axis=-1)         # (B*H4, W4*32)
    t = t.reshape(B, H4, W4 * C2)
    dsm_feat = jnp.concatenate([t[:, k, :] for k in range(H4)], axis=-1)  # (B, 512)

    # ---- rgb backbone stand-in: global average pool + Linear(3, 512) + ReLU ----
    hw = rgbx_ref.shape[-1]
    pooled = jnp.sum(rgbx_ref[...], axis=-1) * (1.0 / hw)                 # (B, 3)
    rgb_feat = jnp.maximum(
        jnp.dot(pooled, rgbw_ref[...], preferred_element_type=jnp.float32)
        + rgbb_ref[...], 0.0)                                             # (B, 512)

    # ---- trait_fc: Linear(1, 16) + ReLU (K=1 matmul as a broadcast multiply) ----
    ef = jnp.maximum(ex_ref[...] * wt_ref[...] + bt_ref[...], 0.0)        # (B, 16)

    # ---- fc head (dropout = identity at eval); big weights stream as bf16 ----
    feats = jnp.concatenate([rgb_feat, dsm_feat], axis=-1).astype(jnp.bfloat16)  # (B, 1024)
    h1 = jnp.dot(feats, w1_ref[...], preferred_element_type=jnp.float32)
    h1 = h1 + jnp.dot(ef.astype(jnp.bfloat16), w1e_ref[...],
                      preferred_element_type=jnp.float32)
    h1 = jnp.maximum(h1 + b1_ref[...], 0.0)                               # (B, 512)
    h2 = jnp.maximum(
        jnp.dot(h1.astype(jnp.bfloat16), w2_ref[...],
                preferred_element_type=jnp.float32) + b2_ref[...], 0.0)   # (B, 256)
    o_ref[...] = jnp.dot(h2, w3_ref[...], preferred_element_type=jnp.float32) + b3_ref[...]


def _fused_forward(cols, rgb_flat, extra, p, *, B, Hp, Wp):
    kernel = functools.partial(_fused_kernel, B=B, Hp=Hp, Wp=Wp)
    return pl.pallas_call(
        kernel,
        out_shape=jax.ShapeDtypeStruct((B, p["w3"].shape[1]), jnp.float32),
    )(cols, rgb_flat, extra,
      p["c1_w"], p["c1_b"], p["c2_w"], p["c2_b"],
      p["rgb_w"], p["rgb_b"], p["wt"], p["bt"],
      p["w1"], p["w1_ex"], p["b1"], p["w2"], p["b2"], p["w3"], p["b3"])


# --------------------------------------------------------------------------- #
# Host glue (fused by XLA with the resize): pooling-phase im2col of padded DSM
# --------------------------------------------------------------------------- #
def _conv1_pool_im2col(dsm_hw):
    """(B, H, W) -> (B*4*Hp*Wp, 9); row = b*4*Hp*Wp + phase*Hp*Wp + q*Wp + r, col = 3*dy+dx,
    value = dsm_pad[b, 2*q + ph + dy, 2*r + pw + dx] with phase = 2*ph + pw."""
    B, H, W = dsm_hw.shape
    hp_, wp_ = H // 2, W // 2
    xpad = jnp.pad(dsm_hw, ((0, 0), (1, 1), (1, 1)))
    phases = []
    for ph in range(2):
        for pw in range(2):
            taps = [xpad[:, ph + dy:ph + dy + H:2, pw + dx:pw + dx + W:2].reshape(B, hp_ * wp_)
                    for dy in range(3) for dx in range(3)]
            phases.append(jnp.stack(taps, axis=-1))          # (B, Hp*Wp, 9)
    return jnp.concatenate(phases, axis=1).reshape(B * 4 * hp_ * wp_, 9)


def forward(params, rgb, dsm, extra_input):
    B = rgb.shape[0]
    H, W = RESIZE
    # F.interpolate(..., mode='bilinear', align_corners=False)
    rgb_r = jax.image.resize(rgb, (B, rgb.shape[1], H, W), method="bilinear", antialias=False)
    dsm_r = jax.image.resize(dsm, (B, dsm.shape[1], H, W), method="bilinear", antialias=False)

    rgb_flat = rgb_r.reshape(B, rgb.shape[1], H * W)          # (B, 3, H*W), pool over lanes
    cols = _conv1_pool_im2col(dsm_r[:, 0])                    # (B*4*Hp*Wp, 9)
    extra = extra_input.reshape(B, 1)
    return _fused_forward(cols, rgb_flat, extra, params, B=B, Hp=H // 2, Wp=W // 2)


# --------------------------------------------------------------------------- #
# Deterministic synthetic parameters (shapes from the module's __init__)
# --------------------------------------------------------------------------- #
def init_params(key):
    H, W = RESIZE
    dsm_flat = 32 * (H // 4) * (W // 4)
    feat = RGB_FEATURES + dsm_flat + 16                       # == self.feature_size

    ks = jax.random.split(key, 8)

    def nrm(k, shape, fan_in, dtype=jnp.float32):
        return (jax.random.normal(k, shape, jnp.float32)
                / jnp.sqrt(jnp.float32(fan_in))).astype(dtype)

    return {
        "rgb_w": nrm(ks[0], (3, RGB_FEATURES), 3.0),
        "rgb_b": jnp.zeros((1, RGB_FEATURES), jnp.float32),
        "c1_w": nrm(ks[1], (9, 16), 9.0),                     # Conv2d(1,16,3): rows = 3*dy+dx
        "c1_b": jnp.zeros((1, 16), jnp.float32),
        "c2_w": nrm(ks[2], (144, 32), 144.0),                 # Conv2d(16,32,3): rows = (3*dy+dx)*16+cin
        "c2_b": jnp.zeros((1, 32), jnp.float32),
        "wt": nrm(ks[3], (1, 16), 1.0),                       # trait_fc Linear(1, 16)
        "bt": jnp.zeros((1, 16), jnp.float32),
        # fc Linear(feature_size, 512): rows = [rgb(512) | dsm(512, (h,w,c) flatten)], bf16 stream
        "w1": nrm(ks[4], (RGB_FEATURES + dsm_flat, 512), feat, jnp.bfloat16),
        "w1_ex": nrm(ks[5], (16, 512), feat, jnp.bfloat16),   # extra-feature rows of fc Linear
        "b1": jnp.zeros((1, 512), jnp.float32),
        "w2": nrm(ks[6], (512, 256), 512.0, jnp.bfloat16),    # fc Linear(512, 256)
        "b2": jnp.zeros((1, 256), jnp.float32),
        "w3": nrm(ks[7], (256, 2), 256.0),                    # fc Linear(256, 2)
        "b3": jnp.zeros((1, 2), jnp.float32),
    }


if __name__ == "__main__":
    key = jax.random.PRNGKey(0)
    kp, k1, k2, k3 = jax.random.split(key, 4)
    params = init_params(kp)

    rgb = jax.random.normal(k1, (2, 3, 20, 20), jnp.float32)   # NCHW, resized to RESIZE
    dsm = jax.random.normal(k2, (2, 1, 20, 20), jnp.float32)
    extra = jax.random.normal(k3, (2, 1), jnp.float32)

    out = jax.block_until_ready(jax.jit(forward)(params, rgb, dsm, extra))
    assert out.shape == (2, 2) and out.dtype == jnp.float32
    print("KERNEL_OK")
</pallas_src>

<mosaic_0001>
module attributes {stable_mosaic.version = 11 : i64} {
  func.func @_fused_kernel(%arg0: memref<512x9xf32, #tpu.memory_space<vmem>>, %arg1: memref<2x3x256xf32, #tpu.memory_space<vmem>>, %arg2: memref<2x1xf32, #tpu.memory_space<vmem>>, %arg3: memref<9x16xf32, #tpu.memory_space<vmem>>, %arg4: memref<1x16xf32, #tpu.memory_space<vmem>>, %arg5: memref<144x32xf32, #tpu.memory_space<vmem>>, %arg6: memref<1x32xf32, #tpu.memory_space<vmem>>, %arg7: memref<3x512xf32, #tpu.memory_space<vmem>>, %arg8: memref<1x512xf32, #tpu.memory_space<vmem>>, %arg9: memref<1x16xf32, #tpu.memory_space<vmem>>, %arg10: memref<1x16xf32, #tpu.memory_space<vmem>>, %arg11: memref<1024x512xbf16, #tpu.memory_space<vmem>>, %arg12: memref<16x512xbf16, #tpu.memory_space<vmem>>, %arg13: memref<1x512xf32, #tpu.memory_space<vmem>>, %arg14: memref<512x256xbf16, #tpu.memory_space<vmem>>, %arg15: memref<1x256xf32, #tpu.memory_space<vmem>>, %arg16: memref<256x2xf32, #tpu.memory_space<vmem>>, %arg17: memref<1x2xf32, #tpu.memory_space<vmem>>, %arg18: memref<2x2xf32, #tpu.memory_space<vmem>>) attributes {dimension_semantics = [], scalar_prefetch = 0 : i64, scratch_operands = 0 : i64, tpu.core_type = #tpu.core_type<tc>} {
    %c0 = arith.constant 0 : index
    %c0_0 = arith.constant 0 : index
    %0 = vector.load %arg0[%c0, %c0_0] : memref<512x9xf32, #tpu.memory_space<vmem>>, vector<512x9xf32>
    %c0_1 = arith.constant 0 : index
    %c0_2 = arith.constant 0 : index
    %1 = vector.load %arg3[%c0_1, %c0_2] : memref<9x16xf32, #tpu.memory_space<vmem>>, vector<9x16xf32>
    %cst = arith.constant dense<0.000000e+00> : vector<512x16xf32>
    %2 = tpu.matmul %0, %1, %cst {dimension_numbers = #tpu.dot_dimension_numbers<[1], [0], [0], [1], [0, 0, 1, 1], [], []>} : vector<512x9xf32>, vector<9x16xf32>, vector<512x16xf32> -> vector<512x16xf32>
    %c0_3 = arith.constant 0 : index
    %c0_4 = arith.constant 0 : index
    %3 = vector.load %arg4[%c0_3, %c0_4] : memref<1x16xf32, #tpu.memory_space<vmem>>, vector<1x16xf32>
    %4 = vector.broadcast %3 : vector<1x16xf32> to vector<512x16xf32>
    %5 = arith.addf %2, %4 : vector<512x16xf32>
    %6 = vector.shape_cast %5 : vector<512x16xf32> to vector<2x4x64x16xf32>
    %7 = vector.extract_strided_slice %6 {offsets = [0, 0, 0, 0], sizes = [2, 1, 64, 16], strides = [1, 1, 1, 1]} : vector<2x4x64x16xf32> to vector<2x1x64x16xf32>
    %8 = vector.shape_cast %7 : vector<2x1x64x16xf32> to vector<2x64x16xf32>
    %9 = vector.extract_strided_slice %6 {offsets = [0, 1, 0, 0], sizes = [2, 1, 64, 16], strides = [1, 1, 1, 1]} : vector<2x4x64x16xf32> to vector<2x1x64x16xf32>
    %10 = vector.shape_cast %9 : vector<2x1x64x16xf32> to vector<2x64x16xf32>
    %11 = arith.maximumf %8, %10 : vector<2x64x16xf32>
    %12 = vector.extract_strided_slice %6 {offsets = [0, 2, 0, 0], sizes = [2, 1, 64, 16], strides = [1, 1, 1, 1]} : vector<2x4x64x16xf32> to vector<2x1x64x16xf32>
    %13 = vector.shape_cast %12 : vector<2x1x64x16xf32> to vector<2x64x16xf32>
    %14 = vector.extract_strided_slice %6 {offsets = [0, 3, 0, 0], sizes = [2, 1, 64, 16], strides = [1, 1, 1, 1]} : vector<2x4x64x16xf32> to vector<2x1x64x16xf32>
    %15 = vector.shape_cast %14 : vector<2x1x64x16xf32> to vector<2x64x16xf32>
    %16 = arith.maximumf %13, %15 : vector<2x64x16xf32>
    %17 = arith.maximumf %11, %16 : vector<2x64x16xf32>
    %cst_5 = arith.constant 0.000000e+00 : f32
    %18 = vector.broadcast %cst_5 : f32 to vector<2x64x16xf32>
    %19 = arith.maximumf %17, %18 : vector<2x64x16xf32>
    %20 = vector.shape_cast %19 : vector<2x64x16xf32> to vector<2x8x8x16xf32>
    %cst_6 = arith.constant 0.000000e+00 : f32
    %21 = vector.broadcast %cst_6 : f32 to vector<2x1x8x16xf32>
    %22 = tpu.concatenate %21, %20, %21 in 1 : vector<2x1x8x16xf32>, vector<2x8x8x16xf32>, vector<2x1x8x16xf32> -> vector<2x10x8x16xf32>
    %cst_7 = arith.constant 0.000000e+00 : f32
    %23 = vector.broadcast %cst_7 : f32 to vector<2x10x1x16xf32>
    %24 = tpu.concatenate %23, %22, %23 in 2 : vector<2x10x1x16xf32>, vector<2x10x8x16xf32>, vector<2x10x1x16xf32> -> vector<2x10x10x16xf32>
    %25 = vector.extract_strided_slice %24 {offsets = [0, 0, 0, 0], sizes = [2, 8, 8, 16], strides = [1, 1, 1, 1]} : vector<2x10x10x16xf32> to vector<2x8x8x16xf32>
    %26 = vector.extract_strided_slice %24 {offsets = [0, 0, 1, 0], sizes = [2, 8, 8, 16], strides = [1, 1, 1, 1]} : vector<2x10x10x16xf32> to vector<2x8x8x16xf32>
    %27 = vector.extract_strided_slice %24 {offsets = [0, 0, 2, 0], sizes = [2, 8, 8, 16], strides = [1, 1, 1, 1]} : vector<2x10x10x16xf32> to vector<2x8x8x16xf32>
    %28 = vector.extract_strided_slice %24 {offsets = [0, 1, 0, 0], sizes = [2, 8, 8, 16], strides = [1, 1, 1, 1]} : vector<2x10x10x16xf32> to vector<2x8x8x16xf32>
    %29 = vector.extract_strided_slice %24 {offsets = [0, 1, 1, 0], sizes = [2, 8, 8, 16], strides = [1, 1, 1, 1]} : vector<2x10x10x16xf32> to vector<2x8x8x16xf32>
    %30 = vector.extract_strided_slice %24 {offsets = [0, 1, 2, 0], sizes = [2, 8, 8, 16], strides = [1, 1, 1, 1]} : vector<2x10x10x16xf32> to vector<2x8x8x16xf32>
    %31 = vector.extract_strided_slice %24 {offsets = [0, 2, 0, 0], sizes = [2, 8, 8, 16], strides = [1, 1, 1, 1]} : vector<2x10x10x16xf32> to vector<2x8x8x16xf32>
    %32 = vector.extract_strided_slice %24 {offsets = [0, 2, 1, 0], sizes = [2, 8, 8, 16], strides = [1, 1, 1, 1]} : vector<2x10x10x16xf32> to vector<2x8x8x16xf32>
    %33 = vector.extract_strided_slice %24 {offsets = [0, 2, 2, 0], sizes = [2, 8, 8, 16], strides = [1, 1, 1, 1]} : vector<2x10x10x16xf32> to vector<2x8x8x16xf32>
    %34 = tpu.concatenate %25, %26, %27, %28, %29, %30, %31, %32, %33 in 3 : vector<2x8x8x16xf32>, vector<2x8x8x16xf32>, vector<2x8x8x16xf32>, vector<2x8x8x16xf32>, vector<2x8x8x16xf32>, vector<2x8x8x16xf32>, vector<2x8x8x16xf32>, vector<2x8x8x16xf32>, vector<2x8x8x16xf32> -> vector<2x8x8x144xf32>
    %35 = vector.shape_cast %34 : vector<2x8x8x144xf32> to vector<128x144xf32>
    %c0_8 = arith.constant 0 : index
    %c0_9 = arith.constant 0 : index
    %36 = vector.load %arg5[%c0_8, %c0_9] : memref<144x32xf32, #tpu.memory_space<vmem>>, vector<144x32xf32>
    %cst_10 = arith.constant dense<0.000000e+00> : vector<128x32xf32>
    %37 = tpu.matmul %35, %36, %cst_10 {dimension_numbers = #tpu.dot_dimension_numbers<[1], [0], [0], [1], [0, 0, 1, 1], [], []>} : vector<128x144xf32>, vector<144x32xf32>, vector<128x32xf32> -> vector<128x32xf32>
    %c0_11 = arith.constant 0 : index
    %c0_12 = arith.constant 0 : index
    %38 = vector.load %arg6[%c0_11, %c0_12] : memref<1x32xf32, #tpu.memory_space<vmem>>, vector<1x32xf32>
    %39 = vector.broadcast %38 : vector<1x32xf32> to vector<128x32xf32>
    %40 = arith.addf %37, %39 : vector<128x32xf32>
    %cst_13 = arith.constant 0.000000e+00 : f32
    %41 = vector.broadcast %cst_13 : f32 to vector<128x32xf32>
    %42 = arith.maximumf %40, %41 : vector<128x32xf32>
    %43 = vector.shape_cast %42 : vector<128x32xf32> to vector<64x2x32xf32>
    %44 = vector.extract_strided_slice %43 {offsets = [0, 0, 0], sizes = [64, 1, 32], strides = [1, 1, 1]} : vector<64x2x32xf32> to vector<64x1x32xf32>
    %45 = vector.shape_cast %44 : vector<64x1x32xf32> to vector<64x32xf32>
    %46 = vector.extract_strided_slice %43 {offsets = [0, 1, 0], sizes = [64, 1, 32], strides = [1, 1, 1]} : vector<64x2x32xf32> to vector<64x1x32xf32>
    %47 = vector.shape_cast %46 : vector<64x1x32xf32> to vector<64x32xf32>
    %48 = arith.maximumf %45, %47 : vector<64x32xf32>
    %49 = vector.shape_cast %48 : vector<64x32xf32> to vector<8x2x4x32xf32>
    %50 = vector.extract_strided_slice %49 {offsets = [0, 0, 0, 0], sizes = [8, 1, 4, 32], strides = [1, 1, 1, 1]} : vector<8x2x4x32xf32> to vector<8x1x4x32xf32>
    %51 = vector.shape_cast %50 : vector<8x1x4x32xf32> to vector<8x4x32xf32>
    %52 = vector.extract_strided_slice %49 {offsets = [0, 1, 0, 0], sizes = [8, 1, 4, 32], strides = [1, 1, 1, 1]} : vector<8x2x4x32xf32> to vector<8x1x4x32xf32>
    %53 = vector.shape_cast %52 : vector<8x1x4x32xf32> to vector<8x4x32xf32>
    %54 = arith.maximumf %51, %53 : vector<8x4x32xf32>
    %55 = vector.extract_strided_slice %54 {offsets = [0, 0, 0], sizes = [8, 1, 32], strides = [1, 1, 1]} : vector<8x4x32xf32> to vector<8x1x32xf32>
    %56 = vector.shape_cast %55 : vector<8x1x32xf32> to vector<8x32xf32>
    %57 = vector.extract_strided_slice %54 {offsets = [0, 1, 0], sizes = [8, 1, 32], strides = [1, 1, 1]} : vector<8x4x32xf32> to vector<8x1x32xf32>
    %58 = vector.shape_cast %57 : vector<8x1x32xf32> to vector<8x32xf32>
    %59 = vector.extract_strided_slice %54 {offsets = [0, 2, 0], sizes = [8, 1, 32], strides = [1, 1, 1]} : vector<8x4x32xf32> to vector<8x1x32xf32>
    %60 = vector.shape_cast %59 : vector<8x1x32xf32> to vector<8x32xf32>
    %61 = vector.extract_strided_slice %54 {offsets = [0, 3, 0], sizes = [8, 1, 32], strides = [1, 1, 1]} : vector<8x4x32xf32> to vector<8x1x32xf32>
    %62 = vector.shape_cast %61 : vector<8x1x32xf32> to vector<8x32xf32>
    %63 = tpu.concatenate %56, %58, %60, %62 in 1 : vector<8x32xf32>, vector<8x32xf32>, vector<8x32xf32>, vector<8x32xf32> -> vector<8x128xf32>
    %64 = vector.shape_cast %63 : vector<8x128xf32> to vector<2x4x128xf32>
    %65 = vector.extract_strided_slice %64 {offsets = [0, 0, 0], sizes = [2, 1, 128], strides = [1, 1, 1]} : vector<2x4x128xf32> to vector<2x1x128xf32>
    %66 = vector.shape_cast %65 : vector<2x1x128xf32> to vector<2x128xf32>
    %67 = vector.extract_strided_slice %64 {offsets = [0, 1, 0], sizes = [2, 1, 128], strides = [1, 1, 1]} : vector<2x4x128xf32> to vector<2x1x128xf32>
    %68 = vector.shape_cast %67 : vector<2x1x128xf32> to vector<2x128xf32>
    %69 = vector.extract_strided_slice %64 {offsets = [0, 2, 0], sizes = [2, 1, 128], strides = [1, 1, 1]} : vector<2x4x128xf32> to vector<2x1x128xf32>
    %70 = vector.shape_cast %69 : vector<2x1x128xf32> to vector<2x128xf32>
    %71 = vector.extract_strided_slice %64 {offsets = [0, 3, 0], sizes = [2, 1, 128], strides = [1, 1, 1]} : vector<2x4x128xf32> to vector<2x1x128xf32>
    %72 = vector.shape_cast %71 : vector<2x1x128xf32> to vector<2x128xf32>
    %73 = tpu.concatenate %66, %68, %70, %72 in 1 : vector<2x128xf32>, vector<2x128xf32>, vector<2x128xf32>, vector<2x128xf32> -> vector<2x512xf32>
    %c0_14 = arith.constant 0 : index
    %c0_15 = arith.constant 0 : index
    %c0_16 = arith.constant 0 : index
    %74 = vector.load %arg1[%c0_14, %c0_15, %c0_16] : memref<2x3x256xf32, #tpu.memory_space<vmem>>, vector<2x3x256xf32>
    %cst_17 = arith.constant dense<0.000000e+00> : vector<2x3xf32>
    %75 = vector.multi_reduction <add>, %74, %cst_17 [2] : vector<2x3x256xf32> to vector<2x3xf32>
    %cst_18 = arith.constant 3.906250e-03 : f32
    %76 = vector.broadcast %cst_18 : f32 to vector<2x3xf32>
    %77 = arith.mulf %75, %76 : vector<2x3xf32>
    %c0_19 = arith.constant 0 : index
    %c0_20 = arith.constant 0 : index
    %78 = vector.load %arg7[%c0_19, %c0_20] : memref<3x512xf32, #tpu.memory_space<vmem>>, vector<3x512xf32>
    %cst_21 = arith.constant dense<0.000000e+00> : vector<2x512xf32>
    %79 = tpu.matmul %77, %78, %cst_21 {dimension_numbers = #tpu.dot_dimension_numbers<[1], [0], [0], [1], [0, 0, 1, 1], [], []>} : vector<2x3xf32>, vector<3x512xf32>, vector<2x512xf32> -> vector<2x512xf32>
    %c0_22 = arith.constant 0 : index
    %c0_23 = arith.constant 0 : index
    %80 = vector.load %arg8[%c0_22, %c0_23] : memref<1x512xf32, #tpu.memory_space<vmem>>, vector<1x512xf32>
    %81 = vector.broadcast %80 : vector<1x512xf32> to vector<2x512xf32>
    %82 = arith.addf %79, %81 : vector<2x512xf32>
    %cst_24 = arith.constant 0.000000e+00 : f32
    %83 = vector.broadcast %cst_24 : f32 to vector<2x512xf32>
    %84 = arith.maximumf %82, %83 : vector<2x512xf32>
    %c0_25 = arith.constant 0 : index
    %c0_26 = arith.constant 0 : index
    %85 = vector.load %arg2[%c0_25, %c0_26] : memref<2x1xf32, #tpu.memory_space<vmem>>, vector<2x1xf32>
    %c0_27 = arith.constant 0 : index
    %c0_28 = arith.constant 0 : index
    %86 = vector.load %arg9[%c0_27, %c0_28] : memref<1x16xf32, #tpu.memory_space<vmem>>, vector<1x16xf32>
    %87 = vector.broadcast %85 : vector<2x1xf32> to vector<2x16xf32>
    %88 = vector.broadcast %86 : vector<1x16xf32> to vector<2x16xf32>
    %89 = arith.mulf %87, %88 : vector<2x16xf32>
    %c0_29 = arith.constant 0 : index
    %c0_30 = arith.constant 0 : index
    %90 = vector.load %arg10[%c0_29, %c0_30] : memref<1x16xf32, #tpu.memory_space<vmem>>, vector<1x16xf32>
    %91 = vector.broadcast %90 : vector<1x16xf32> to vector<2x16xf32>
    %92 = arith.addf %89, %91 : vector<2x16xf32>
    %cst_31 = arith.constant 0.000000e+00 : f32
    %93 = vector.broadcast %cst_31 : f32 to vector<2x16xf32>
    %94 = arith.maximumf %92, %93 : vector<2x16xf32>
    %95 = tpu.concatenate %84, %73 in 1 : vector<2x512xf32>, vector<2x512xf32> -> vector<2x1024xf32>
    %96 = arith.truncf %95 : vector<2x1024xf32> to vector<2x1024xbf16>
    %c0_32 = arith.constant 0 : index
    %c0_33 = arith.constant 0 : index
    %97 = vector.load %arg11[%c0_32, %c0_33] : memref<1024x512xbf16, #tpu.memory_space<vmem>>, vector<1024x512xbf16>
    %cst_34 = arith.constant dense<0.000000e+00> : vector<2x512xf32>
    %98 = tpu.matmul %96, %97, %cst_34 {dimension_numbers = #tpu.dot_dimension_numbers<[1], [0], [0], [1], [0, 0, 1, 1], [], []>} : vector<2x1024xbf16>, vector<1024x512xbf16>, vector<2x512xf32> -> vector<2x512xf32>
    %99 = arith.truncf %94 : vector<2x16xf32> to vector<2x16xbf16>
    %c0_35 = arith.constant 0 : index
    %c0_36 = arith.constant 0 : index
    %100 = vector.load %arg12[%c0_35, %c0_36] : memref<16x512xbf16, #tpu.memory_space<vmem>>, vector<16x512xbf16>
    %cst_37 = arith.constant dense<0.000000e+00> : vector<2x512xf32>
    %101 = tpu.matmul %99, %100, %cst_37 {dimension_numbers = #tpu.dot_dimension_numbers<[1], [0], [0], [1], [0, 0, 1, 1], [], []>} : vector<2x16xbf16>, vector<16x512xbf16>, vector<2x512xf32> -> vector<2x512xf32>
    %102 = arith.addf %98, %101 : vector<2x512xf32>
    %c0_38 = arith.constant 0 : index
    %c0_39 = arith.constant 0 : index
    %103 = vector.load %arg13[%c0_38, %c0_39] : memref<1x512xf32, #tpu.memory_space<vmem>>, vector<1x512xf32>
    %104 = vector.broadcast %103 : vector<1x512xf32> to vector<2x512xf32>
    %105 = arith.addf %102, %104 : vector<2x512xf32>
    %cst_40 = arith.constant 0.000000e+00 : f32
    %106 = vector.broadcast %cst_40 : f32 to vector<2x512xf32>
    %107 = arith.maximumf %105, %106 : vector<2x512xf32>
    %108 = arith.truncf %107 : vector<2x512xf32> to vector<2x512xbf16>
    %c0_41 = arith.constant 0 : index
    %c0_42 = arith.constant 0 : index
    %109 = vector.load %arg14[%c0_41, %c0_42] : memref<512x256xbf16, #tpu.memory_space<vmem>>, vector<512x256xbf16>
    %cst_43 = arith.constant dense<0.000000e+00> : vector<2x256xf32>
    %110 = tpu.matmul %108, %109, %cst_43 {dimension_numbers = #tpu.dot_dimension_numbers<[1], [0], [0], [1], [0, 0, 1, 1], [], []>} : vector<2x512xbf16>, vector<512x256xbf16>, vector<2x256xf32> -> vector<2x256xf32>
    %c0_44 = arith.constant 0 : index
    %c0_45 = arith.constant 0 : index
    %111 = vector.load %arg15[%c0_44, %c0_45] : memref<1x256xf32, #tpu.memory_space<vmem>>, vector<1x256xf32>
    %112 = vector.broadcast %111 : vector<1x256xf32> to vector<2x256xf32>
    %113 = arith.addf %110, %112 : vector<2x256xf32>
    %cst_46 = arith.constant 0.000000e+00 : f32
    %114 = vector.broadcast %cst_46 : f32 to vector<2x256xf32>
    %115 = arith.maximumf %113, %114 : vector<2x256xf32>
    %c0_47 = arith.constant 0 : index
    %c0_48 = arith.constant 0 : index
    %116 = vector.load %arg16[%c0_47, %c0_48] : memref<256x2xf32, #tpu.memory_space<vmem>>, vector<256x2xf32>
    %cst_49 = arith.constant dense<0.000000e+00> : vector<2x2xf32>
    %117 = tpu.matmul %115, %116, %cst_49 {dimension_numbers = #tpu.dot_dimension_numbers<[1], [0], [0], [1], [0, 0, 1, 1], [], []>} : vector<2x256xf32>, vector<256x2xf32>, vector<2x2xf32> -> vector<2x2xf32>
    %c0_50 = arith.constant 0 : index
    %c0_51 = arith.constant 0 : index
    %118 = vector.load %arg17[%c0_50, %c0_51] : memref<1x2xf32, #tpu.memory_space<vmem>>, vector<1x2xf32>
    %119 = vector.broadcast %118 : vector<1x2xf32> to vector<2x2xf32>
    %120 = arith.addf %117, %119 : vector<2x2xf32>
    %c0_52 = arith.constant 0 : index
    %c0_53 = arith.constant 0 : index
    %121 = vector.load %arg18[%c0_52, %c0_53] : memref<2x2xf32, #tpu.memory_space<vmem>>, vector<2x2xf32>
    tpu.vector_store %arg18[%c0_52, %c0_53], %120 {strides = array<i32>} : memref<2x2xf32, #tpu.memory_space<vmem>>, vector<2x2xf32>,
    return
  }
}

</mosaic_0001>

<bundles_post_ra>
// kernel: forward.1
= control target key start
LH: loop header
LB: loop body
LE: loop exit
PB: predicated region body
PF: predicated region fallthrough
CT: control target
= control target key end

     0   :  { %s10117_s0 = inlined_call_operand.vmem [shape: f32[512,9], index: 0, kind: input, shape index: {}]   ;;  %s10118_s1 = inlined_call_operand.vmem [shape: f32[2,3,256], index: 1, kind: input, shape index: {}]   ;;  %s10119_s2 = inlined_call_operand.vmem [shape: f32[2,1], index: 2, kind: input, shape index: {}]   ;;  %s10120_s3 = inlined_call_operand.vmem [shape: f32[9,16], index: 3, kind: input, shape index: {}]   ;;  %s10121_s4 = inlined_call_operand.vmem [shape: f32[1,16], index: 4, kind: input, shape index: {}]   ;;  %s10122_s5 = inlined_call_operand.vmem [shape: f32[144,32], index: 5, kind: input, shape index: {}]   ;;  %s10123_s6 = inlined_call_operand.vmem [shape: f32[1,32], index: 6, kind: input, shape index: {}]   ;;  %s10124_s7 = inlined_call_operand.vmem [shape: f32[3,512], index: 7, kind: input, shape index: {}]   ;;  %s10125_s8 = inlined_call_operand.vmem [shape: f32[1,512], index: 8, kind: input, shape index: {}]   ;;  %s10126_s9 = inlined_call_operand.vmem [shape: f32[1,16], index: 9, kind: input, shape index: {}]   ;;  %s10127_s10 = inlined_call_operand.vmem [shape: f32[1,16], index: 10, kind: input, shape index: {}]   ;;  %s10128_s11 = inlined_call_operand.vmem [shape: bf16[1024,512], index: 11, kind: input, shape index: {}]   ;;  %s10129_s12 = inlined_call_operand.vmem [shape: bf16[16,512], index: 12, kind: input, shape index: {}]   ;;  %s10130_s13 = inlined_call_operand.vmem [shape: f32[1,512], index: 13, kind: input, shape index: {}]   ;;  %s10131_s14 = inlined_call_operand.hbm [shape: bf16[512,256], index: 14, kind: input, shape index: {}]   ;;  %s10132_s15 = inlined_call_operand.vmem [shape: f32[1,256], index: 15, kind: input, shape index: {}]   ;;  %s10133_s16 = inlined_call_operand.vmem [shape: f32[256,2], index: 16, kind: input, shape index: {}]   ;;  %s10134_s17 = inlined_call_operand.vmem [shape: f32[1,2], index: 17, kind: input, shape index: {}]   ;;  %s10135_s18 = inlined_call_operand.hbm [shape: f32[2,2], index: 18, kind: output, shape index: {}]  }
   0x1   :  { %10138 = sst [smem:[#allocation8_spill]] %s10117_s0 }
   0x2   :  { %10139 = sst [smem:[#allocation9_spill]] %s10118_s1 }
   0x3   :  { %10140 = sst [smem:[#allocation10_spill]] %s10119_s2 }
   0x4   :  { %23 = vsyncpa [#allocation3], 0 }
   0x5   :  { %24 = vsyncpa [#allocation4], 0  ;;  %s57_s29 = sshll.u32 %s10131_s14, 4  ;;  %s6928_s30 = smov [#allocation2]   ;;  %s58_s29 = int_to_ptr.hbm [resolvable:$true] %s57_s29 }
   0x6   :  { %s59_s0 = sshll.u32 %s6928_s30, 4  ;;  %s6929_s19 = smov 128   ;;  %s60_s0 = int_to_ptr.vmem [resolvable:$true] %s59_s0 }
   0x7   :  { %s6930_s1 = smov 8  }
   0x8   :  { %65 = dma.hbm_to_vmem [thread:$0]  %s58_s29, 8192, %s60_s0, [#allocation3], %s6929_s19, %s6929_s19, %s6930_s1  }
   0x9   :  { %6924 = dma.done.wait [#allocation3], 8192  }
   0xa   :  { %6925 = vsyncadd [#allocation3], 4294959104  ;;  %vm340_vm0 = vcmask 1040384   ;;  %v142_v0 = vld [vmem:[%s10120_s3 + $0x8] sm:$0x1]  ;;  %v141_v1 = vld [vmem:[%s10120_s3] sm:$0xff] }
   0xb   :  { %4830 = vmatpush.msk.msra.mxu0 %vm340_vm0, %v142_v0  ;;  %s10141_s24 = sld [smem:[#allocation8_spill]]  ;;  %vm147_vm1 = vcmask 72704   ;;  %6607 = vmatpush.msk.msra.mxu2 %vm340_vm0, %v142_v0  ;;  %vm732_vm2 = vcmask 1046528   ;;  %vm823_vm3 = vcmask 1045504   ;;  %s6932_s22 = smov 16   ;;  %vm1164_vm4 = vcmask 130048  }
   0xc   :  { %s6933_s2 = smov 48   ;;  %s6934_s25 = smov 32   ;;  %vm1180_vm5 = vcmask 261120   ;;  %vm1196_vm6 = vcmask 392192   ;;  %vm1213_vm7 = vcmask 523264   ;;  %vm1230_vm8 = vcmask 654336  }
   0xd   :  { %359 = vmatpush.msra.mxu0 %v141_v1  ;;  %6608 = vmatpush.msra.mxu2 %v141_v1  ;;  %v1298_v1 = vld [vmem:[%s10122_s5 + $0x88] sm:$0xff]  ;;  %s6935_s26 = smov 80   ;;  %s6936_s3 = smov 64   ;;  %vm1247_vm9 = vcmask 785408   ;;  %vm1264_vm10 = vcmask 916480   ;;  %vm1895_vm11 = vcmask 1041409  }
   0xe   :  { %s6937_s29 = smov 96   ;;  %s6938_s30 = smov 112   ;;  %vm1897_vm12 = vcmask 1042434   ;;  %vm1899_vm13 = vcmask 1043459   ;;  %vm2024_vm14 = vcmask 1042432   ;;  %vm2065_vm15 = vcmask 23552  }
   0xf   :  { %1412 = vmatpush.msrb.mxu2 %v1298_v1  ;;  %s6940_s21 = smov [#allocation5]   ;;  %s4820_s14 = sshll.u32 %s10135_s18, 4  ;;  %s4821_s14 = int_to_ptr.hbm [resolvable:$true] %s4820_s14 }
  0x11   :  { %v77_v2 = vld [vmem:[%s10141_s24] sm:$0xff]  ;;  %v78_v3 = vld [vmem:[%s10141_s24 + $0x8] sm:$0xff]  ;;  %v79_v4 = vld [vmem:[%s10141_s24 + $0x10] sm:$0xff] }
  0x12   :  { %4831 = vmatmul.msk.f32.vlgmr.msra.gmra.mxu0 %vm147_vm1, %v77_v2  ;;  %v80_v5 = vld [vmem:[%s10141_s24 + $0x18] sm:$0xff]  ;;  %v81_v6 = vld [vmem:[%s10141_s24 + $0x20] sm:$0xff]  ;;  %v82_v7 = vld [vmem:[%s10141_s24 + $0x28] sm:$0xff] }
  0x13   :  { %v83_v8 = vld [vmem:[%s10141_s24 + $0x30] sm:$0xff]  ;;  %v84_v9 = vld [vmem:[%s10141_s24 + $0x38] sm:$0xff]  ;;  %v85_v10 = vld [vmem:[%s10141_s24 + $0x40] sm:$0xff] }
  0x14   :  { %v86_v11 = vld [vmem:[%s10141_s24 + $0x48] sm:$0xff]  ;;  %v87_v12 = vld [vmem:[%s10141_s24 + $0x50] sm:$0xff]  ;;  %v88_v13 = vld [vmem:[%s10141_s24 + $0x58] sm:$0xff] }
  0x15   :  { %v89_v14 = vld [vmem:[%s10141_s24 + $0x60] sm:$0xff]  ;;  %v90_v15 = vld [vmem:[%s10141_s24 + $0x68] sm:$0xff]  ;;  %v91_v16 = vld [vmem:[%s10141_s24 + $0x70] sm:$0xff] }
  0x16   :  { %v92_v17 = vld [vmem:[%s10141_s24 + $0x78] sm:$0xff]  ;;  %v93_v19 = vld [vmem:[%s10141_s24 + $0x80] sm:$0xff]  ;;  %v94_v21 = vld [vmem:[%s10141_s24 + $0x88] sm:$0xff] }
  0x17   :  { %v95_v23 = vld [vmem:[%s10141_s24 + $0x90] sm:$0xff]  ;;  %v96_v25 = vld [vmem:[%s10141_s24 + $0x98] sm:$0xff]  ;;  %v97_v27 = vld [vmem:[%s10141_s24 + $0xa0] sm:$0xff] }
  0x18   :  { %v98_v29 = vld [vmem:[%s10141_s24 + $0xa8] sm:$0xff]  ;;  %v99_v31 = vld [vmem:[%s10141_s24 + $0xb0] sm:$0xff]  ;;  %v100_v33 = vld [vmem:[%s10141_s24 + $0xb8] sm:$0xff] }
  0x19   :  { %v101_v35 = vld [vmem:[%s10141_s24 + $0xc0] sm:$0xff]  ;;  %v102_v37 = vld [vmem:[%s10141_s24 + $0xc8] sm:$0xff]  ;;  %v103_v39 = vld [vmem:[%s10141_s24 + $0xd0] sm:$0xff] }
  0x1a   :  { %4832 = vmatmul.msk.f32.gmra.mxu0 %vm147_vm1, %v78_v3  ;;  %v104_v41 = vld [vmem:[%s10141_s24 + $0xd8] sm:$0xff]  ;;  %v105_v43 = vld [vmem:[%s10141_s24 + $0xe0] sm:$0xff]  ;;  %v106_v45 = vld [vmem:[%s10141_s24 + $0xe8] sm:$0xff] }
  0x1b   :  { %v107_v47 = vld [vmem:[%s10141_s24 + $0xf0] sm:$0xff]  ;;  %v108_v49 = vld [vmem:[%s10141_s24 + $0xf8] sm:$0xff]  ;;  %v109_v51 = vld [vmem:[%s10141_s24 + $0x100] sm:$0xff] }
  0x1c   :  { %v110_v53 = vld [vmem:[%s10141_s24 + $0x108] sm:$0xff]  ;;  %v111_v55 = vld [vmem:[%s10141_s24 + $0x110] sm:$0xff]  ;;  %v112_v57 = vld [vmem:[%s10141_s24 + $0x118] sm:$0xff] }
  0x1d   :  { %v113_v59 = vld [vmem:[%s10141_s24 + $0x120] sm:$0xff]  ;;  %v114_v61 = vld [vmem:[%s10141_s24 + $0x128] sm:$0xff]  ;;  %v140_v62 = vld [vmem:[%s10141_s24 + $0x1f8] sm:$0xff] }
  0x1e   :  { %4894 = vmatmul.msk.f32.vlgmr.msra.gmra.mxu2 %vm147_vm1, %v140_v62  ;;  %v115_v0 = vld [vmem:[%s10141_s24 + $0x130] sm:$0xff]  ;;  %v1297_v2 = vld [vmem:[%s10122_s5 + $0x80] sm:$0xff] }
  0x1f   :  { %1413 = vmatpush.msrb.mxu2 %v1297_v2 }
  0x22   :  { %4833 = vmatmul.msk.f32.gmra.mxu0 %vm147_vm1, %v79_v4  ;;  %v116_v4 = vld [vmem:[%s10141_s24 + $0x138] sm:$0xff] }
  0x2a   :  { %4834 = vmatmul.msk.f32.gmra.mxu0 %vm147_vm1, %v80_v5  ;;  %v7262_v5 = vld [vmem:[%s10121_s4] ss:$0 sm:$0xff] }
  0x32   :  { %4835 = vmatmul.msk.f32.gmra.mxu0 %vm147_vm1, %v81_v6 }
  0x3a   :  { %4836 = vmatmul.msk.f32.gmra.mxu0 %vm147_vm1, %v82_v7 }
  0x42   :  { %4837 = vmatmul.msk.f32.gmra.mxu0 %vm147_vm1, %v83_v8  ;;  %v117_v8 = vld [vmem:[%s10141_s24 + $0x140] sm:$0xff] }
  0x4a   :  { %4838 = vmatmul.msk.f32.gmra.mxu0 %vm147_vm1, %v84_v9 }
  0x52   :  { %4839 = vmatmul.msk.f32.gmra.mxu0 %vm147_vm1, %v85_v10 }
  0x5a   :  { %4840 = vmatmul.msk.f32.gmra.mxu0 %vm147_vm1, %v86_v11 }
  0x62   :  { %4841 = vmatmul.msk.f32.gmra.mxu0 %vm147_vm1, %v87_v12  ;;  %v6931_v12 = vmov 0.0  }
  0x6a   :  { %4842 = vmatmul.msk.f32.gmra.mxu0 %vm147_vm1, %v88_v13  ;;  %v634_v13 = vrot.slane %v6931_v12, 7 }
  0x72   :  { %4843 = vmatmul.msk.f32.gmra.mxu0 %vm147_vm1, %v89_v14 }
  0x7a   :  { %4844 = vmatmul.msk.f32.gmra.mxu0 %vm147_vm1, %v90_v15 }
  0x82   :  { %4845 = vmatmul.msk.f32.gmra.mxu0 %vm147_vm1, %v91_v16 }
  0x8a   :  { %4846 = vmatmul.msk.f32.gmra.mxu0 %vm147_vm1, %v92_v17  ;;  %v7274_v17 = vsel %vm340_vm0, 0.0, %v634_v13 }
  0x8f   :  { %v7111_v18 = vpop.f32.mrf.mxu0 }
  0x90   :  { %v362_v9 = vadd.f32 %v7262_v5, %v7111_v18 }
  0x92   :  { %4847 = vmatmul.msk.f32.gmra.mxu0 %vm147_vm1, %v93_v19  ;;  %v685_v19 = vsel %vm340_vm0, %v634_v13, 0.0 }
  0x97   :  { %v7117_v20 = vpop.f32.mrf.mxu0 }
  0x9a   :  { %4848 = vmatmul.msk.f32.gmra.mxu0 %vm147_vm1, %v94_v21 }
  0x9f   :  { %v7123_v22 = vpop.f32.mrf.mxu0 }
  0xa2   :  { %4849 = vmatmul.msk.f32.gmra.mxu0 %vm147_vm1, %v95_v23  ;;  %v365_v23 = vadd.f32 %v7262_v5, %v7117_v20 }
  0xa7   :  { %v7129_v24 = vpop.f32.mrf.mxu0 }
  0xaa   :  { %4850 = vmatmul.msk.f32.gmra.mxu0 %vm147_vm1, %v96_v25 }
  0xaf   :  { %v7135_v26 = vpop.f32.mrf.mxu0 }
  0xb2   :  { %4851 = vmatmul.msk.f32.gmra.mxu0 %vm147_vm1, %v97_v27  ;;  %v118_v27 = vld [vmem:[%s10141_s24 + $0x148] sm:$0xff] }
  0xb7   :  { %v7141_v28 = vpop.f32.mrf.mxu0 }
  0xba   :  { %4852 = vmatmul.msk.f32.gmra.mxu0 %vm147_vm1, %v98_v29  ;;  %v733_v29 = vrot.slane %v7274_v17, 1 }
  0xbf   :  { %v7147_v30 = vpop.f32.mrf.mxu0 }
  0xc2   :  { %4853 = vmatmul.msk.f32.gmra.mxu0 %vm147_vm1, %v99_v31  ;;  %v734_v31 = vrot.slane %v685_v19, 1 }
  0xc7   :  { %v7153_v32 = vpop.f32.mrf.mxu0 }
  0xca   :  { %4854 = vmatmul.msk.f32.gmra.mxu0 %vm147_vm1, %v100_v33 }
  0xcf   :  { %v385_v34 = vpop.f32.mrf.mxu0 }
  0xd0   :  { %v386_v6 = vadd.f32 %v7262_v5, %v385_v34 }
  0xd2   :  { %4855 = vmatmul.msk.f32.gmra.mxu0 %vm147_vm1, %v101_v35  ;;  %v553_v14 = vmax.f32 %v362_v9, %v386_v6 }
  0xd7   :  { %v7163_v36 = vpop.f32.mrf.mxu0 }
  0xd8   :  { %v389_v21 = vadd.f32 %v7262_v5, %v7163_v36 }
  0xda   :  { %4856 = vmatmul.msk.f32.gmra.mxu0 %vm147_vm1, %v102_v37  ;;  %v554_v37 = vmax.f32 %v365_v23, %v389_v21 }
  0xdf   :  { %v7169_v38 = vpop.f32.mrf.mxu0 }
  0xe2   :  { %4857 = vmatmul.msk.f32.gmra.mxu0 %vm147_vm1, %v103_v39 }
  0xe7   :  { %v7175_v40 = vpop.f32.mrf.mxu0 }
  0xea   :  { %4858 = vmatmul.msk.f32.gmra.mxu0 %vm147_vm1, %v104_v41  ;;  %v7293_v41 = vsel %vm732_vm2, %v733_v29, %v734_v31  ;;  %v371_v29 = vadd.f32 %v7262_v5, %v7129_v24 }
  0xef   :  { %v7181_v42 = vpop.f32.mrf.mxu0 }
  0xf2   :  { %4859 = vmatmul.msk.f32.gmra.mxu0 %vm147_vm1, %v105_v43 }
  0xf7   :  { %v7187_v44 = vpop.f32.mrf.mxu0 }
  0xfa   :  { %4860 = vmatmul.msk.f32.gmra.mxu0 %vm147_vm1, %v106_v45 }
  0xff   :  { %v7193_v46 = vpop.f32.mrf.mxu0 }
 0x102   :  { %4861 = vmatmul.msk.f32.gmra.mxu0 %vm147_vm1, %v107_v47  ;;  %v392_v47 = vadd.f32 %v7262_v5, %v7169_v38  ;;  %v119_v38 = vld [vmem:[%s10141_s24 + $0x150] sm:$0xff] }
 0x107   :  { %v7199_v48 = vpop.f32.mrf.mxu0 }
 0x10a   :  { %4862 = vmatmul.msk.f32.gmra.mxu0 %vm147_vm1, %v108_v49 }
 0x10f   :  { %v409_v50 = vpop.f32.mrf.mxu0 }
 0x110   :  { %v410_v10 = vadd.f32 %v7262_v5, %v409_v50 }
 0x112   :  { %4863 = vmatmul.msk.f32.gmra.mxu0 %vm147_vm1, %v109_v51  ;;  %v825_v51 = vrot.slane %v685_v19, 2 }
 0x117   :  { %v412_v52 = vpop.f32.mrf.mxu0 }
 0x118   :  { %v413_v33 = vadd.f32 %v7262_v5, %v412_v52  ;;  %v824_v52 = vrot.slane %v7274_v17, 2 }
 0x11a   :  { %4864 = vmatmul.msk.f32.gmra.mxu0 %vm147_vm1, %v110_v53  ;;  %v7312_v6 = vsel %vm823_vm3, %v824_v52, %v825_v51 }
 0x11f   :  { %v7213_v54 = vpop.f32.mrf.mxu0 }
 0x122   :  { %4865 = vmatmul.msk.f32.gmra.mxu0 %vm147_vm1, %v111_v55 }
 0x127   :  { %v7219_v56 = vpop.f32.mrf.mxu0 }
 0x128   :  { %v419_v31 = vadd.f32 %v7262_v5, %v7219_v56 }
 0x12a   :  { %4866 = vmatmul.msk.f32.gmra.mxu0 %vm147_vm1, %v112_v57 }
 0x12f   :  { %v7225_v58 = vpop.f32.mrf.mxu0 }
 0x132   :  { %4867 = vmatmul.msk.f32.gmra.mxu0 %vm147_vm1, %v113_v59 }
 0x137   :  { %v7231_v60 = vpop.f32.mrf.mxu0 }
 0x13a   :  { %4868 = vmatmul.msk.f32.gmra.mxu0 %vm147_vm1, %v114_v61  ;;  %v368_v61 = vadd.f32 %v7262_v5, %v7123_v22 }
 0x13f   :  { %v7241_v63 = vpop.f32.mrf.mxu0 }
 0x142   :  { %4869 = vmatmul.msk.f32.gmra.mxu0 %vm147_vm1, %v115_v0  ;;  %v416_v0 = vadd.f32 %v7262_v5, %v7213_v54 }
 0x147   :  { %v7253_v3 = vpop.f32.mrf.mxu0 }
 0x14a   :  { %4870 = vmatmul.msk.f32.gmra.mxu0 %vm147_vm1, %v116_v4  ;;  %v555_v4 = vmax.f32 %v368_v61, %v392_v47  ;;  %v121_v61 = vld [vmem:[%s10141_s24 + $0x160] sm:$0xff] }
 0x14f   :  { %v433_v7 = vpop.f32.mrf.mxu0 }
 0x150   :  { %v434_v11 = vadd.f32 %v7262_v5, %v433_v7 }
 0x152   :  { %v569_v15 = vmax.f32 %v410_v10, %v434_v11  ;;  %4871 = vmatmul.msk.f32.gmra.mxu0 %vm147_vm1, %v117_v8 }
 0x154   :  { %v585_v16 = vmax.f32 %v553_v14, %v569_v15  ;;  %v395_v15 = vadd.f32 %v7262_v5, %v7175_v40  ;;  %v120_v40 = vld [vmem:[%s10141_s24 + $0x158] sm:$0xff] }
 0x156   :  { %v601_v18 = vmax.f32 %v585_v16, 0.0 }
 0x157   :  { %v436_v25 = vpop.f32.mrf.mxu0 }
 0x158   :  { %v635_v34 = vrot.slane %v601_v18, 7  ;;  %v437_v35 = vadd.f32 %v7262_v5, %v436_v25 }
 0x15a   :  { %v7288_v36 = vsel %vm340_vm0, 0.0, %v635_v34  ;;  %v570_v39 = vmax.f32 %v413_v33, %v437_v35  ;;  %4872 = vmatmul.msk.f32.gmra.mxu0 %vm147_vm1, %v118_v27  ;;  %v686_v20 = vsel %vm340_vm0, %v635_v34, 0.0  ;;  %v556_v35 = vmax.f32 %v371_v29, %v395_v15 }
 0x15b   :  { %v736_v43 = vrot.slane %v7288_v36, 1  ;;  %v737_v45 = vrot.slane %v686_v20, 1  ;;  %v827_v57 = vrot.slane %v7288_v36, 2  ;;  %v828_v59 = vrot.slane %v686_v20, 2 }
 0x15c   :  { %v586_v49 = vmax.f32 %v554_v37, %v570_v39 }
 0x15d   :  { %v738_v50 = vsel %vm732_vm2, %v736_v43, %v737_v45  ;;  %v829_v54 = vsel %vm823_vm3, %v827_v57, %v828_v59 }
 0x15e   :  { %v602_v53 = vmax.f32 %v586_v49, 0.0  ;;  %v6622_v55 = vpack.i.bf16 %v738_v50, %v7293_v41  ;;  %v6627_v23 = vpack.i.bf16 %v829_v54, %v7312_v6 }
 0x15f   :  { %v439_v62 = vpop.f32.mrf.mxu0 }
 0x160   :  { %v636_v1 = vrot.slane %v602_v53, 7  ;;  %v440_v2 = vadd.f32 %v7262_v5, %v439_v62  ;;  %6623 = vrot.lane.b32.xlu0 %v6622_v55, %s6932_s22  ;;  %v422_v62 = vadd.f32 %v7262_v5, %v7225_v58 }
 0x162   :  { %v7315_v22 = vsel %vm340_vm0, 0.0, %v636_v1  ;;  %v687_v7 = vsel %vm340_vm0, %v636_v1, 0.0  ;;  %v571_v8 = vmax.f32 %v416_v0, %v440_v2  ;;  %4873 = vmatmul.msk.f32.gmra.mxu0 %vm147_vm1, %v119_v38 }
 0x163   :  { %v740_v9 = vrot.slane %v687_v7, 1  ;;  %v739_v10 = vrot.slane %v7315_v22, 1  ;;  %v6632_v11 = vpack.i.bf16 %v7315_v22, %v7288_v36  ;;  %v830_v12 = vrot.slane %v7315_v22, 2 }
 0x164   :  { %v587_v13 = vmax.f32 %v555_v4, %v571_v8  ;;  %v831_v14 = vrot.slane %v687_v7, 2 }
 0x165   :  { %v741_v16 = vsel %vm732_vm2, %v739_v10, %v740_v9  ;;  %6633 = vrot.lane.b32.xlu1 %v6632_v11, %s6933_s2  ;;  %v401_v11 = vadd.f32 %v7262_v5, %v7187_v44  ;;  %v377_v44 = vadd.f32 %v7262_v5, %v7141_v28 }
 0x166   :  { %v603_v19 = vmax.f32 %v587_v13, 0.0  ;;  %v6637_v21 = vpack.i.bf16 %v741_v16, %v738_v50  ;;  %v7329_v18 = vsel %vm823_vm3, %v830_v12, %v831_v14  ;;  %v398_v50 = vadd.f32 %v7262_v5, %v7181_v42 }
 0x167   :  { %4895 = vmatmul.msk.f32.vlgmr.msrb.gmra.mxu2 %vm1164_vm4, %v7329_v18  ;;  %v442_v25 = vpop.f32.mrf.mxu0  ;;  %v6642_v27 = vpack.i.bf16 %v7329_v18, %v829_v54  ;;  %v374_v42 = vadd.f32 %v7262_v5, %v7135_v26 }
 0x168   :  { %v637_v33 = vrot.slane %v603_v19, 7  ;;  %v443_v34 = vadd.f32 %v7262_v5, %v442_v25  ;;  %6628 = vrot.lane.b32.xlu0 %v6627_v23, %s6934_s25  ;;  %v122_v19 = vld [vmem:[%s10141_s24 + $0x168] sm:$0xff] }
 0x169   :  { %6643 = vrot.lane.b32.xlu2 %v6642_v27, %s6935_s26  ;;  %v557_v1 = vmax.f32 %v374_v42, %v398_v50  ;;  %v558_v27 = vmax.f32 %v377_v44, %v401_v11 }
 0x16a   :  { %v7346_v37 = vsel %vm340_vm0, 0.0, %v637_v33  ;;  %v572_v39 = vmax.f32 %v419_v31, %v443_v34  ;;  %4874 = vmatmul.msk.f32.gmra.mxu0 %vm147_vm1, %v120_v40  ;;  %v688_v24 = vsel %vm340_vm0, %v637_v33, 0.0 }
 0x16b   :  { %v743_v20 = vrot.slane %v688_v24, 1  ;;  %v833_v56 = vrot.slane %v7346_v37, 2  ;;  %v834_v43 = vrot.slane %v688_v24, 2  ;;  %v742_v47 = vrot.slane %v7346_v37, 1 }
 0x16c   :  { %v588_v45 = vmax.f32 %v556_v35, %v572_v39  ;;  %v6647_v57 = vpack.i.bf16 %v7346_v37, %v7315_v22  ;;  %v404_v24 = vadd.f32 %v7262_v5, %v7193_v46  ;;  %v380_v46 = vadd.f32 %v7262_v5, %v7147_v30 }
 0x16d   :  { %6638 = vrot.lane.b32.xlu1 %v6637_v21, %s6936_s3  ;;  %v7354_v49 = vsel %vm823_vm3, %v833_v56, %v834_v43  ;;  %v744_v52 = vsel %vm732_vm2, %v742_v47, %v743_v20 }
 0x16e   :  { %v604_v51 = vmax.f32 %v588_v45, 0.0  ;;  %v6662_v53 = vpack.i.bf16 %v7354_v49, %v7329_v18  ;;  %v6652_v59 = vpack.i.bf16 %v744_v52, %v741_v16  ;;  %v425_v18 = vadd.f32 %v7262_v5, %v7231_v60 }
 0x16f   :  { %4896 = vmatmul.msk.f32.gmra.mxu2 %vm1164_vm4, %v7354_v49  ;;  %v445_v55 = vpop.f32.mrf.mxu0 }
 0x170   :  { %v638_v38 = vrot.slane %v604_v51, 7  ;;  %v446_v0 = vadd.f32 %v7262_v5, %v445_v55  ;;  %6653 = vrot.lane.b32.xlu0 %v6652_v59, %s6938_s30  ;;  %v428_v51 = vadd.f32 %v7262_v5, %v7241_v63  ;;  %v559_v55 = vmax.f32 %v380_v46, %v404_v24 }
 0x171   :  { %6648 = vrot.lane.b32.xlu2 %v6647_v57, %s6937_s29 }
 0x172   :  { %v7376_v2 = vsel %vm340_vm0, 0.0, %v638_v38  ;;  %v573_v4 = vmax.f32 %v422_v62, %v446_v0  ;;  %4875 = vmatmul.msk.f32.gmra.mxu0 %vm147_vm1, %v121_v61  ;;  %v689_v26 = vsel %vm340_vm0, %v638_v38, 0.0 }
 0x173   :  { %v746_v7 = vrot.slane %v689_v26, 1  ;;  %v836_v58 = vrot.slane %v7376_v2, 2  ;;  %v837_v8 = vrot.slane %v689_v26, 2  ;;  %v745_v9 = vrot.slane %v7376_v2, 1 }
 0x174   :  { %v589_v54 = vmax.f32 %v557_v1, %v573_v4  ;;  %v6667_v16 = vpack.i.bf16 %v7376_v2, %v7346_v37  ;;  %v407_v1 = vadd.f32 %v7262_v5, %v7199_v48 }
 0x175   :  { %6658 = vrot.lane.b32.xlu1 %v6652_v59, %s6932_s22  ;;  %v7384_v10 = vsel %vm823_vm3, %v836_v58, %v837_v8  ;;  %v747_v13 = vsel %vm732_vm2, %v745_v9, %v746_v7  ;;  %v124_v8 = vld [vmem:[%s10141_s24 + $0x178] sm:$0xff]  ;;  %v383_v9 = vadd.f32 %v7262_v5, %v7153_v32 }
 0x176   :  { %v605_v12 = vmax.f32 %v589_v54, 0.0  ;;  %v6677_v14 = vpack.i.bf16 %v7384_v10, %v7354_v49  ;;  %v6672_v21 = vpack.i.bf16 %v747_v13, %v744_v52  ;;  %v123_v49 = vld [vmem:[%s10141_s24 + $0x170] sm:$0xff] }
 0x177   :  { %4897 = vmatmul.msk.f32.gmra.mxu2 %vm1164_vm4, %v7384_v10  ;;  %v448_v15 = vpop.f32.mrf.mxu0 }
 0x178   :  { %v639_v23 = vrot.slane %v605_v12, 7  ;;  %v449_v25 = vadd.f32 %v7262_v5, %v448_v15  ;;  %6668 = vrot.lane.b32.xlu0 %v6667_v16, %s6933_s2  ;;  %v560_v12 = vmax.f32 %v383_v9, %v407_v1  ;;  %v1292_v1 = vld [vmem:[%s10122_s5 + $0x58] sm:$0xff]  ;;  %v1287_v9 = vld [vmem:[%s10122_s5 + $0x30] sm:$0xff] }
 0x179   :  { %6663 = vrot.lane.b32.xlu2 %v6662_v53, %s6934_s25 }
 0x17a   :  { %v7406_v40 = vsel %vm340_vm0, 0.0, %v639_v23  ;;  %v574_v29 = vmax.f32 %v425_v18, %v449_v25  ;;  %4876 = vmatmul.msk.f32.gmra.mxu0 %vm147_vm1, %v122_v19  ;;  %v690_v31 = vsel %vm340_vm0, %v639_v23, 0.0 }
 0x17b   :  { %v749_v28 = vrot.slane %v690_v31, 1  ;;  %v839_v33 = vrot.slane %v7406_v40, 2  ;;  %v840_v60 = vrot.slane %v690_v31, 2  ;;  %v748_v35 = vrot.slane %v7406_v40, 1  ;;  %v125_v31 = vld [vmem:[%s10141_s24 + $0x180] sm:$0xff] }
 0x17c   :  { %v590_v34 = vmax.f32 %v558_v27, %v574_v29  ;;  %v6682_v47 = vpack.i.bf16 %v7406_v40, %v7376_v2 }
 0x17d   :  { %6673 = vrot.lane.b32.xlu1 %v6672_v21, %s6936_s3  ;;  %v7414_v39 = vsel %vm823_vm3, %v839_v33, %v840_v60  ;;  %v750_v56 = vsel %vm732_vm2, %v748_v35, %v749_v28 }
 0x17e   :  { %v606_v20 = vmax.f32 %v590_v34, 0.0  ;;  %v6697_v43 = vpack.i.bf16 %v7414_v39, %v7384_v10  ;;  %v6687_v50 = vpack.i.bf16 %v750_v56, %v747_v13  ;;  %v431_v10 = vadd.f32 %v7262_v5, %v7253_v3 }
 0x17f   :  { %4898 = vmatmul.msk.f32.gmra.mxu2 %vm1164_vm4, %v7414_v39  ;;  %v451_v45 = vpop.f32.mrf.mxu0 }
 0x180   :  { %v640_v52 = vrot.slane %v606_v20, 7  ;;  %v452_v53 = vadd.f32 %v7262_v5, %v451_v45  ;;  %6683 = vrot.lane.b32.xlu0 %v6682_v47, %s6937_s29 }
 0x181   :  { %6678 = vrot.lane.b32.xlu2 %v6677_v14, %s6935_s26 }
 0x182   :  { %v7436_v57 = vsel %vm340_vm0, 0.0, %v640_v52  ;;  %v575_v59 = vmax.f32 %v428_v51, %v452_v53  ;;  %4877 = vmatmul.msk.f32.gmra.mxu0 %vm147_vm1, %v123_v49  ;;  %v691_v61 = vsel %vm340_vm0, %v640_v52, 0.0 }
 0x183   :  { %v752_v30 = vrot.slane %v691_v61, 1  ;;  %v842_v42 = vrot.slane %v7436_v57, 2  ;;  %v843_v63 = vrot.slane %v691_v61, 2  ;;  %v751_v38 = vrot.slane %v7436_v57, 1  ;;  %v128_v61 = vld [vmem:[%s10141_s24 + $0x198] sm:$0xff] }
 0x184   :  { %v591_v62 = vmax.f32 %v559_v55, %v575_v59  ;;  %v6702_v32 = vpack.i.bf16 %v7436_v57, %v7406_v40  ;;  %v127_v55 = vld [vmem:[%s10141_s24 + $0x190] sm:$0xff] }
 0x185   :  { %6688 = vrot.lane.b32.xlu1 %v6687_v50, %s6938_s30  ;;  %v844_v0 = vsel %vm823_vm3, %v842_v42, %v843_v63  ;;  %v753_v26 = vsel %vm732_vm2, %v751_v38, %v752_v30  ;;  %v1296_v30 = vld [vmem:[%s10122_s5 + $0x78] sm:$0xff]  ;;  %v1295_v42 = vld [vmem:[%s10122_s5 + $0x70] sm:$0xff]  ;;  %v1294_v63 = vld [vmem:[%s10122_s5 + $0x68] sm:$0xff] }
 0x186   :  { %v607_v4 = vmax.f32 %v591_v62, 0.0  ;;  %v6712_v7 = vpack.i.bf16 %v844_v0, %v7414_v39  ;;  %v6707_v54 = vpack.i.bf16 %v753_v26, %v750_v56  ;;  %1333 = vmatpush.msra.mxu1 %v1296_v30  ;;  %v1293_v62 = vld [vmem:[%s10122_s5 + $0x60] sm:$0xff] }
 0x187   :  { %4899 = vmatmul.msk.f32.gmra.mxu2 %vm1164_vm4, %v844_v0  ;;  %v454_v58 = vpop.f32.mrf.mxu0 }
 0x188   :  { %v641_v48 = vrot.slane %v607_v4, 7  ;;  %v455_v11 = vadd.f32 %v7262_v5, %v454_v58  ;;  %6698 = vrot.lane.b32.xlu0 %v6697_v43, %s6934_s25  ;;  %1334 = vmatpush.msra.mxu1 %v1295_v42  ;;  %v1291_v4 = vld [vmem:[%s10122_s5 + $0x50] sm:$0xff] }
 0x189   :  { %6693 = vrot.lane.b32.xlu2 %v6687_v50, %s6932_s22  ;;  %v126_v50 = vld [vmem:[%s10141_s24 + $0x188] sm:$0xff] }
 0x18a   :  { %v7460_v13 = vsel %vm340_vm0, 0.0, %v641_v48  ;;  %v576_v14 = vmax.f32 %v431_v10, %v455_v11  ;;  %4878 = vmatmul.msk.f32.gmra.mxu0 %vm147_vm1, %v124_v8  ;;  %v692_v15 = vsel %vm340_vm0, %v641_v48, 0.0  ;;  %1335 = vmatpush.msra.mxu1 %v1294_v63  ;;  %v130_v8 = vld [vmem:[%s10141_s24 + $0x1a8] sm:$0xff]  ;;  %v1285_v48 = vld [vmem:[%s10122_s5 + $0x20] sm:$0xff] }
 0x18b   :  { %v755_v3 = vrot.slane %v692_v15, 1  ;;  %v845_v16 = vrot.slane %v7460_v13, 2  ;;  %v846_v19 = vrot.slane %v692_v15, 2  ;;  %v754_v44 = vrot.slane %v7460_v13, 1  ;;  %v1286_v10 = vld [vmem:[%s10122_s5 + $0x28] sm:$0xff]  ;;  %v1283_v15 = vld [vmem:[%s10122_s5 + $0x10] sm:$0xff] }
 0x18c   :  { %v592_v21 = vmax.f32 %v560_v12, %v576_v14  ;;  %v6717_v35 = vpack.i.bf16 %v7460_v13, %v7436_v57  ;;  %1336 = vmatpush.msra.mxu1 %v1293_v62  ;;  %v131_v12 = vld [vmem:[%s10141_s24 + $0x1b0] sm:$0xff]  ;;  %v1284_v14 = vld [vmem:[%s10122_s5 + $0x18] sm:$0xff] }
 0x18d   :  { %6703 = vrot.lane.b32.xlu1 %v6702_v32, %s6933_s2  ;;  %v847_v18 = vsel %vm823_vm3, %v845_v16, %v846_v19  ;;  %v756_v25 = vsel %vm732_vm2, %v754_v44, %v755_v3  ;;  %v1282_v32 = vld [vmem:[%s10122_s5 + $0x8] sm:$0xff]  ;;  %v1281_v3 = vld [vmem:[%s10122_s5] sm:$0xff] }
 0x18e   :  { %v608_v23 = vmax.f32 %v592_v21, 0.0  ;;  %v6732_v27 = vpack.i.bf16 %v847_v18, %v844_v0  ;;  %v6722_v28 = vpack.i.bf16 %v756_v25, %v753_v26  ;;  %v129_v0 = vld [vmem:[%s10141_s24 + $0x1a0] sm:$0xff]  ;;  %1337 = vmatpush.msra.mxu1 %v1292_v1  ;;  %v1290_v26 = vld [vmem:[%s10122_s5 + $0x48] sm:$0xff]  ;;  %v132_v21 = vld [vmem:[%s10141_s24 + $0x1b8] sm:$0xff] }
 0x18f   :  { %4900 = vmatmul.msk.f32.gmra.mxu2 %vm1164_vm4, %v847_v18  ;;  %v7472_v29 = vpop.f32.mrf.mxu0 }
 0x190   :  { %v642_v33 = vrot.slane %v608_v23, 7  ;;  %6713 = vrot.lane.b32.xlu0 %v6712_v7, %s6935_s26  ;;  %1338 = vmatpush.msra.mxu1 %v1291_v4  ;;  %v1289_v7 = vld [vmem:[%s10122_s5 + $0x40] sm:$0xff] }
 0x191   :  { %6708 = vrot.lane.b32.xlu2 %v6707_v54, %s6936_s3  ;;  %v1288_v54 = vld [vmem:[%s10122_s5 + $0x38] sm:$0xff]  ;;  %s10143_s5 = sld [smem:[#allocation10_spill]] }
 0x192   :  { %v676_v60 = vsel %vm340_vm0, 0.0, %v642_v33  ;;  %4879 = vmatmul.msk.f32.gmra.mxu0 %vm147_vm1, %v125_v31  ;;  %v693_v34 = vsel %vm340_vm0, %v642_v33, 0.0  ;;  %1339 = vmatpush.msra.mxu1 %v1290_v26 }
 0x193   :  { %v967_v39 = vrot.slane %v693_v34, 1  ;;  %v1020_v24 = vrot.slane %v676_v60, 2  ;;  %v1021_v20 = vrot.slane %v693_v34, 2  ;;  %v966_v56 = vrot.slane %v676_v60, 1 }
 0x194   :  { %v6737_v53 = vpack.i.bf16 %v676_v60, %v7460_v13  ;;  %v6742_v59 = vpack.i.bf16 %v7274_v17, %v676_v60  ;;  %1340 = vmatpush.msra.mxu1 %v1289_v7 }
 0x195   :  { %6718 = vrot.lane.b32.xlu1 %v6717_v35, %s6937_s29  ;;  %v1022_v43 = vsel %vm823_vm3, %v1020_v24, %v1021_v20  ;;  %v968_v47 = vsel %vm732_vm2, %v966_v56, %v967_v39 }
 0x196   :  { %v6752_v45 = vpack.i.bf16 %v1022_v43, %v847_v18  ;;  %v6747_v46 = vpack.i.bf16 %v968_v47, %v756_v25  ;;  %v6757_v51 = vpack.i.bf16 %v7293_v41, %v968_v47  ;;  %1341 = vmatpush.msra.mxu1 %v1288_v54  ;;  %v133_v18 = vld [vmem:[%s10141_s24 + $0x1c0] sm:$0xff] }
 0x197   :  { %4901 = vmatmul.msk.f32.gmra.mxu2 %vm1164_vm4, %v1022_v43  ;;  %v7488_v49 = vpop.f32.mrf.mxu0 }
 0x198   :  { %6728 = vrot.lane.b32.xlu0 %v6722_v28, %s6932_s22  ;;  %1342 = vmatpush.msra.mxu1 %v1287_v9 }
 0x199   :  { %6723 = vrot.lane.b32.xlu2 %v6722_v28, %s6938_s30  ;;  %v134_v28 = vld [vmem:[%s10141_s24 + $0x1c8] sm:$0xff] }
 0x19a   :  { %4880 = vmatmul.msk.f32.gmra.mxu0 %vm147_vm1, %v126_v50  ;;  %1343 = vmatpush.msra.mxu1 %v1286_v10  ;;  %v135_v50 = vld [vmem:[%s10141_s24 + $0x1d0] sm:$0xff]  ;;  %v136_v10 = vld [vmem:[%s10141_s24 + $0x1d8] sm:$0xff] }
 0x19c   :  { %1344 = vmatpush.msra.mxu1 %v1285_v48 }
 0x19d   :  { %6733 = vrot.lane.b32.xlu1 %v6732_v27, %s6934_s25 }
 0x19e   :  { %1345 = vmatpush.msra.mxu1 %v1284_v14 }
 0x19f   :  { %v7498_v52 = vpop.f32.mrf.mxu0  ;;  %4902 = vmatmul.msk.f32.gmra.mxu2 %vm1164_vm4, %v7312_v6 }
 0x1a0   :  { %6748 = vrot.lane.b32.xlu0 %v6747_v46, %s6936_s3  ;;  %1346 = vmatpush.msra.mxu1 %v1283_v15 }
 0x1a1   :  { %6738 = vrot.lane.b32.xlu2 %v6737_v53, %s6933_s2 }
 0x1a2   :  { %4881 = vmatmul.msk.f32.gmra.mxu0 %vm147_vm1, %v127_v55  ;;  %1347 = vmatpush.msra.mxu1 %v1282_v32 }
 0x1a4   :  { %1348 = vmatpush.msra.mxu1 %v1281_v3 }
 0x1a5   :  { %6753 = vrot.lane.b32.xlu1 %v6752_v45, %s6935_s26 }
 0x1a7   :  { %v7510_v41 = vpop.f32.mrf.mxu0 }
 0x1a8   :  { %6758 = vrot.lane.b32.xlu0 %v6757_v51, %s6938_s30 }
 0x1a9   :  { %6743 = vrot.lane.b32.xlu2 %v6742_v59, %s6937_s29 }
 0x1aa   :  { %4882 = vmatmul.msk.f32.gmra.mxu0 %vm147_vm1, %v128_v61 }
 0x1af   :  { %v7531_v38 = vpop.f32.mrf.mxu0 }
 0x1b2   :  { %4883 = vmatmul.msk.f32.gmra.mxu0 %vm147_vm1, %v129_v0 }
 0x1b7   :  { %v7549_v58 = vpop.f32.mrf.mxu0 }
 0x1ba   :  { %4884 = vmatmul.msk.f32.gmra.mxu0 %vm147_vm1, %v130_v8 }
 0x1bf   :  { %v7567_v11 = vpop.f32.mrf.mxu0 }
 0x1c2   :  { %4885 = vmatmul.msk.f32.gmra.mxu0 %vm147_vm1, %v131_v12 }
 0x1c3   :  { %v6644_v16 = vpop.permute.xlu2 %6643 }
 0x1c4   :  { %v6646_v7 = vunpack.i.h.bf16 %v6644_v16 }
 0x1c7   :  { %v7585_v19 = vpop.f32.mrf.mxu0 }
 0x1ca   :  { %4886 = vmatmul.msk.f32.gmra.mxu0 %vm147_vm1, %v132_v21 }
 0x1cb   :  { %v6649_v23 = vpop.permute.xlu2 %6648 }
 0x1cc   :  { %v6650_v42 = vunpack.i.l.bf16 %v6649_v23  ;;  %v6651_v14 = vunpack.i.h.bf16 %v6649_v23 }
 0x1cf   :  { %v7591_v44 = vpop.f32.mrf.mxu0 }
 0x1d2   :  { %4887 = vmatmul.msk.f32.gmra.mxu0 %vm147_vm1, %v133_v18  ;;  %v6624_v25 = vpop.permute.xlu0 %6623 }
 0x1d3   :  { %v6625_v33 = vunpack.i.l.bf16 %v6624_v25  ;;  %v7602_v60 = vpop.permute.xlu2 %6663  ;;  %v6626_v39 = vunpack.i.h.bf16 %v6624_v25 }
 0x1d4   :  { %v6665_v21 = vunpack.i.l.bf16 %v7602_v60 }
 0x1d5   :  { %v1165_v24 = vsel %vm1164_vm4, %v7274_v17, %v6625_v33  ;;  %v1166_v46 = vsel %vm1164_vm4, %v7288_v36, %v6626_v39  ;;  %v6645_v17 = vunpack.i.l.bf16 %v6644_v16 }
 0x1d7   :  { %v7597_v27 = vpop.f32.mrf.mxu0  ;;  %v6634_v31 = vpop.permute.xlu1 %6633 }
 0x1d8   :  { %v6635_v43 = vunpack.i.l.bf16 %v6634_v31  ;;  %v6636_v61 = vunpack.i.h.bf16 %v6634_v31 }
 0x1da   :  { %4888 = vmatmul.msk.f32.gmra.mxu0 %vm147_vm1, %v134_v28  ;;  %v6629_v34 = vpop.permute.xlu0 %6628 }
 0x1db   :  { %v6630_v35 = vunpack.i.l.bf16 %v6629_v34  ;;  %v6631_v20 = vunpack.i.h.bf16 %v6629_v34  ;;  %v6679_v36 = vpop.permute.xlu2 %6678  ;;  %v137_v34 = vld [vmem:[%s10141_s24 + $0x1e0] sm:$0xff] }
 0x1dd   :  { %v7608_v56 = vsel %vm1180_vm5, %v1165_v24, %v6630_v35  ;;  %v1182_v53 = vsel %vm1180_vm5, %v1166_v46, %v6631_v20 }
 0x1de   :  { %v1197_v59 = vsel %vm1196_vm6, %v7608_v56, %v6635_v43  ;;  %v1198_v0 = vsel %vm1196_vm6, %v1182_v53, %v6636_v61  ;;  %v6680_v43 = vunpack.i.l.bf16 %v6679_v36 }
 0x1df   :  { %v7610_v45 = vpop.f32.mrf.mxu0  ;;  %v6639_v47 = vpop.permute.xlu1 %6638 }
 0x1e0   :  { %v6640_v51 = vunpack.i.l.bf16 %v6639_v47  ;;  %v6641_v55 = vunpack.i.h.bf16 %v6639_v47 }
 0x1e2   :  { %v1214_v30 = vsel %vm1213_vm7, %v1197_v59, %v6640_v51  ;;  %4889 = vmatmul.msk.f32.gmra.mxu0 %vm147_vm1, %v135_v50  ;;  %v6654_v63 = vpop.permute.xlu0 %6653  ;;  %v1215_v4 = vsel %vm1213_vm7, %v1198_v0, %v6641_v55  ;;  %v6666_v50 = vunpack.i.h.bf16 %v7602_v60 }
 0x1e3   :  { %v1231_v62 = vsel %vm1230_vm8, %v1214_v30, %v6645_v17  ;;  %v6655_v1 = vunpack.i.l.bf16 %v6654_v63  ;;  %v1232_v12 = vsel %vm1230_vm8, %v1215_v4, %v6646_v7  ;;  %v6656_v15 = vunpack.i.h.bf16 %v6654_v63  ;;  %v6694_v18 = vpop.permute.xlu2 %6693  ;;  %v138_v30 = vld [vmem:[%s10141_s24 + $0x1e8] sm:$0xff] }
 0x1e4   :  { %v1248_v26 = vsel %vm1247_vm9, %v1231_v62, %v6650_v42  ;;  %v1249_v3 = vsel %vm1247_vm9, %v1232_v12, %v6651_v14  ;;  %v6681_v4 = vunpack.i.h.bf16 %v6679_v36  ;;  %v139_v14 = vld [vmem:[%s10141_s24 + $0x1f0] sm:$0xff] }
 0x1e5   :  { %v1265_v8 = vsel %vm1264_vm10, %v1248_v26, %v6655_v1  ;;  %v1266_v31 = vsel %vm1264_vm10, %v1249_v3, %v6656_v15  ;;  %v6695_v26 = vunpack.i.l.bf16 %v6694_v18 }
 0x1e6   :  { %1349 = vmatmul.f32.vlgmr.msra.gmra.mxu1 %v1265_v8 }
 0x1e7   :  { %v7627_v54 = vpop.f32.mrf.mxu0  ;;  %v6659_v9 = vpop.permute.xlu1 %6658 }
 0x1e8   :  { %v6660_v48 = vunpack.i.l.bf16 %v6659_v9  ;;  %v6661_v35 = vunpack.i.h.bf16 %v6659_v9 }
 0x1ea   :  { %4890 = vmatmul.msk.f32.gmra.mxu0 %vm147_vm1, %v136_v10  ;;  %v6669_v32 = vpop.permute.xlu0 %6668  ;;  %v1167_v16 = vsel %vm1164_vm4, %v7315_v22, %v6660_v48  ;;  %v1168_v47 = vsel %vm1164_vm4, %v7346_v37, %v6661_v35 }
 0x1eb   :  { %v6670_v25 = vunpack.i.l.bf16 %v6669_v32  ;;  %v1183_v28 = vsel %vm1180_vm5, %v1167_v16, %v6665_v21  ;;  %v6671_v51 = vunpack.i.h.bf16 %v6669_v32  ;;  %v1184_v53 = vsel %vm1180_vm5, %v1168_v47, %v6666_v50  ;;  %v6709_v42 = vpop.permute.xlu2 %6708 }
 0x1ec   :  { %v1169_v32 = vsel %vm1164_vm4, %v7376_v2, %v6695_v26 }
 0x1ed   :  { %v1199_v22 = vsel %vm1196_vm6, %v1183_v28, %v6670_v25  ;;  %v1200_v60 = vsel %vm1196_vm6, %v1184_v53, %v6671_v51  ;;  %v6696_v25 = vunpack.i.h.bf16 %v6694_v18  ;;  %v6711_v53 = vunpack.i.h.bf16 %v6709_v42 }
 0x1ee   :  { %1352 = vmatmul.f32.gmra.mxu1 %v1266_v31 }
 0x1ef   :  { %v7640_v33 = vpop.f32.mrf.mxu0  ;;  %v6674_v23 = vpop.permute.xlu1 %6673 }
 0x1f0   :  { %v6675_v39 = vunpack.i.l.bf16 %v6674_v23  ;;  %v6676_v55 = vunpack.i.h.bf16 %v6674_v23  ;;  %v6710_v23 = vunpack.i.l.bf16 %v6709_v42 }
 0x1f2   :  { %4891 = vmatmul.msk.f32.gmra.mxu0 %vm147_vm1, %v137_v34  ;;  %v1216_v24 = vsel %vm1213_vm7, %v1199_v22, %v6675_v39  ;;  %v6684_v20 = vpop.permute.xlu0 %6683  ;;  %v1217_v0 = vsel %vm1213_vm7, %v1200_v60, %v6676_v55  ;;  %v1170_v22 = vsel %vm1164_vm4, %v7406_v40, %v6696_v25 }
 0x1f3   :  { %v6685_v46 = vunpack.i.l.bf16 %v6684_v20  ;;  %v1233_v17 = vsel %vm1230_vm8, %v1216_v24, %v6680_v43  ;;  %v6686_v7 = vunpack.i.h.bf16 %v6684_v20  ;;  %v1234_v10 = vsel %vm1230_vm8, %v1217_v0, %v6681_v4  ;;  %v6724_v36 = vpop.permute.xlu2 %6723 }
 0x1f4   :  { %v7681_v43 = vadd.f32 %v7262_v5, %v7585_v19 }
 0x1f5   :  { %v1250_v37 = vsel %vm1247_vm9, %v1233_v17, %v6685_v46  ;;  %v1251_v3 = vsel %vm1247_vm9, %v1234_v10, %v6686_v7  ;;  %v6725_v46 = vunpack.i.l.bf16 %v6724_v36  ;;  %v6726_v7 = vunpack.i.h.bf16 %v6724_v36 }
 0x1f7   :  { %v7653_v59 = vpop.f32.mrf.mxu0  ;;  %v6689_v61 = vpop.permute.xlu1 %6688 }
 0x1f8   :  { %v6690_v63 = vunpack.i.l.bf16 %v6689_v61  ;;  %v6691_v8 = vunpack.i.h.bf16 %v6689_v61 }
 0x1fa   :  { %4892 = vmatmul.msk.f32.gmra.mxu0 %vm147_vm1, %v138_v30  ;;  %v1267_v62 = vsel %vm1264_vm10, %v1250_v37, %v6690_v63  ;;  %v6699_v1 = vpop.permute.xlu0 %6698  ;;  %v1268_v21 = vsel %vm1264_vm10, %v1251_v3, %v6691_v8 }
 0x1fb   :  { %1355 = vmatmul.f32.gmra.mxu1 %v1267_v62  ;;  %v6700_v9 = vunpack.i.l.bf16 %v6699_v1  ;;  %v6701_v34 = vunpack.i.h.bf16 %v6699_v1  ;;  %v6739_v63 = vpop.permute.xlu2 %6738 }
 0x1fd   :  { %v1185_v16 = vsel %vm1180_vm5, %v1169_v32, %v6700_v9  ;;  %v1186_v18 = vsel %vm1180_vm5, %v1170_v22, %v6701_v34 }
 0x1ff   :  { %v7664_v48 = vpop.f32.mrf.mxu0  ;;  %v6704_v12 = vpop.permute.xlu1 %6703 }
 0x200   :  { %v6705_v15 = vunpack.i.l.bf16 %v6704_v12  ;;  %v6706_v35 = vunpack.i.h.bf16 %v6704_v12 }
 0x202   :  { %4893 = vmatmul.msk.f32.gmra.mxu0 %vm147_vm1, %v139_v14  ;;  %v1201_v31 = vsel %vm1196_vm6, %v1185_v16, %v6705_v15  ;;  %v6714_v28 = vpop.permute.xlu0 %6713  ;;  %v1202_v51 = vsel %vm1196_vm6, %v1186_v18, %v6706_v35  ;;  %v6740_v14 = vunpack.i.l.bf16 %v6739_v63  ;;  %v6741_v35 = vunpack.i.h.bf16 %v6739_v63 }
 0x203   :  { %1358 = vmatmul.f32.gmra.mxu1 %v1268_v21  ;;  %v6715_v39 = vunpack.i.l.bf16 %v6714_v28  ;;  %v1218_v2 = vsel %vm1213_vm7, %v1201_v31, %v6710_v23  ;;  %v6716_v61 = vunpack.i.h.bf16 %v6714_v28  ;;  %v1219_v60 = vsel %vm1213_vm7, %v1202_v51, %v6711_v53  ;;  %v7700_v16 = vpop.permute.xlu2 %6743 }
 0x204   :  { %v6745_v28 = vunpack.i.l.bf16 %v7700_v16  ;;  %v6746_v51 = vunpack.i.h.bf16 %v7700_v16  ;;  %vm1903_vm1 = vcmask 1045509  }
 0x205   :  { %v1235_v17 = vsel %vm1230_vm8, %v1218_v2, %v6715_v39  ;;  %v1236_v4 = vsel %vm1230_vm8, %v1219_v60, %v6716_v61 }
 0x207   :  { %v502_v24 = vpop.f32.mrf.mxu0  ;;  %v6719_v20 = vpop.permute.xlu1 %6718 }
 0x208   :  { %v7685_v47 = vadd.f32 %v7262_v5, %v502_v24  ;;  %v6720_v50 = vunpack.i.l.bf16 %v6719_v20  ;;  %v6721_v37 = vunpack.i.h.bf16 %v6719_v20 }
 0x20a   :  { %v568_v40 = vmax.f32 %v7681_v43, %v7685_v47  ;;  %v1252_v55 = vsel %vm1247_vm9, %v1235_v17, %v6720_v50  ;;  %v6729_v19 = vpop.permute.xlu0 %6728  ;;  %v1253_v26 = vsel %vm1247_vm9, %v1236_v4, %v6721_v37  ;;  %v550_v37 = vpop.f32.mrf.mxu2 }
 0x20b   :  { %v1269_v30 = vsel %vm1264_vm10, %v1252_v55, %v6725_v46  ;;  %v6730_v62 = vunpack.i.l.bf16 %v6729_v19  ;;  %v1270_v12 = vsel %vm1264_vm10, %v1253_v26, %v6726_v7  ;;  %v6731_v15 = vunpack.i.h.bf16 %v6729_v19 }
 0x20c   :  { %1361 = vmatmul.f32.gmra.mxu1 %v1269_v30  ;;  %v551_v60 = vadd.f32 %v7262_v5, %v550_v37  ;;  %v482_v26 = vadd.f32 %v7262_v5, %v7591_v44 }
 0x20d   :  { %v1171_v8 = vsel %vm1164_vm4, %v7436_v57, %v6730_v62  ;;  %v1172_v36 = vsel %vm1164_vm4, %v7460_v13, %v6731_v15 }
 0x20f   :  { %v505_v0 = vpop.f32.mrf.mxu0  ;;  %v6734_v1 = vpop.permute.xlu1 %6733 }
 0x210   :  { %v6735_v42 = vunpack.i.l.bf16 %v6734_v1  ;;  %v6736_v32 = vunpack.i.h.bf16 %v6734_v1 }
 0x212   :  { %v1187_v9 = vsel %vm1180_vm5, %v1171_v8, %v6735_v42  ;;  %v6749_v10 = vpop.permute.xlu0 %6748  ;;  %v1188_v23 = vsel %vm1180_vm5, %v1172_v36, %v6736_v32  ;;  %v458_v8 = vadd.f32 %v7262_v5, %v7472_v29  ;;  %v485_v32 = vadd.f32 %v7262_v5, %v7597_v27 }
 0x213   :  { %v6750_v3 = vunpack.i.l.bf16 %v6749_v10  ;;  %v1203_v21 = vsel %vm1196_vm6, %v1187_v9, %v6740_v14  ;;  %v6751_v2 = vunpack.i.h.bf16 %v6749_v10  ;;  %v1204_v20 = vsel %vm1196_vm6, %v1188_v23, %v6741_v35 }
 0x214   :  { %1364 = vmatmul.f32.gmra.mxu1 %v1270_v12  ;;  %v506_v9 = vadd.f32 %v7262_v5, %v505_v0  ;;  %v561_v12 = vmax.f32 %v458_v8, %v482_v26 }
 0x215   :  { %v1220_v34 = vsel %vm1213_vm7, %v1203_v21, %v6750_v3  ;;  %v1221_v47 = vsel %vm1213_vm7, %v1204_v20, %v6751_v2  ;;  %v461_v21 = vadd.f32 %v7262_v5, %v7488_v49  ;;  %v7758_v49 = vld [vmem:[%s10121_s4] ss:$0 sm:$0xff] }
 0x217   :  { %v508_v25 = vpop.f32.mrf.mxu0  ;;  %v6754_v31 = vpop.permute.xlu1 %6753  ;;  %v562_v29 = vmax.f32 %v461_v21, %v485_v32 }
 0x218   :  { %v6755_v57 = vunpack.i.l.bf16 %v6754_v31  ;;  %v6756_v43 = vunpack.i.h.bf16 %v6754_v31  ;;  %v509_v44 = vadd.f32 %v7262_v5, %v508_v25  ;;  %v464_v25 = vadd.f32 %v7758_v49, %v7498_v52 }
 0x21a   :  { %v1237_v39 = vsel %vm1230_vm8, %v1220_v34, %v6755_v57  ;;  %v7709_v22 = vpop.permute.xlu0 %6758  ;;  %v1238_v46 = vsel %vm1230_vm8, %v1221_v47, %v6756_v43  ;;  %v7767_v43 = vld [vmem:[%s10123_s6] ss:$0 sm:$0xff] }
 0x21b   :  { %v1254_v24 = vsel %vm1247_vm9, %v1237_v39, %v6745_v28  ;;  %v6760_v13 = vunpack.i.l.bf16 %v7709_v22  ;;  %v6761_v17 = vunpack.i.h.bf16 %v7709_v22  ;;  %v1255_v53 = vsel %vm1247_vm9, %v1238_v46, %v6746_v51 }
 0x21c   :  { %v488_v28 = vadd.f32 %v7262_v5, %v7610_v45  ;;  %v1415_v45 = vpop.f32.mrf.mxu2 }
 0x21d   :  { %v1271_v18 = vsel %vm1264_vm10, %v1254_v24, %v6760_v13  ;;  %v1272_v55 = vsel %vm1264_vm10, %v1255_v53, %v6761_v17 }
 0x21e   :  { %1367 = vmatmul.f32.gmra.mxu1 %v1271_v18  ;;  %v563_v47 = vmax.f32 %v464_v25, %v488_v28 }
 0x21f   :  { %v511_v50 = vpop.f32.mrf.mxu0 }
 0x220   :  { %v512_v39 = vadd.f32 %v7758_v49, %v511_v50 }
 0x226   :  { %1370 = vmatmul.f32.gmra.mxu1 %v1272_v55 }
 0x227   :  { %v7725_v61 = vpop.f32.mrf.mxu0 }
 0x228   :  { %v515_v21 = vadd.f32 %v7758_v49, %v7725_v61 }
 0x22f   :  { %v7727_v19 = vpop.f32.mrf.mxu0 }
 0x237   :  { %v7729_v30 = vpop.f32.mrf.mxu0 }
 0x23f   :  { %v7731_v63 = vpop.f32.mrf.mxu0 }
 0x247   :  { %v526_v62 = vpop.f32.mrf.mxu0 }
 0x248   :  { %v527_v1 = vadd.f32 %v7262_v5, %v526_v62  ;;  %v491_v62 = vadd.f32 %v7758_v49, %v7627_v54 }
 0x24a   :  { %v584_v4 = vmax.f32 %v527_v1, %v551_v60 }
 0x24c   :  { %v7735_v42 = vmax.f32 %v568_v40, %v584_v4 }
 0x24f   :  { %v529_v7 = vpop.f32.mrf.mxu0 }
 0x250   :  { %v530_v10 = vadd.f32 %v7262_v5, %v529_v7 }
 0x252   :  { %v577_v14 = vmax.f32 %v506_v9, %v530_v10 }
 0x254   :  { %v593_v15 = vmax.f32 %v561_v12, %v577_v14 }
 0x256   :  { %v609_v3 = vmax.f32 %v593_v15, 0.0 }
 0x257   :  { %v532_v40 = vpop.f32.mrf.mxu0 }
 0x258   :  { %v533_v31 = vadd.f32 %v7262_v5, %v532_v40  ;;  %v643_v36 = vrot.slane %v609_v3, 7  ;;  %v467_v40 = vadd.f32 %v7758_v49, %v7510_v41  ;;  %v7804_v41 = vadd.f32 %v7758_v49, %v7664_v48 }
 0x259   :  { %v616_v48 = vmax.f32 %v7735_v42, 0.0 }
 0x25a   :  { %v578_v0 = vmax.f32 %v509_v44, %v533_v31  ;;  %v7752_v23 = vsel %vm340_vm0, 0.0, %v643_v36  ;;  %v694_v27 = vsel %vm340_vm0, %v643_v36, 0.0  ;;  %v494_v36 = vadd.f32 %v7758_v49, %v7640_v33 }
 0x25b   :  { %v758_v24 = vrot.slane %v694_v27, 1  ;;  %v849_v20 = vrot.slane %v694_v27, 2  ;;  %v757_v13 = vrot.slane %v7752_v23, 1  ;;  %v848_v18 = vrot.slane %v7752_v23, 2  ;;  %v1418_v27 = vpop.f32.mrf.mxu2 }
 0x25c   :  { %v594_v57 = vmax.f32 %v562_v29, %v578_v0  ;;  %v470_v29 = vadd.f32 %v7758_v49, %v7531_v38  ;;  %v7800_v0 = vadd.f32 %v7758_v49, %v7653_v59  ;;  %v564_v61 = vmax.f32 %v467_v40, %v491_v62 }
 0x25d   :  { %v759_v9 = vsel %vm732_vm2, %v757_v13, %v758_v24  ;;  %v850_v10 = vsel %vm823_vm3, %v848_v18, %v849_v20  ;;  %v7813_v33 = vadd.f32 %v7758_v49, %v7549_v58  ;;  %v7817_v59 = vadd.f32 %v7758_v49, %v7567_v11 }
 0x25e   :  { %v610_v34 = vmax.f32 %v594_v57, 0.0  ;;  %v518_v11 = vadd.f32 %v7758_v49, %v7727_v19 }
 0x25f   :  { %v535_v35 = vpop.f32.mrf.mxu0  ;;  %v566_v58 = vmax.f32 %v7813_v33, %v7800_v0  ;;  %v567_v24 = vmax.f32 %v7817_v59, %v7804_v41 }
 0x260   :  { %v644_v2 = vrot.slane %v610_v34, 7  ;;  %v536_v5 = vadd.f32 %v7758_v49, %v535_v35 }
 0x262   :  { %v7772_v52 = vsel %vm340_vm0, 0.0, %v644_v2  ;;  %v579_v50 = vmax.f32 %v512_v39, %v536_v5  ;;  %v695_v46 = vsel %vm340_vm0, %v644_v2, 0.0 }
 0x263   :  { %v6762_v53 = vpack.i.bf16 %v7772_v52, %v7752_v23  ;;  %v761_v55 = vrot.slane %v695_v46, 1  ;;  %v851_v37 = vrot.slane %v7772_v52, 2  ;;  %v852_v60 = vrot.slane %v695_v46, 2  ;;  %v1350_v4 = vpop.f32.mrf.mxu1 }
 0x264   :  { %v595_v1 = vmax.f32 %v563_v47, %v579_v50  ;;  %v760_v26 = vrot.slane %v7772_v52, 1  ;;  %v1351_v7 = vadd.f32 %v7767_v43, %v1350_v4  ;;  %v7835_v47 = vadd.f32 %v7758_v49, %v7729_v30 }
 0x265   :  { %6763 = vrot.lane.b32.xlu1 %v6762_v53, %s6933_s2  ;;  %v853_v8 = vsel %vm823_vm3, %v851_v37, %v852_v60  ;;  %v7839_v50 = vadd.f32 %v7758_v49, %v7731_v63  ;;  %v7841_v46 = vrot.slane %v616_v48, 7 }
 0x266   :  { %v611_v12 = vmax.f32 %v595_v1, 0.0  ;;  %4903 = vmatmul.msk.f32.gmra.mxu2 %vm1164_vm4, %v853_v8  ;;  %v762_v14 = vsel %vm732_vm2, %v760_v26, %v761_v55  ;;  %v6772_v54 = vpack.i.bf16 %v853_v8, %v850_v10  ;;  %v1416_v15 = vadd.f32 %v1415_v45, %v1351_v7 }
 0x267   :  { %v538_v32 = vpop.f32.mrf.mxu0  ;;  %v6767_v3 = vpack.i.bf16 %v762_v14, %v759_v9  ;;  %v565_v45 = vmax.f32 %v470_v29, %v494_v36 }
 0x268   :  { %v645_v44 = vrot.slane %v611_v12, 7  ;;  %v539_v31 = vadd.f32 %v7758_v49, %v538_v32  ;;  %6773 = vrot.lane.b32.xlu0 %v6772_v54, %s6935_s26  ;;  %v7820_v34 = vmax.f32 %v1416_v15, 0.0 }
 0x269   :  { %6768 = vrot.lane.b32.xlu2 %v6767_v3, %s6936_s3 }
 0x26a   :  { %v7808_v57 = vsel %vm340_vm0, 0.0, %v645_v44  ;;  %v580_v28 = vmax.f32 %v515_v21, %v539_v31  ;;  %v696_v38 = vsel %vm340_vm0, %v645_v44, 0.0  ;;  %v1495_v19 = vrot.slane %v7820_v34, 2  ;;  %v1421_v21 = vpop.f32.mrf.mxu2 }
 0x26b   :  { %v1353_v25 = vpop.f32.mrf.mxu1  ;;  %v764_v39 = vrot.slane %v696_v38, 1  ;;  %v854_v2 = vrot.slane %v7808_v57, 2  ;;  %v855_v5 = vrot.slane %v696_v38, 2  ;;  %v763_v18 = vrot.slane %v7808_v57, 1 }
 0x26c   :  { %v596_v35 = vmax.f32 %v564_v61, %v580_v28  ;;  %v1354_v20 = vadd.f32 %v7767_v43, %v1353_v25  ;;  %v1496_v30 = vrot.slane %v7820_v34, 4  ;;  %v1497_v63 = vrot.slane %v7820_v34, 6 }
 0x26d   :  { %6783 = vrot.lane.b32.xlu1 %v6772_v54, %s6934_s25  ;;  %v856_v13 = vsel %vm823_vm3, %v854_v2, %v855_v5  ;;  %v765_v62 = vsel %vm732_vm2, %v763_v18, %v764_v39  ;;  %v4911_v1 = vrot.slane %v7820_v34, 9  ;;  %v6787_v10 = vpack.i.bf16 %v7808_v57, %v7772_v52 }
 0x26e   :  { %v612_v42 = vmax.f32 %v596_v35, 0.0  ;;  %4904 = vmatmul.msk.f32.gmra.mxu2 %vm1164_vm4, %v856_v13  ;;  %v1419_v37 = vadd.f32 %v1418_v27, %v1354_v20  ;;  %v6792_v4 = vpack.i.bf16 %v765_v62, %v762_v14  ;;  %v4912_v32 = vrot.slane %v1495_v19, 9 }
 0x26f   :  { %v541_v53 = vpop.f32.mrf.mxu0  ;;  %v4913_v44 = vrot.slane %v1496_v30, 9  ;;  %v7868_v61 = vmax.f32 %v7820_v34, %v4911_v1  ;;  %v4914_v2 = vrot.slane %v1497_v63, 9 }
 0x270   :  { %v646_v55 = vrot.slane %v612_v42, 7  ;;  %v542_v60 = vadd.f32 %v7758_v49, %v541_v53  ;;  %6778 = vrot.lane.b32.xlu0 %v6767_v3, %s6932_s22  ;;  %v7854_v7 = vmax.f32 %v1419_v37, 0.0  ;;  %v1784_v37 = vmax.f32 %v1495_v19, %v4912_v32 }
 0x271   :  { %6793 = vrot.lane.b32.xlu2 %v6792_v4, %s6938_s30  ;;  %v7901_v32 = vsel %vm340_vm0, 0.0, %v7841_v46 }
 0x272   :  { %v7852_v26 = vsel %vm340_vm0, 0.0, %v646_v55  ;;  %v581_v8 = vmax.f32 %v518_v11, %v542_v60  ;;  %v697_v9 = vsel %vm340_vm0, %v646_v55, 0.0  ;;  %v1498_v14 = vrot.slane %v7854_v7, 2 }
 0x273   :  { %v767_v12 = vrot.slane %v697_v9, 1  ;;  %v857_v54 = vrot.slane %v7852_v26, 2  ;;  %v858_v15 = vrot.slane %v697_v9, 2  ;;  %v1499_v3 = vrot.slane %v7854_v7, 4 }
 0x274   :  { %v4915_v40 = vrot.slane %v7854_v7, 9  ;;  %v597_v31 = vmax.f32 %v565_v45, %v581_v8  ;;  %v766_v36 = vrot.slane %v7852_v26, 1  ;;  %v4916_v28 = vrot.slane %v1498_v14, 9 }
 0x275   :  { %6788 = vrot.lane.b32.xlu1 %v6787_v10, %s6937_s29  ;;  %v859_v29 = vsel %vm823_vm3, %v857_v54, %v858_v15  ;;  %v4917_v38 = vrot.slane %v1499_v3, 9  ;;  %v1500_v5 = vrot.slane %v7854_v7, 6  ;;  %v6797_v11 = vpack.i.bf16 %v7852_v26, %v7808_v57 }
 0x276   :  { %v7871_v27 = vmax.f32 %v7854_v7, %v4915_v40  ;;  %v613_v48 = vmax.f32 %v597_v31, 0.0  ;;  %4905 = vmatmul.msk.f32.gmra.mxu2 %vm1164_vm4, %v859_v29  ;;  %v768_v25 = vsel %vm732_vm2, %v766_v36, %v767_v12  ;;  %v6807_v39 = vpack.i.bf16 %v859_v29, %v856_v13 }
 0x277   :  { %v544_v35 = vpop.f32.mrf.mxu0  ;;  %v6802_v53 = vpack.i.bf16 %v768_v25, %v765_v62  ;;  %v1788_v13 = vmax.f32 %v1498_v14, %v4916_v28  ;;  %v1789_v60 = vmax.f32 %v1499_v3, %v4917_v38  ;;  %v1785_v12 = vmax.f32 %v1496_v30, %v4913_v44 }
 0x278   :  { %v1847_v45 = vmax.f32 %v7868_v61, %v7871_v27  ;;  %v1356_v42 = vpop.f32.mrf.mxu1  ;;  %v647_v20 = vrot.slane %v613_v48, 7  ;;  %v545_v18 = vadd.f32 %v7758_v49, %v544_v35  ;;  %v4918_v54 = vrot.slane %v1500_v5, 9 }
 0x279   :  { %v1357_v55 = vadd.f32 %v7767_v43, %v1356_v42  ;;  %6798 = vrot.lane.b32.xlu2 %v6797_v11, %s6933_s2  ;;  %6803 = vrot.lane.b32.xlu0 %v6802_v53, %s6936_s3  ;;  %v1848_v40 = vmax.f32 %v1784_v37, %v1788_v13  ;;  %v7910_v31 = vmax.f32 %v1497_v63, %v4914_v2  ;;  %v7915_v38 = vsel %vm340_vm0, %v7841_v46, 0.0 }
 0x27a   :  { %v7885_v1 = vsel %vm340_vm0, 0.0, %v647_v20  ;;  %v582_v4 = vmax.f32 %v7835_v47, %v545_v18  ;;  %v698_v8 = vsel %vm340_vm0, %v647_v20, 0.0  ;;  %v7917_v48 = vmax.f32 %v1500_v5, %v4918_v54 }
 0x27b   :  { %v1422_v7 = vadd.f32 %v1421_v21, %v1357_v55  ;;  %v770_v9 = vrot.slane %v698_v8, 1  ;;  %v860_v62 = vrot.slane %v7885_v1, 2  ;;  %v861_v10 = vrot.slane %v698_v8, 2  ;;  %v1424_v21 = vpop.f32.mrf.mxu2 }
 0x27c   :  { %v769_v19 = vrot.slane %v7885_v1, 1  ;;  %v598_v15 = vmax.f32 %v566_v58, %v582_v4  ;;  %v1849_v58 = vmax.f32 %v1785_v12, %v1789_v60  ;;  %v6822_v42 = vpack.i.bf16 %v7885_v1, %v7852_v26 }
 0x27d   :  { %v7896_v47 = vmax.f32 %v1422_v7, 0.0  ;;  %6808 = vrot.lane.b32.xlu1 %v6807_v39, %s6935_s26  ;;  %v862_v14 = vsel %vm823_vm3, %v860_v62, %v861_v10  ;;  %v7930_v5 = vperm.slane %v1848_v40, 0  ;;  %v1024_v27 = vrot.slane %v7915_v38, 2 }
 0x27e   :  { %v771_v3 = vsel %vm732_vm2, %v769_v19, %v770_v9  ;;  %v614_v30 = vmax.f32 %v598_v15, 0.0  ;;  %4906 = vmatmul.msk.f32.gmra.mxu2 %vm1164_vm4, %v862_v14  ;;  %v7932_v20 = vperm.slane %v1849_v58, 0 }
 0x27f   :  { %v1501_v44 = vrot.slane %v7896_v47, 2  ;;  %v1502_v0 = vrot.slane %v7896_v47, 4  ;;  %v547_v33 = vpop.f32.mrf.mxu0  ;;  %v6827_v36 = vpack.i.bf16 %v771_v3, %v768_v25  ;;  %v1503_v11 = vrot.slane %v7896_v47, 6 }
 0x280   :  { %v548_v29 = vadd.f32 %v7758_v49, %v547_v33  ;;  %v1359_v28 = vpop.f32.mrf.mxu1  ;;  %v648_v35 = vrot.slane %v614_v30, 7  ;;  %v4919_v34 = vrot.slane %v7896_v47, 9 }
 0x281   :  { %v4920_v63 = vrot.slane %v1501_v44, 9  ;;  %v1360_v49 = vadd.f32 %v7767_v43, %v1359_v28  ;;  %v4921_v46 = vrot.slane %v1502_v0, 9  ;;  %6818 = vrot.lane.b32.xlu2 %v6807_v39, %s6934_s25  ;;  %6828 = vrot.lane.b32.xlu0 %v6827_v36, %s6938_s30  ;;  %v4922_v13 = vrot.slane %v1503_v11, 9 }
 0x282   :  { %v583_v2 = vmax.f32 %v7839_v50, %v548_v29  ;;  %v7926_v25 = vsel %vm340_vm0, 0.0, %v648_v35  ;;  %v699_v50 = vsel %vm340_vm0, %v648_v35, 0.0  ;;  %v1791_v7 = vmax.f32 %v7896_v47, %v4919_v34 }
 0x283   :  { %v1425_v55 = vadd.f32 %v1424_v21, %v1360_v49  ;;  %v863_v37 = vrot.slane %v7926_v25, 2  ;;  %v773_v60 = vrot.slane %v699_v50, 1  ;;  %v864_v39 = vrot.slane %v699_v50, 2  ;;  %v1427_v15 = vpop.f32.mrf.mxu2 }
 0x284   :  { %v599_v18 = vmax.f32 %v567_v24, %v583_v2  ;;  %v772_v4 = vrot.slane %v7926_v25, 1  ;;  %v1792_v8 = vmax.f32 %v1501_v44, %v4920_v63  ;;  %v1793_v10 = vmax.f32 %v1502_v0, %v4921_v46 }
 0x285   :  { %6813 = vrot.lane.b32.xlu1 %v6802_v53, %s6932_s22  ;;  %v1466_v62 = vmax.f32 %v1425_v55, 0.0  ;;  %v865_v41 = vsel %vm823_vm3, %v863_v37, %v864_v39  ;;  %v6832_v59 = vpack.i.bf16 %v7926_v25, %v7885_v1 }
 0x286   :  { %v615_v9 = vmax.f32 %v599_v18, 0.0  ;;  %v7946_v24 = vsel %vm732_vm2, %v772_v4, %v773_v60  ;;  %4907 = vmatmul.msk.f32.gmra.mxu2 %vm1164_vm4, %v865_v41  ;;  %v6842_v30 = vpack.i.bf16 %v865_v41, %v862_v14  ;;  %v1794_v18 = vmax.f32 %v1503_v11, %v4922_v13 }
 0x287   :  { %v1504_v53 = vrot.slane %v1466_v62, 2  ;;  %v1505_v12 = vrot.slane %v1466_v62, 4  ;;  %v1506_v54 = vrot.slane %v1466_v62, 6  ;;  %v4923_v47 = vrot.slane %v1466_v62, 9 }
 0x288   :  { %v649_v19 = vrot.slane %v615_v9, 7  ;;  %v7950_v21 = vpack.i.bf16 %v7946_v24, %v771_v3  ;;  %v1850_v4 = vmax.f32 %v7910_v31, %v7917_v48 }
 0x289   :  { %v1362_v40 = vpop.f32.mrf.mxu1  ;;  %v4924_v0 = vrot.slane %v1504_v53, 9  ;;  %v4925_v33 = vrot.slane %v1505_v12, 9  ;;  %v4926_v58 = vrot.slane %v1506_v54, 9  ;;  %v1795_v29 = vmax.f32 %v1466_v62, %v4923_v47  ;;  %6823 = vrot.lane.b32.xlu2 %v6822_v42, %s6937_s29  ;;  %6833 = vrot.lane.b32.xlu0 %v6832_v59, %s6933_s2 }
 0x28a   :  { %v7953_v44 = vsel %vm340_vm0, 0.0, %v649_v19  ;;  %v1363_v36 = vadd.f32 %v7767_v43, %v1362_v40  ;;  %v700_v28 = vsel %vm340_vm0, %v649_v19, 0.0  ;;  %vm1901_vm0 = vcmask 1044484  }
 0x28b   :  { %v866_v35 = vrot.slane %v7953_v44, 2  ;;  %v1796_v3 = vmax.f32 %v1504_v53, %v4924_v0  ;;  %v1797_v34 = vmax.f32 %v1505_v12, %v4925_v33  ;;  %v1798_v14 = vmax.f32 %v1506_v54, %v4926_v58  ;;  %v1430_v19 = vpop.f32.mrf.mxu2 }
 0x28c   :  { %v776_v63 = vrot.slane %v700_v28, 1  ;;  %v1851_v2 = vmax.f32 %v1791_v7, %v1795_v29  ;;  %v1428_v49 = vadd.f32 %v1427_v15, %v1363_v36  ;;  %v867_v46 = vrot.slane %v700_v28, 2 }
 0x28d   :  { %6838 = vrot.lane.b32.xlu1 %v7950_v21, %s6936_s3  ;;  %v775_v42 = vrot.slane %v7953_v44, 1  ;;  %v1852_v55 = vmax.f32 %v1792_v8, %v1796_v3  ;;  %v1853_v50 = vmax.f32 %v1793_v10, %v1797_v34  ;;  %v1854_v13 = vmax.f32 %v1794_v18, %v1798_v14 }
 0x28e   :  { %v1888_v37 = vperm.slane %v1851_v2, 0  ;;  %v1467_v60 = vmax.f32 %v1428_v49, 0.0  ;;  %v7964_v39 = vsel %vm823_vm3, %v866_v35, %v867_v46  ;;  %v1887_v8 = vperm.slane %v1847_v45, 0 }
 0x28f   :  { %4908 = vmatmul.msk.f32.gmra.mxu2 %vm1164_vm4, %v7964_v39  ;;  %v7971_v7 = vsel %vm732_vm2, %v775_v42, %v776_v63  ;;  %v1919_v9 = vperm.slane %v1852_v55, 0  ;;  %v1945_v11 = vperm.slane %v1853_v50, 0  ;;  %v1023_v10 = vrot.slane %v7901_v32, 2 }
 0x290   :  { %v6862_v31 = vpack.i.bf16 %v7971_v7, %v7946_v24  ;;  %v1507_v53 = vrot.slane %v1467_v60, 2  ;;  %v1508_v12 = vrot.slane %v1467_v60, 4  ;;  %v1509_v61 = vrot.slane %v1467_v60, 6 }
 0x291   :  { %v1365_v62 = vpop.f32.mrf.mxu1  ;;  %v1926_v48 = vsel %vm1895_vm11, %v1919_v9, %v7930_v5  ;;  %v1952_v59 = vsel %vm1895_vm11, %v1945_v11, %v7932_v20  ;;  %6843 = vrot.lane.b32.xlu2 %v6842_v30, %s6935_s26  ;;  %6853 = vrot.lane.b32.xlu0 %v6842_v30, %s6934_s25  ;;  %v1970_v54 = vperm.slane %v1850_v4, 0  ;;  %v1971_v15 = vperm.slane %v1854_v13, 0 }
 0x292   :  { %v1366_v41 = vadd.f32 %v7767_v43, %v1365_v62  ;;  %v1896_v24 = vsel %vm1895_vm11, %v1888_v37, %v1887_v8  ;;  %v4927_v47 = vrot.slane %v1467_v60, 9  ;;  %v4928_v40 = vrot.slane %v1507_v53, 9 }
 0x293   :  { %v1978_v20 = vsel %vm1895_vm11, %v1971_v15, %v1970_v54  ;;  %v4929_v0 = vrot.slane %v1508_v12, 9  ;;  %v4930_v33 = vrot.slane %v1509_v61, 9  ;;  %v7992_v58 = vsel %vm823_vm3, %v1023_v10, %v1024_v27  ;;  %v1433_v4 = vpop.f32.mrf.mxu2 }
 0x294   :  { %v1431_v45 = vadd.f32 %v1430_v19, %v1366_v41  ;;  %v1799_v35 = vmax.f32 %v1467_v60, %v4927_v47  ;;  %v6857_v3 = vpack.i.bf16 %v7953_v44, %v7926_v25  ;;  %v1800_v49 = vmax.f32 %v1507_v53, %v4928_v40 }
 0x295   :  { %944 = vrot.lane.b32.xlu1 %v7953_v44, %s6933_s2  ;;  %v1801_v46 = vmax.f32 %v1508_v12, %v4929_v0  ;;  %v1802_v18 = vmax.f32 %v1509_v61, %v4930_v33  ;;  %v969_v11 = vrot.slane %v7901_v32, 1  ;;  %v970_v13 = vrot.slane %v7915_v38, 1 }
 0x296   :  { %v1468_v5 = vmax.f32 %v1431_v45, 0.0  ;;  %vm1907_vm3 = vcmask 1047559  }
 0x297   :  { %4909 = vmatmul.msk.f32.gmra.mxu2 %vm1164_vm4, %v7992_v58  ;;  %v971_v27 = vsel %vm732_vm2, %v969_v11, %v970_v13  ;;  %vm1905_vm2 = vcmask 1046534  }
 0x298   :  { %v1510_v30 = vrot.slane %v1468_v5, 2  ;;  %v1511_v29 = vrot.slane %v1468_v5, 4  ;;  %v1512_v36 = vrot.slane %v1468_v5, 6  ;;  %v4931_v28 = vrot.slane %v1468_v5, 9 }
 0x299   :  { %6848 = vrot.lane.b32.xlu2 %v7950_v21, %s6932_s22  ;;  %6858 = vrot.lane.b32.xlu0 %v6857_v3, %s6937_s29 }
 0x29a   :  { %v4932_v34 = vrot.slane %v1510_v30, 9  ;;  %v4933_v14 = vrot.slane %v1511_v29, 9  ;;  %v4934_v63 = vrot.slane %v1512_v36, 9  ;;  %v1803_v2 = vmax.f32 %v1468_v5, %v4931_v28 }
 0x29b   :  { %v1368_v60 = vpop.f32.mrf.mxu1  ;;  %v1436_v47 = vpop.f32.mrf.mxu2 }
 0x29c   :  { %v1804_v42 = vmax.f32 %v1510_v30, %v4932_v34  ;;  %v1805_v55 = vmax.f32 %v1511_v29, %v4933_v14  ;;  %v1806_v50 = vmax.f32 %v1512_v36, %v4934_v63  ;;  %v1855_v37 = vmax.f32 %v1799_v35, %v1803_v2 }
 0x29d   :  { %v1369_v9 = vadd.f32 %v7767_v43, %v1368_v60  ;;  %6863 = vrot.lane.b32.xlu1 %v6862_v31, %s6938_s30 }
 0x29e   :  { %v1889_v8 = vperm.slane %v1855_v37, 0  ;;  %v1856_v62 = vmax.f32 %v1800_v49, %v1804_v42  ;;  %v1857_v21 = vmax.f32 %v1801_v46, %v1805_v55  ;;  %v1858_v10 = vmax.f32 %v1802_v18, %v1806_v50 }
 0x29f   :  { %v1434_v41 = vadd.f32 %v1433_v4, %v1369_v9  ;;  %4910 = vmatmul.msk.f32.gmra.mxu2 %vm1164_vm4, %v7312_v6 }
 0x2a0   :  { %v1920_v19 = vperm.slane %v1856_v62, 0  ;;  %v1946_v53 = vperm.slane %v1857_v21, 0  ;;  %v1972_v12 = vperm.slane %v1858_v10, 0  ;;  %v1898_v61 = vsel %vm1897_vm12, %v1889_v8, %v1896_v24 }
 0x2a1   :  { %v1469_v15 = vmax.f32 %v1434_v41, 0.0  ;;  %1147 = vrot.lane.b32.xlu2 %v971_v27, %s6938_s30  ;;  %1054 = vrot.lane.b32.xlu0 %v7964_v39, %s6935_s26  ;;  %s10142_s30 = sld [smem:[#allocation9_spill]] }
 0x2a2   :  { %v1927_v31 = vsel %vm1897_vm12, %v1920_v19, %v1926_v48  ;;  %v1953_v45 = vsel %vm1897_vm12, %v1946_v53, %v1952_v59  ;;  %v1979_v54 = vsel %vm1897_vm12, %v1972_v12, %v1978_v20  ;;  %v2038_v53 = vld [vmem:[%s10124_s7 + $0x8] sm:$0x77] }
 0x2a3   :  { %v1371_v38 = vpop.f32.mrf.mxu1  ;;  %v1513_v5 = vrot.slane %v1469_v15, 2  ;;  %v1514_v24 = vrot.slane %v1469_v15, 4  ;;  %v1515_v40 = vrot.slane %v1469_v15, 6  ;;  %v4935_v48 = vrot.slane %v1469_v15, 9 }
 0x2a4   :  { %v1372_v6 = vadd.f32 %v7767_v43, %v1371_v38 }
 0x2a5   :  { %1102 = vrot.lane.b32.xlu1 %v7901_v32, %s6937_s29  ;;  %v4936_v20 = vrot.slane %v1513_v5, 9  ;;  %v4937_v33 = vrot.slane %v1514_v24, 9  ;;  %v4938_v30 = vrot.slane %v1515_v40, 9  ;;  %v1807_v43 = vmax.f32 %v1469_v15, %v4935_v48 }
 0x2a6   :  { %v1437_v0 = vadd.f32 %v1436_v47, %v1372_v6 }
 0x2a7   :  { %v1808_v2 = vmax.f32 %v1513_v5, %v4936_v20  ;;  %v1809_v49 = vmax.f32 %v1514_v24, %v4937_v33  ;;  %v1810_v46 = vmax.f32 %v1515_v40, %v4938_v30  ;;  %v2009_v8 = vld [vmem:[%s10142_s30] sm:$0x77]  ;;  %v2010_v62 = vld [vmem:[%s10142_s30 + $0x8] sm:$0x77] }
 0x2a8   :  { %v1470_v59 = vmax.f32 %v1437_v0, 0.0  ;;  %2013 = vst [vmem:[#allocation1] ss:$2 sm:$0xff] %v2009_v8 }
 0x2a9   :  { %1000 = vrot.lane.b32.xlu2 %v7971_v7, %s6936_s3  ;;  %806 = vrot.lane.b32.xlu0 %v7971_v7, %s6932_s22  ;;  %2017 = vst [vmem:[#allocation1 + $0x10] ss:$2 sm:$0xff] %v2010_v62 }
 0x2aa   :  { %v1516_v29 = vrot.slane %v1470_v59, 2  ;;  %v1517_v36 = vrot.slane %v1470_v59, 4  ;;  %v1518_v28 = vrot.slane %v1470_v59, 6  ;;  %v4939_v35 = vrot.slane %v1470_v59, 9 }
 0x2ac   :  { %v4940_v3 = vrot.slane %v1516_v29, 9  ;;  %v4941_v34 = vrot.slane %v1517_v36, 9  ;;  %v4942_v14 = vrot.slane %v1518_v28, 9  ;;  %v1811_v63 = vmax.f32 %v1470_v59, %v4939_v35 }
 0x2ad   :  { %897 = vrot.lane.b32.xlu1 %v7964_v39, %s6934_s25 }
 0x2ae   :  { %v1812_v18 = vmax.f32 %v1516_v29, %v4940_v3  ;;  %v1813_v42 = vmax.f32 %v1517_v36, %v4941_v34  ;;  %v1814_v55 = vmax.f32 %v1518_v28, %v4942_v14  ;;  %v1859_v50 = vmax.f32 %v1807_v43, %v1811_v63 }
 0x2af   :  { %v2014_v41 = vld.sshfl [vmem:[#allocation1] sm:$0xff pattern:$0x75316420]  ;;  %v2015_v19 = vld.sshfl [vmem:[#allocation1 + $0x8] sm:$0xff pattern:$0x75316420] }
 0x2b0   :  { %v1890_v7 = vperm.slane %v1859_v50, 0  ;;  %v1860_v37 = vmax.f32 %v1808_v2, %v1812_v18  ;;  %v1861_v60 = vmax.f32 %v1809_v49, %v1813_v42  ;;  %v1862_v4 = vmax.f32 %v1810_v46, %v1814_v55  ;;  %v2018_v12 = vld.sshfl [vmem:[#allocation1 + $0x10] sm:$0xff pattern:$0x75316420] }
 0x2b1   :  { %946 = vrot.lane.b32.xlu2 %v7901_v32, %s6933_s2  ;;  %1002 = vrot.lane.b32.xlu0 %v971_v27, %s6936_s3  ;;  %v2030_v15 = vsel %vm2024_vm14, %v2018_v12, 0.0 }
 0x2b2   :  { %v1921_v39 = vperm.slane %v1860_v37, 0  ;;  %v1947_v9 = vperm.slane %v1861_v60, 0  ;;  %v1973_v11 = vperm.slane %v1862_v4, 0  ;;  %v8024_v13 = vsel %vm1899_vm13, %v1890_v7, %v1898_v61  ;;  %v2019_v61 = vld.sshfl [vmem:[#allocation1 + $0x18] sm:$0xff pattern:$0x75316420] }
 0x2b3   :  { %2060 = vst [vmem:[#allocation1 + $0x10] ss:$2 sm:$0xff] %v2038_v53  ;;  %v2031_v38 = vsel %vm2024_vm14, %v2019_v61, 0.0 }
 0x2b4   :  { %v8035_v32 = vsel %vm1899_vm13, %v1921_v39, %v1927_v31  ;;  %v8038_v21 = vsel %vm1899_vm13, %v1947_v9, %v1953_v45  ;;  %v8041_v10 = vsel %vm1899_vm13, %v1973_v11, %v1979_v54  ;;  %v2025_v45 = vsel %vm2024_vm14, %v2014_v41, 0.0 }
 0x2b5   :  { %1056 = vrot.lane.b32.xlu1 %v7992_v58, %s6935_s26  ;;  %v2037_v58 = vld [vmem:[%s10124_s7] sm:$0x77]  ;;  %v2026_v54 = vsel %vm2024_vm14, %v2015_v19, 0.0  ;;  %v2032_v5 = vadd.f32 %v2031_v38, %v2030_v15 }
 0x2b6   :  { %2058 = vst [vmem:[#allocation1] ss:$2 sm:$0xff] %v2037_v58  ;;  %v2027_v6 = vadd.f32 %v2026_v54, %v2025_v45  ;;  %v2160_v15 = vld [vmem:[%s10143_s5] sm:$0x3] }
 0x2c3   :  { %v6769_v27 = vpop.permute.xlu2 %6768 }
 0x2c4   :  { %v6770_v30 = vunpack.i.l.bf16 %v6769_v27  ;;  %v6771_v2 = vunpack.i.h.bf16 %v6769_v27 }
 0x2cb   :  { %v6794_v31 = vpop.permute.xlu2 %6793 }
 0x2cc   :  { %v6796_v58 = vunpack.i.h.bf16 %v6794_v31 }
 0x2d3   :  { %v8053_v40 = vpop.permute.xlu2 %6798 }
 0x2d4   :  { %v6800_v41 = vunpack.i.l.bf16 %v8053_v40 }
 0x2d7   :  { %v6764_v47 = vpop.permute.xlu1 %6763 }
 0x2d8   :  { %v6765_v0 = vunpack.i.l.bf16 %v6764_v47  ;;  %v6766_v36 = vunpack.i.h.bf16 %v6764_v47 }
 0x2da   :  { %v6774_v24 = vpop.permute.xlu0 %6773  ;;  %2028 = vadd.xlane.f32.xlu2 %v2027_v6  ;;  %v1205_v20 = vsel %vm1196_vm6, %v7608_v56, %v6765_v0  ;;  %v6795_v56 = vunpack.i.l.bf16 %v6794_v31  ;;  %v6801_v0 = vunpack.i.h.bf16 %v8053_v40 }
 0x2db   :  { %2033 = vadd.xlane.f32.xlu0 %v2032_v5  ;;  %v6775_v28 = vunpack.i.l.bf16 %v6774_v24  ;;  %v1222_v3 = vsel %vm1213_vm7, %v1205_v20, %v6770_v30  ;;  %v8061_v34 = vpop.permute.xlu2 %6818  ;;  %v6939_v5 = vmov 0  }
 0x2dc   :  { %6867 = vset.pattern.permute.xlu1 %v6939_v5  ;;  %6868 = vset.pattern.permute.xlu0 %v6939_v5 }
 0x2dd   :  { %v1239_v18 = vsel %vm1230_vm8, %v1222_v3, %v6775_v28  ;;  %2164 = vperm.xlu1 %6867, %v2160_v15  }
 0x2df   :  { %v6784_v48 = vpop.permute.xlu1 %6783 }
 0x2e0   :  { %v6785_v29 = vunpack.i.l.bf16 %v6784_v48  ;;  %v6786_v39 = vunpack.i.h.bf16 %v6784_v48 }
 0x2e2   :  { %v6779_v59 = vpop.permute.xlu0 %6778 }
 0x2e3   :  { %v6780_v33 = vunpack.i.l.bf16 %v6779_v59  ;;  %v6781_v46 = vunpack.i.h.bf16 %v6779_v59  ;;  %v6824_v19 = vpop.permute.xlu2 %6823 }
 0x2e4   :  { %v6825_v54 = vunpack.i.l.bf16 %v6824_v19 }
 0x2e5   :  { %v1173_v35 = vsel %vm1164_vm4, %v7752_v23, %v6780_v33  ;;  %v6776_v23 = vunpack.i.h.bf16 %v6774_v24  ;;  %v1174_v37 = vsel %vm1164_vm4, %v7772_v52, %v6781_v46  ;;  %v6820_v24 = vunpack.i.l.bf16 %v8061_v34 }
 0x2e6   :  { %v1189_v43 = vsel %vm1180_vm5, %v1173_v35, %v6785_v29  ;;  %v1190_v11 = vsel %vm1180_vm5, %v1174_v37, %v6786_v39 }
 0x2e7   :  { %v6789_v14 = vpop.permute.xlu1 %6788  ;;  %v1206_v63 = vsel %vm1196_vm6, %v1189_v43, %v6766_v36  ;;  %v1207_v12 = vsel %vm1196_vm6, %v1190_v11, %v6800_v41  ;;  %v6826_v43 = vunpack.i.h.bf16 %v6824_v19 }
 0x2e8   :  { %v6790_v49 = vunpack.i.l.bf16 %v6789_v14  ;;  %v1223_v55 = vsel %vm1213_vm7, %v1206_v63, %v6771_v2  ;;  %v6791_v7 = vunpack.i.h.bf16 %v6789_v14 }
 0x2e9   :  { %v1240_v4 = vsel %vm1230_vm8, %v1223_v55, %v6776_v23 }
 0x2ea   :  { %v1256_v42 = vsel %vm1247_vm9, %v1239_v18, %v6790_v49  ;;  %v1257_v62 = vsel %vm1247_vm9, %v1240_v4, %v6791_v7  ;;  %v6821_v18 = vunpack.i.h.bf16 %v8061_v34 }
 0x2eb   :  { %v1273_v50 = vsel %vm1264_vm10, %v1256_v42, %v6795_v56  ;;  %v6804_v60 = vpop.permute.xlu0 %6803  ;;  %v1274_v61 = vsel %vm1264_vm10, %v1257_v62, %v6796_v58  ;;  %v6844_v59 = vpop.permute.xlu2 %6843 }
 0x2ec   :  { %1373 = vmatmul.f32.gmra.mxu1 %v1273_v50  ;;  %v6805_v8 = vunpack.i.l.bf16 %v6804_v60  ;;  %v6806_v20 = vunpack.i.h.bf16 %v6804_v60 }
 0x2ee   :  { %v1224_v52 = vsel %vm1213_vm7, %v1207_v12, %v6805_v8 }
 0x2ef   :  { %v6809_v9 = vpop.permute.xlu1 %6808 }
 0x2f0   :  { %v6810_v53 = vunpack.i.l.bf16 %v6809_v9  ;;  %v6811_v29 = vunpack.i.h.bf16 %v6809_v9  ;;  %v6845_v9 = vunpack.i.l.bf16 %v6844_v59 }
 0x2f2   :  { %v1241_v45 = vsel %vm1230_vm8, %v1224_v52, %v6810_v53 }
 0x2f3   :  { %v6829_v27 = vpop.permute.xlu0 %6828  ;;  %v1258_v6 = vsel %vm1247_vm9, %v1241_v45, %v6825_v54  ;;  %v6849_v49 = vpop.permute.xlu2 %6848 }
 0x2f4   :  { %1376 = vmatmul.f32.gmra.mxu1 %v1274_v61  ;;  %v6830_v31 = vunpack.i.l.bf16 %v6829_v27  ;;  %v6850_v7 = vunpack.i.l.bf16 %v6849_v49 }
 0x2f6   :  { %v1275_v30 = vsel %vm1264_vm10, %v1258_v6, %v6830_v31  ;;  %v1177_v11 = vsel %vm1164_vm4, %v7885_v1, %v6850_v7  ;;  %v6846_v31 = vunpack.i.h.bf16 %v6844_v59 }
 0x2f7   :  { %v6814_v38 = vpop.permute.xlu1 %6813 }
 0x2f8   :  { %v6815_v47 = vunpack.i.l.bf16 %v6814_v38  ;;  %v6816_v63 = vunpack.i.h.bf16 %v6814_v38 }
 0x2fa   :  { %v1175_v48 = vsel %vm1164_vm4, %v7808_v57, %v6815_v47  ;;  %v6831_v57 = vunpack.i.h.bf16 %v6829_v27  ;;  %v1176_v46 = vsel %vm1164_vm4, %v7852_v26, %v6816_v63  ;;  %v6851_v27 = vunpack.i.h.bf16 %v6849_v49 }
 0x2fb   :  { %v1191_v33 = vsel %vm1180_vm5, %v1175_v48, %v6820_v24  ;;  %v6834_v28 = vpop.permute.xlu0 %6833  ;;  %v1192_v23 = vsel %vm1180_vm5, %v1176_v46, %v6821_v18  ;;  %v1148_v26 = vpop.permute.xlu2 %1147  ;;  %v2062_v46 = vld.sshfl [vmem:[#allocation1 + $0x8] sm:$0xff pattern:$0x75316420]  ;;  %v2051_v18 = vlaneseq }
 0x2fc   :  { %1379 = vmatmul.f32.gmra.mxu1 %v1275_v30  ;;  %v1208_v36 = vsel %vm1196_vm6, %v1191_v33, %v6801_v0  ;;  %v6835_v55 = vunpack.i.l.bf16 %v6834_v28  ;;  %v6836_v58 = vunpack.i.h.bf16 %v6834_v28  ;;  %v1178_v6 = vsel %vm1164_vm4, %v7926_v25, %v6851_v27 }
 0x2fd   :  { %v1225_v35 = vsel %vm1213_vm7, %v1208_v36, %v6806_v20 }
 0x2fe   :  { %v1242_v3 = vsel %vm1230_vm8, %v1225_v35, %v6811_v29  ;;  %v1209_v60 = vsel %vm1196_vm6, %v1192_v23, %v6835_v55 }
 0x2ff   :  { %v6839_v40 = vpop.permute.xlu1 %6838  ;;  %v1259_v14 = vsel %vm1247_vm9, %v1242_v3, %v6826_v43 }
 0x300   :  { %v1276_v2 = vsel %vm1264_vm10, %v1259_v14, %v6831_v57  ;;  %v6840_v50 = vunpack.i.l.bf16 %v6839_v40  ;;  %v6841_v52 = vunpack.i.h.bf16 %v6839_v40 }
 0x302   :  { %v1226_v4 = vsel %vm1213_vm7, %v1209_v60, %v6840_v50  ;;  %v1439_v60 = vpop.f32.mrf.mxu2 }
 0x303   :  { %v6854_v56 = vpop.permute.xlu0 %6853  ;;  %v1243_v19 = vsel %vm1230_vm8, %v1226_v4, %v6845_v9  ;;  %v1001_v24 = vpop.permute.xlu2 %1000  ;;  %v6871_v4 = vld [vmem:[%s10126_s9] ss:$0 sm:$0xff] }
 0x304   :  { %1382 = vmatmul.f32.gmra.mxu1 %v1276_v2  ;;  %v6855_v37 = vunpack.i.l.bf16 %v6854_v56  ;;  %v6856_v45 = vunpack.i.h.bf16 %v6854_v56  ;;  %v2061_v56 = vld.sshfl [vmem:[#allocation1] sm:$0xff pattern:$0x75316420] }
 0x305   :  { %4975 = vmatpush.msk.msra.mxu3 %vm2024_vm14, %v2061_v56  ;;  %v6542_v56 = vld [vmem:[%s10129_s12 + $0x14] sm:$0xf0] }
 0x306   :  { %v1193_v34 = vsel %vm1180_vm5, %v1177_v11, %v6855_v37  ;;  %v1194_v0 = vsel %vm1180_vm5, %v1178_v6, %v6856_v45  ;;  %v6541_v11 = vld [vmem:[%s10129_s12 + $0xc] sm:$0xf0] }
 0x307   :  { %v945_v42 = vpop.permute.xlu1 %944  ;;  %v1210_v12 = vsel %vm1196_vm6, %v1193_v34, %v6836_v58  ;;  %4977 = vmatpush.msk.msrb.mxu3 %vm2024_vm14, %v2062_v46  ;;  %v6872_v34 = vld [vmem:[%s10127_s10] ss:$0 sm:$0xff]  ;;  %v6540_v46 = vld [vmem:[%s10129_s12 + $0xc] sm:$0xf] }
 0x308   :  { %v1227_v15 = vsel %vm1213_vm7, %v1210_v12, %v6841_v52  ;;  %v1211_v20 = vsel %vm1196_vm6, %v1194_v0, %v945_v42  ;;  %v2052_v42 = vand.u32 127, %v2051_v18 }
 0x309   :  { %v1244_v5 = vsel %vm1230_vm8, %v1227_v15, %v6846_v31  ;;  %v1228_v30 = vsel %vm1213_vm7, %v1211_v20, %v1001_v24  ;;  %v6539_v20 = vld [vmem:[%s10129_s12 + $0x4] sm:$0xf] }
 0x30b   :  { %v6859_v39 = vpop.permute.xlu0 %6858  ;;  %v947_v3 = vpop.permute.xlu2 %946 }
 0x30c   :  { %v6860_v8 = vunpack.i.l.bf16 %v6859_v39  ;;  %v6861_v1 = vunpack.i.h.bf16 %v6859_v39  ;;  %v4985_v39 = vld [vmem:[%s10129_s12] sm:$0xf] }
 0x30e   :  { %v1260_v53 = vsel %vm1247_vm9, %v1243_v19, %v6860_v8  ;;  %v1261_v48 = vsel %vm1247_vm9, %v1244_v5, %v6861_v1  ;;  %v8150_v8 = vld [vmem:[%s10123_s6] ss:$0 sm:$0xff]  ;;  %v1442_v19 = vpop.f32.mrf.mxu2 }
 0x30f   :  { %v6864_v62 = vpop.permute.xlu1 %6863 }
 0x310   :  { %v6865_v41 = vunpack.i.l.bf16 %v6864_v62  ;;  %v6866_v38 = vunpack.i.h.bf16 %v6864_v62  ;;  %v4986_v62 = vor.u32 %v6541_v11, %v4985_v39 }
 0x312   :  { %v1277_v61 = vsel %vm1264_vm10, %v1260_v53, %v6865_v41  ;;  %v1278_v33 = vsel %vm1264_vm10, %v1261_v48, %v6866_v38 }
 0x313   :  { %1385 = vmatmul.f32.gmra.mxu1 %v1277_v61  ;;  %v1055_v54 = vpop.permute.xlu0 %1054 }
 0x314   :  { %v1245_v29 = vsel %vm1230_vm8, %v1228_v30, %v1055_v54 }
 0x316   :  { %v1445_v38 = vpop.f32.mrf.mxu2 }
 0x317   :  { %v1103_v47 = vpop.permute.xlu1 %1102 }
 0x318   :  { %v1262_v36 = vsel %vm1247_vm9, %v1245_v29, %v1103_v47 }
 0x319   :  { %v1279_v43 = vsel %vm1264_vm10, %v1262_v36, %v1148_v26 }
 0x31b   :  { %1388 = vmatmul.f32.gmra.mxu1 %v1278_v33  ;;  %v807_v59 = vpop.permute.xlu0 %806  ;;  %v4987_v33 = vld [vmem:[%s10129_s12 + $0x10] sm:$0xf0] }
 0x31c   :  { %v1179_v28 = vsel %vm1164_vm4, %v7953_v44, %v807_v59  ;;  %v4990_v59 = vor.u32 %v6539_v20, %v4987_v33 }
 0x31f   :  { %v898_v25 = vpop.permute.xlu1 %897 }
 0x320   :  { %v1195_v35 = vsel %vm1180_vm5, %v1179_v28, %v898_v25  ;;  %v1448_v28 = vpop.f32.mrf.mxu2 }
 0x321   :  { %v1212_v40 = vsel %vm1196_vm6, %v1195_v35, %v947_v3 }
 0x323   :  { %1391 = vmatmul.f32.gmra.mxu1 %v1279_v43  ;;  %v1003_v14 = vpop.permute.xlu0 %1002 }
 0x324   :  { %v1229_v57 = vsel %vm1213_vm7, %v1212_v40, %v1003_v14 }
 0x327   :  { %v1057_v63 = vpop.permute.xlu1 %1056 }
 0x328   :  { %v1246_v2 = vsel %vm1230_vm8, %v1229_v57, %v1057_v63 }
 0x329   :  { %v1263_v49 = vsel %vm1247_vm9, %v1246_v2, %v6746_v51  ;;  %v2063_v51 = vld.sshfl [vmem:[#allocation1 + $0x10] sm:$0xff pattern:$0x75316420] }
 0x32a   :  { %v1280_v44 = vsel %vm1264_vm10, %v1263_v49, %v6761_v17  ;;  %v2064_v17 = vld.sshfl [vmem:[#allocation1 + $0x18] sm:$0xff pattern:$0x75316420] }
 0x32b   :  { %1394 = vmatmul.f32.gmra.mxu1 %v1280_v44  ;;  %v4993_v44 = vld [vmem:[%s10129_s12 + $0x8] sm:$0xf] }
 0x32c   :  { %v4994_v18 = vor.u32 %v6542_v56, %v4993_v44 }
 0x34d   :  { %v2029_v55 = vpop.xlane.xlu2 %2028 }
 0x34e   :  { %v2035_v23 = vmul.f32 0.00390625, %v2029_v55  ;;  %v2034_v50 = vpop.xlane.xlu0 %2033 }
 0x34f   :  { %v2036_v7 = vmul.f32 0.00390625, %v2034_v50  ;;  %v2165_v58 = vpop.permute.xlu1 %2164  ;;  %v5117_v50 = vld [vmem:[%s10128_s11 + $0xe0] sm:$0xf] }
 0x350   :  { %v2053_v16 = vperm.slane %v2035_v23, %v2052_v42  ;;  %v2170_v41 = vmul.f32 %v6871_v4, %v2165_v58 }
 0x351   :  { %v2054_v37 = vperm.slane %v2036_v7, %v2052_v42  ;;  %v4995_v42 = vld [vmem:[%s10129_s12 + $0x18] sm:$0xf0]  ;;  %v6313_v7 = vld [vmem:[%s10128_s11 + $0xec] sm:$0xf0] }
 0x352   :  { %v2175_v12 = vadd.f32 %v6872_v34, %v2170_v41  ;;  %v4998_v55 = vor.u32 %v6540_v46, %v4995_v42  ;;  %v5085_v41 = vld [vmem:[%s10128_s11 + $0xa0] sm:$0xf] }
 0x353   :  { %v2055_v22 = vsel %vm1895_vm11, %v2054_v37, %v2053_v16 }
 0x354   :  { %4976 = vmatmul.msk.f32.vlgmr.msra.gmra.mxu3 %vm2065_vm15, %v2055_v22  ;;  %v2176_v52 = vmax.f32 %v2175_v12, 0.0 }
 0x355   :  { %4979 = vmatpush.msk.msra.mxu3 %vm2024_vm14, %v2063_v51  ;;  %v5118_v51 = vor.u32 %v6313_v7, %v5117_v50 }
 0x356   :  { %v8160_v1 = vpack.c.bf16 %v2176_v52, %v2176_v52 }
 0x35c   :  { %4978 = vmatmul.msk.f32.vlgmr.msrb.gmra.mxu3 %vm2065_vm15, %v2055_v22 }
 0x35d   :  { %4981 = vmatpush.msk.msrb.mxu3 %vm2024_vm14, %v2064_v17  ;;  %v5101_v17 = vld [vmem:[%s10128_s11 + $0xc0] sm:$0xf] }
 0x364   :  { %4980 = vmatmul.msk.f32.vlgmr.msra.gmra.mxu3 %vm2065_vm15, %v2055_v22 }
 0x365   :  { %2476 = vmatpush.bf16.msra.mxu3 %v4986_v62 }
 0x369   :  { %v1374_v9 = vpop.f32.mrf.mxu1 }
 0x36a   :  { %v1375_v26 = vadd.f32 %v8150_v8, %v1374_v9 }
 0x36c   :  { %v1440_v53 = vadd.f32 %v1439_v60, %v1375_v26  ;;  %4982 = vmatmul.msk.f32.vlgmr.msrb.gmra.mxu3 %vm2065_vm15, %v2055_v22  ;;  %v6309_v60 = vld [vmem:[%s10128_s11 + $0xcc] sm:$0xf0] }
 0x36d   :  { %2489 = vmatpush.bf16.msrb.mxu3 %v4990_v59  ;;  %v5102_v62 = vor.u32 %v6309_v60, %v5101_v17  ;;  %v5037_v60 = vld [vmem:[%s10128_s11 + $0x40] sm:$0xf] }
 0x36e   :  { %v8157_v27 = vmax.f32 %v1440_v53, 0.0 }
 0x370   :  { %v4943_v15 = vrot.slane %v8157_v27, 9  ;;  %v1519_v11 = vrot.slane %v8157_v27, 2  ;;  %v1520_v34 = vrot.slane %v8157_v27, 4 }
 0x371   :  { %v1377_v61 = vpop.f32.mrf.mxu1 }
 0x372   :  { %v1378_v45 = vadd.f32 %v8150_v8, %v1377_v61  ;;  %v1815_v5 = vmax.f32 %v8157_v27, %v4943_v15 }
 0x374   :  { %v1443_v54 = vadd.f32 %v1442_v19, %v1378_v45  ;;  %4999 = vmatmul.msk.bf16.vlgmr.msra.gmra.mxu3 %vm1164_vm4, %v8160_v1  ;;  %v6305_v19 = vld [vmem:[%s10128_s11 + $0xac] sm:$0xf0] }
 0x375   :  { %2502 = vmatpush.bf16.msra.mxu3 %v4994_v18 }
 0x376   :  { %v8163_v31 = vmax.f32 %v1443_v54, 0.0  ;;  %v4944_v54 = vrot.slane %v1519_v11, 9 }
 0x378   :  { %v4947_v47 = vrot.slane %v8163_v31, 9  ;;  %v1522_v4 = vrot.slane %v8163_v31, 2  ;;  %v1523_v39 = vrot.slane %v8163_v31, 4 }
 0x379   :  { %v1380_v6 = vpop.f32.mrf.mxu1 }
 0x37a   :  { %v1819_v24 = vmax.f32 %v8163_v31, %v4947_v47  ;;  %v1381_v0 = vadd.f32 %v8150_v8, %v1380_v6  ;;  %v4948_v61 = vrot.slane %v1522_v4, 9  ;;  %v4949_v52 = vrot.slane %v1523_v39, 9 }
 0x37b   :  { %v4945_v6 = vrot.slane %v1520_v34, 9 }
 0x37c   :  { %v1863_v48 = vmax.f32 %v1815_v5, %v1819_v24  ;;  %v1446_v30 = vadd.f32 %v1445_v38, %v1381_v0  ;;  %v5086_v38 = vor.u32 %v6305_v19, %v5085_v41  ;;  %v1521_v5 = vrot.slane %v8157_v27, 6  ;;  %v5069_v0 = vld [vmem:[%s10128_s11 + $0x80] sm:$0xf] }
 0x37d   :  { %v1524_v24 = vrot.slane %v8163_v31, 6  ;;  %v1821_v59 = vmax.f32 %v1523_v39, %v4949_v52  ;;  %v6293_v39 = vld [vmem:[%s10128_s11 + $0x4c] sm:$0xf0] }
 0x37e   :  { %v1891_v29 = vperm.slane %v1863_v48, 0  ;;  %v8179_v35 = vmax.f32 %v1446_v30, 0.0  ;;  %v6301_v48 = vld [vmem:[%s10128_s11 + $0x8c] sm:$0xf0]  ;;  %v1820_v30 = vmax.f32 %v1522_v4, %v4948_v61 }
 0x37f   :  { %v6345_v4 = vld [vmem:[%s10128_s11 + $0x1ec] sm:$0xf0] }
 0x380   :  { %v1902_v25 = vsel %vm1901_vm0, %v1891_v29, %v8024_v13  ;;  %v4951_v40 = vrot.slane %v8179_v35, 9  ;;  %v1451_v13 = vpop.f32.mrf.mxu2  ;;  %v1525_v47 = vrot.slane %v8179_v35, 2  ;;  %v1816_v29 = vmax.f32 %v1519_v11, %v4944_v54  ;;  %v5229_v11 = vld [vmem:[%s10128_s11 + $0x1c0] sm:$0xf] }
 0x381   :  { %v1383_v36 = vpop.f32.mrf.mxu1  ;;  %v1526_v42 = vrot.slane %v8179_v35, 4 }
 0x382   :  { %v1384_v43 = vadd.f32 %v8150_v8, %v1383_v36  ;;  %v1823_v63 = vmax.f32 %v8179_v35, %v4951_v40  ;;  %v1864_v46 = vmax.f32 %v1816_v29, %v1820_v30 }
 0x383   :  { %v4953_v54 = vrot.slane %v1526_v42, 9 }
 0x384   :  { %v1449_v3 = vadd.f32 %v1448_v28, %v1384_v43  ;;  %5000 = vmatmul.msk.bf16.vlgmr.msrb.gmra.mxu3 %vm1164_vm4, %v8160_v1  ;;  %v5070_v28 = vor.u32 %v6301_v48, %v5069_v0  ;;  %v1817_v43 = vmax.f32 %v1520_v34, %v4945_v6  ;;  %v1922_v52 = vperm.slane %v1864_v46, 0  ;;  %v5021_v48 = vld [vmem:[%s10128_s11 + $0x20] sm:$0xf]  ;;  %v6285_v46 = vld [vmem:[%s10128_s11 + $0xc] sm:$0xf0] }
 0x385   :  { %2515 = vmatpush.bf16.msrb.mxu3 %v4998_v55  ;;  %v5245_v55 = vld [vmem:[%s10128_s11 + $0x1e0] sm:$0xf] }
 0x386   :  { %v8183_v14 = vmax.f32 %v1449_v3, 0.0  ;;  %v1865_v18 = vmax.f32 %v1817_v43, %v1821_v59 }
 0x388   :  { %v4955_v57 = vrot.slane %v8183_v14, 9  ;;  %v1454_v9 = vpop.f32.mrf.mxu2  ;;  %v1528_v12 = vrot.slane %v8183_v14, 2  ;;  %v1530_v41 = vrot.slane %v8183_v14, 6 }
 0x38a   :  { %v1827_v2 = vmax.f32 %v8183_v14, %v4955_v57  ;;  %v4956_v33 = vrot.slane %v1528_v12, 9 }
 0x38c   :  { %v1867_v49 = vmax.f32 %v1823_v63, %v1827_v2  ;;  %v5053_v63 = vld [vmem:[%s10128_s11 + $0x60] sm:$0xf]  ;;  %v6297_v2 = vld [vmem:[%s10128_s11 + $0x6c] sm:$0xf0]  ;;  %v1828_v56 = vmax.f32 %v1528_v12, %v4956_v33 }
 0x38d   :  { %v5054_v17 = vor.u32 %v6297_v2, %v5053_v63  ;;  %v5213_v63 = vld [vmem:[%s10128_s11 + $0x1a0] sm:$0xf]  ;;  %v6337_v2 = vld [vmem:[%s10128_s11 + $0x1ac] sm:$0xf0] }
 0x38e   :  { %v1892_v16 = vperm.slane %v1867_v49, 0  ;;  %v4950_v49 = vrot.slane %v1524_v24, 9 }
 0x390   :  { %v1386_v23 = vpop.f32.mrf.mxu1  ;;  %v8210_v22 = vsel %vm1903_vm1, %v1892_v16, %v1902_v25  ;;  %v4952_v25 = vrot.slane %v1525_v47, 9  ;;  %v1457_v40 = vpop.f32.mrf.mxu2 }
 0x391   :  { %v1387_v37 = vadd.f32 %v8150_v8, %v1386_v23  ;;  %v1527_v23 = vrot.slane %v8179_v35, 6 }
 0x393   :  { %v1452_v26 = vadd.f32 %v1451_v13, %v1387_v37  ;;  %v8255_v13 = vrot.slane %v1521_v5, 9  ;;  %v8302_v33 = vrot.slane %v1527_v23, 9 }
 0x394   :  { %5001 = vmatmul.msk.bf16.vlgmr.msra.gmra.mxu3 %vm1164_vm4, %v8160_v1 }
 0x395   :  { %3801 = vmatpush.bf16.msra.mxu3 %v5118_v51  ;;  %v8232_v45 = vmax.f32 %v1452_v26, 0.0  ;;  %v1824_v51 = vmax.f32 %v1525_v47, %v4952_v25  ;;  %v6341_v26 = vld [vmem:[%s10128_s11 + $0x1cc] sm:$0xf0]  ;;  %v8313_v25 = vrot.slane %v1530_v41, 9 }
 0x396   :  { %v5230_v12 = vor.u32 %v6341_v26, %v5229_v11 }
 0x397   :  { %v4959_v36 = vrot.slane %v8232_v45, 9 }
 0x398   :  { %v1389_v58 = vpop.f32.mrf.mxu1  ;;  %v1460_v6 = vpop.f32.mrf.mxu2 }
 0x399   :  { %v1390_v53 = vadd.f32 %v8150_v8, %v1389_v58  ;;  %3802 = vmatpush.bf16.msra.mxu3 %v5102_v62  ;;  %v1831_v50 = vmax.f32 %v8232_v45, %v4959_v36  ;;  %v1868_v62 = vmax.f32 %v1824_v51, %v1828_v56  ;;  %v1529_v58 = vrot.slane %v8183_v14, 4 }
 0x39a   :  { %v8329_v56 = vmax.f32 %v1524_v24, %v4950_v49  ;;  %v1825_v24 = vmax.f32 %v1526_v42, %v4953_v54 }
 0x39b   :  { %v1455_v15 = vadd.f32 %v1454_v9, %v1390_v53  ;;  %v5246_v9 = vor.u32 %v6345_v4, %v5245_v55  ;;  %v1531_v53 = vrot.slane %v8232_v45, 2  ;;  %v8309_v29 = vperm.slane %v1868_v62, 0  ;;  %v5197_v55 = vld [vmem:[%s10128_s11 + $0x180] sm:$0xf]  ;;  %v6573_v4 = vld [vmem:[#allocation2 + $0xf4] sm:$0xf] }
 0x39c   :  { %v4957_v36 = vrot.slane %v1529_v58, 9 }
 0x39d   :  { %v8243_v20 = vmax.f32 %v1455_v15, 0.0  ;;  %3803 = vmatpush.bf16.msra.mxu3 %v5086_v38  ;;  %3814 = vmatpush.bf16.msra.mxu2 %v5246_v9  ;;  %v8292_v15 = vperm.slane %v1865_v18, 0  ;;  %v5038_v38 = vor.u32 %v6293_v39, %v5037_v60  ;;  %v4960_v43 = vrot.slane %v1531_v53, 9  ;;  %v6151_v39 = vld [vmem:[#allocation2 + $0xf8] sm:$0xf0] }
 0x39e   :  { %v5214_v18 = vor.u32 %v6337_v2, %v5213_v63  ;;  %v1829_v49 = vmax.f32 %v1529_v58, %v4957_v36 }
 0x39f   :  { %v4963_v3 = vrot.slane %v8243_v20, 9  ;;  %v1534_v37 = vrot.slane %v8243_v20, 2 }
 0x3a0   :  { %v1392_v57 = vpop.f32.mrf.mxu1 }
 0x3a1   :  { %v1393_v44 = vadd.f32 %v8150_v8, %v1392_v57  ;;  %v1835_v7 = vmax.f32 %v8243_v20, %v4963_v3  ;;  %3804 = vmatpush.bf16.msra.mxu3 %v5070_v28  ;;  %v4964_v0 = vrot.slane %v1534_v37, 9  ;;  %v1532_v3 = vrot.slane %v8232_v45, 4  ;;  %3815 = vmatpush.bf16.msra.mxu2 %v5230_v12 }
 0x3a3   :  { %v1458_v16 = vadd.f32 %v1457_v40, %v1393_v44  ;;  %v1871_v34 = vmax.f32 %v1831_v50, %v1835_v7  ;;  %v1535_v40 = vrot.slane %v8243_v20, 4  ;;  %v1836_v44 = vmax.f32 %v1534_v37, %v4964_v0  ;;  %v6333_v50 = vld [vmem:[%s10128_s11 + $0x18c] sm:$0xf0] }
 0x3a4   :  { %5002 = vmatmul.msk.bf16.vlgmr.msrb.gmra.mxu3 %vm1164_vm4, %v8160_v1  ;;  %v6289_v1 = vld [vmem:[%s10128_s11 + $0x2c] sm:$0xf0]  ;;  %v5198_v60 = vor.u32 %v6333_v50, %v5197_v55  ;;  %vm4811_vm4 = vcmask 9216  }
 0x3a5   :  { %v8285_v19 = vmax.f32 %v1458_v16, 0.0  ;;  %v1893_v61 = vperm.slane %v1871_v34, 0  ;;  %3805 = vmatpush.bf16.msra.mxu3 %v5054_v17  ;;  %v5373_v16 = vld [vmem:[%s10128_s11 + $0x2e0] sm:$0xf]  ;;  %v6377_v37 = vld [vmem:[%s10128_s11 + $0x2ec] sm:$0xf0]  ;;  %v1832_v17 = vmax.f32 %v1531_v53, %v4960_v43  ;;  %3816 = vmatpush.bf16.msra.mxu2 %v5214_v18  ;;  %v6154_v34 = vor.u32 %v6573_v4, %v6151_v39 }
 0x3a6   :  { %v4965_v58 = vrot.slane %v1535_v40, 9  ;;  %v5374_v12 = vor.u32 %v6377_v37, %v5373_v16  ;;  %v1929_v53 = vsel %vm1901_vm0, %v1922_v52, %v8035_v32  ;;  %v6373_v0 = vld [vmem:[%s10128_s11 + $0x2cc] sm:$0xf0] }
 0x3a7   :  { %v8306_v30 = vsel %vm1905_vm2, %v1893_v61, %v8210_v22  ;;  %v1537_v28 = vrot.slane %v8285_v19, 2  ;;  %v5022_v22 = vor.u32 %v6289_v1, %v5021_v48  ;;  %v1538_v31 = vrot.slane %v8285_v19, 4  ;;  %4694 = vmatpush.bf16.msrb.mxu0 %v6154_v34  ;;  %v6369_v39 = vld [vmem:[%s10128_s11 + $0x2ac] sm:$0xf0] }
 0x3a8   :  { %v1395_v47 = vpop.f32.mrf.mxu1  ;;  %v4967_v9 = vrot.slane %v8285_v19, 9  ;;  %v1872_v62 = vmax.f32 %v1832_v17, %v1836_v44  ;;  %v4961_v48 = vrot.slane %v1532_v3, 9  ;;  %v1533_v1 = vrot.slane %v8232_v45, 6 }
 0x3a9   :  { %v1396_v59 = vadd.f32 %v8150_v8, %v1395_v47  ;;  %3806 = vmatpush.bf16.msra.mxu3 %v5038_v38  ;;  %v5005_v8 = vld [vmem:[%s10128_s11] sm:$0xf]  ;;  %v4968_v51 = vrot.slane %v1537_v28, 9  ;;  %v1869_v47 = vmax.f32 %v1825_v24, %v1829_v49  ;;  %3817 = vmatpush.bf16.msra.mxu2 %v5198_v60  ;;  %v4969_v43 = vrot.slane %v1538_v31, 9 }
 0x3aa   :  { %v5006_v26 = vor.u32 %v6285_v46, %v5005_v8  ;;  %v1837_v8 = vmax.f32 %v1535_v40, %v4965_v58  ;;  %v1539_v18 = vrot.slane %v8285_v19, 6  ;;  %v1833_v50 = vmax.f32 %v1532_v3, %v4961_v48  ;;  %v5165_v58 = vld [vmem:[%s10128_s11 + $0x140] sm:$0xf] }
 0x3ab   :  { %v1461_v57 = vadd.f32 %v1460_v6, %v1396_v59  ;;  %v5357_v6 = vld [vmem:[%s10128_s11 + $0x2c0] sm:$0xf]  ;;  %v1839_v59 = vmax.f32 %v8285_v19, %v4967_v9  ;;  %v1840_v52 = vmax.f32 %v1537_v28, %v4968_v51  ;;  %v1949_v28 = vperm.slane %v1869_v47, 0 }
 0x3ac   :  { %v5358_v63 = vor.u32 %v6373_v0, %v5357_v6  ;;  %v1930_v40 = vsel %vm1903_vm1, %v8309_v29, %v1929_v53  ;;  %v1841_v16 = vmax.f32 %v1538_v31, %v4969_v43  ;;  %v4962_v37 = vrot.slane %v1533_v1, 9  ;;  %v5181_v29 = vld [vmem:[%s10128_s11 + $0x160] sm:$0xf]  ;;  %v6321_v43 = vld [vmem:[%s10128_s11 + $0x12c] sm:$0xf0] }
 0x3ad   :  { %v8340_v7 = vmax.f32 %v1461_v57, 0.0  ;;  %3807 = vmatpush.bf16.msra.mxu3 %v5022_v22  ;;  %v1536_v57 = vrot.slane %v8243_v20, 6  ;;  %v1924_v22 = vperm.slane %v1872_v62, 0  ;;  %v1830_v20 = vmax.f32 %v1530_v41, %v8313_v25  ;;  %v5501_v9 = vld [vmem:[%s10128_s11 + $0x3e0] sm:$0xf] }
 0x3ae   :  { %v1873_v19 = vmax.f32 %v1833_v50, %v1837_v8  ;;  %v4970_v41 = vrot.slane %v1539_v18, 9  ;;  %v1818_v31 = vmax.f32 %v1521_v5, %v8255_v13  ;;  %v1826_v60 = vmax.f32 %v1527_v23, %v8302_v33  ;;  %v6361_v8 = vld [vmem:[%s10128_s11 + $0x26c] sm:$0xf0] }
 0x3af   :  { %v1540_v11 = vrot.slane %v8340_v7, 2  ;;  %v1541_v42 = vrot.slane %v8340_v7, 4  ;;  %v4971_v61 = vrot.slane %v8340_v7, 9  ;;  %v1542_v55 = vrot.slane %v8340_v7, 6 }
 0x3b0   :  { %v1931_v51 = vsel %vm1905_vm2, %v1924_v22, %v1930_v40  ;;  %v4966_v17 = vrot.slane %v1536_v57, 9  ;;  %v1866_v23 = vmax.f32 %v1818_v31, %v8329_v56  ;;  %v1870_v33 = vmax.f32 %v1826_v60, %v1830_v20  ;;  %v5325_v56 = vld [vmem:[%s10128_s11 + $0x280] sm:$0xf]  ;;  %v6317_v20 = vld [vmem:[%s10128_s11 + $0x10c] sm:$0xf0] }
 0x3b1   :  { %v4972_v54 = vrot.slane %v1540_v11, 9  ;;  %v4973_v38 = vrot.slane %v1541_v42, 9  ;;  %v1843_v32 = vmax.f32 %v8340_v7, %v4971_v61  ;;  %3808 = vmatpush.bf16.msra.mxu3 %v5006_v26  ;;  %v4974_v25 = vrot.slane %v1542_v55, 9  ;;  %v6329_v7 = vld [vmem:[%s10128_s11 + $0x16c] sm:$0xf0] }
 0x3b2   :  { %v5182_v4 = vor.u32 %v6329_v7, %v5181_v29  ;;  %v1838_v27 = vmax.f32 %v1536_v57, %v4966_v17  ;;  %v1955_v34 = vsel %vm1901_vm0, %v8292_v15, %v8038_v21  ;;  %v1834_v62 = vmax.f32 %v1533_v1, %v4962_v37  ;;  %v6365_v21 = vld [vmem:[%s10128_s11 + $0x28c] sm:$0xf0]  ;;  %v5485_v15 = vld [vmem:[%s10128_s11 + $0x3c0] sm:$0xf] }
 0x3b3   :  { %v1844_v36 = vmax.f32 %v1540_v11, %v4972_v54  ;;  %v1875_v2 = vmax.f32 %v1839_v59, %v1843_v32  ;;  %v1845_v46 = vmax.f32 %v1541_v42, %v4973_v38  ;;  %v6409_v11 = vld [vmem:[%s10128_s11 + $0x3ec] sm:$0xf0]  ;;  %v1950_v42 = vperm.slane %v1873_v19, 0  ;;  %v5309_v57 = vld [vmem:[%s10128_s11 + $0x260] sm:$0xf] }
 0x3b4   :  { %v5502_v13 = vor.u32 %v6409_v11, %v5501_v9  ;;  %v1846_v35 = vmax.f32 %v1542_v55, %v4974_v25  ;;  %3818 = vmatpush.bf16.msra.mxu2 %v5182_v4  ;;  %v1956_v61 = vsel %vm1903_vm1, %v1949_v28, %v1955_v34  ;;  %v1842_v54 = vmax.f32 %v1539_v18, %v4970_v41  ;;  %v6405_v38 = vld [vmem:[%s10128_s11 + $0x3cc] sm:$0xf0]  ;;  %v5133_v28 = vld [vmem:[%s10128_s11 + $0x100] sm:$0xf] }
 0x3b5   :  { %3827 = vmatpush.bf16.msrb.mxu3 %v5374_v12  ;;  %v1876_v44 = vmax.f32 %v1840_v52, %v1844_v36  ;;  %v1894_v24 = vperm.slane %v1875_v2, 0  ;;  %v1877_v14 = vmax.f32 %v1841_v16, %v1845_v46  ;;  %v6325_v12 = vld [vmem:[%s10128_s11 + $0x14c] sm:$0xf0]  ;;  %v1957_v47 = vsel %vm1905_vm2, %v1950_v42, %v1956_v61  ;;  %v5149_v36 = vld [vmem:[%s10128_s11 + $0x120] sm:$0xf] }
 0x3b6   :  { %3840 = vmatpush.bf16.msrb.mxu1 %v5502_v13  ;;  %v5166_v53 = vor.u32 %v6325_v12, %v5165_v58  ;;  %v1874_v6 = vmax.f32 %v1834_v62, %v1838_v27  ;;  %v5326_v0 = vor.u32 %v6365_v21, %v5325_v56  ;;  %v5486_v48 = vor.u32 %v6405_v38, %v5485_v15  ;;  %v6401_v2 = vld [vmem:[%s10128_s11 + $0x3ac] sm:$0xf0]  ;;  %v5453_v16 = vld [vmem:[%s10128_s11 + $0x380] sm:$0xf] }
 0x3b7   :  { %v1925_v49 = vperm.slane %v1876_v44, 0  ;;  %v8381_v45 = vsel %vm1907_vm3, %v1894_v24, %v8306_v30  ;;  %v5341_v30 = vld [vmem:[%s10128_s11 + $0x2a0] sm:$0xf]  ;;  %v1951_v26 = vperm.slane %v1877_v14, 0  ;;  %v1878_v59 = vmax.f32 %v1842_v54, %v1846_v35  ;;  %v6397_v37 = vld [vmem:[%s10128_s11 + $0x38c] sm:$0xf0] }
 0x3b8   :  { %v5342_v5 = vor.u32 %v6369_v39, %v5341_v30  ;;  %v1974_v32 = vperm.slane %v1866_v23, 0  ;;  %v1975_v52 = vperm.slane %v1870_v33, 0  ;;  %3819 = vmatpush.bf16.msra.mxu2 %v5166_v53  ;;  %v5150_v22 = vor.u32 %v6321_v43, %v5149_v36  ;;  %v5293_v24 = vld [vmem:[%s10128_s11 + $0x240] sm:$0xf]  ;;  %v6353_v41 = vld [vmem:[%s10128_s11 + $0x22c] sm:$0xf0] }
 0x3b9   :  { %3828 = vmatpush.bf16.msrb.mxu3 %v5358_v63  ;;  %v1932_v3 = vsel %vm1907_vm3, %v1925_v49, %v1931_v51  ;;  %v1958_v1 = vsel %vm1907_vm3, %v1951_v26, %v1957_v47  ;;  %v5469_v63 = vld [vmem:[%s10128_s11 + $0x3a0] sm:$0xf]  ;;  %v1976_v44 = vperm.slane %v1874_v6, 0  ;;  %v5310_v46 = vor.u32 %v6361_v8, %v5309_v57  ;;  %v6393_v7 = vld [vmem:[%s10128_s11 + $0x36c] sm:$0xf0] }
 0x3ba   :  { %1933 = vrot.lane.b32.xlu1 %v1932_v3, %s6934_s25  ;;  %3841 = vmatpush.bf16.msrb.mxu1 %v5486_v48  ;;  %v5470_v18 = vor.u32 %v6401_v2, %v5469_v63  ;;  %v1977_v55 = vperm.slane %v1878_v59, 0  ;;  %v1981_v50 = vsel %vm1901_vm0, %v1974_v32, %v8041_v10  ;;  %v5134_v40 = vor.u32 %v6317_v20, %v5133_v28  ;;  %v6357_v10 = vld [vmem:[%s10128_s11 + $0x24c] sm:$0xf0]  ;;  %v5277_v14 = vld [vmem:[%s10128_s11 + $0x220] sm:$0xf] }
 0x3bb   :  { %v1982_v49 = vsel %vm1903_vm1, %v1975_v52, %v1981_v50  ;;  %v5294_v19 = vor.u32 %v6357_v10, %v5293_v24  ;;  %v5454_v17 = vor.u32 %v6397_v37, %v5453_v16  ;;  %v5437_v25 = vld [vmem:[%s10128_s11 + $0x360] sm:$0xf]  ;;  %v5278_v29 = vor.u32 %v6353_v41, %v5277_v14  ;;  %v6349_v60 = vld [vmem:[%s10128_s11 + $0x20c] sm:$0xf0] }
 0x3bc   :  { %3820 = vmatpush.bf16.msra.mxu2 %v5150_v22  ;;  %v1983_v51 = vsel %vm1905_vm2, %v1976_v44, %v1982_v49  ;;  %v5438_v30 = vor.u32 %v6393_v7, %v5437_v25  ;;  %v5261_v31 = vld [vmem:[%s10128_s11 + $0x200] sm:$0xf]  ;;  %v6389_v9 = vld [vmem:[%s10128_s11 + $0x34c] sm:$0xf0]  ;;  %v6571_v44 = vld [vmem:[#allocation2 + $0xe4] sm:$0xf] }
 0x3bd   :  { %3829 = vmatpush.bf16.msrb.mxu3 %v5342_v5  ;;  %v1984_v3 = vsel %vm1907_vm3, %v1977_v55, %v1983_v51  ;;  %v5421_v4 = vld [vmem:[%s10128_s11 + $0x340] sm:$0xf]  ;;  %v5262_v39 = vor.u32 %v6349_v60, %v5261_v31  ;;  %v6385_v27 = vld [vmem:[%s10128_s11 + $0x32c] sm:$0xf0] }
 0x3be   :  { %3842 = vmatpush.bf16.msrb.mxu1 %v5470_v18  ;;  %v5422_v11 = vor.u32 %v6389_v9, %v5421_v4  ;;  %v5405_v42 = vld [vmem:[%s10128_s11 + $0x320] sm:$0xf]  ;;  %v6381_v23 = vld [vmem:[%s10128_s11 + $0x30c] sm:$0xf0] }
 0x3bf   :  { %v8510_v5 = vld [vmem:[%s10125_s8] sm:$0xf]  ;;  %v5406_v13 = vor.u32 %v6385_v27, %v5405_v42  ;;  %v6441_v62 = vld [vmem:[%s10128_s11 + $0x4ec] sm:$0xf0] }
 0x3c0   :  { %3821 = vmatpush.bf16.msra.mxu2 %v5134_v40  ;;  %v2041_v26 = vperm.slane %v8510_v5, 0  ;;  %v5389_v35 = vld [vmem:[%s10128_s11 + $0x300] sm:$0xf]  ;;  %v6505_v54 = vld [vmem:[%s10128_s11 + $0x6ec] sm:$0xf0]  ;;  %v2042_v59 = vperm.slane %v8510_v5, 1 }
 0x3c1   :  { %3830 = vmatpush.bf16.msrb.mxu3 %v5326_v0  ;;  %v5390_v33 = vor.u32 %v6381_v23, %v5389_v35  ;;  %v5629_v34 = vld [vmem:[%s10128_s11 + $0x4e0] sm:$0xf]  ;;  %v6473_v21 = vld [vmem:[%s10128_s11 + $0x5ec] sm:$0xf0]  ;;  %v2043_v31 = vperm.slane %v8510_v5, 2 }
 0x3c2   :  { %1959 = vrot.lane.b32.xlu1 %v1958_v1, %s6936_s3  ;;  %3843 = vmatpush.bf16.msrb.mxu1 %v5454_v17  ;;  %v5630_v12 = vor.u32 %v6441_v62, %v5629_v34  ;;  %v5757_v56 = vld [vmem:[%s10128_s11 + $0x5e0] sm:$0xf]  ;;  %v6437_v47 = vld [vmem:[%s10128_s11 + $0x4cc] sm:$0xf0]  ;;  %s4818_s3 = sshll.u32 %s6940_s21, 4  ;;  %s4819_s3 = int_to_ptr.vmem [resolvable:$true] %s4818_s3 }
 0x3c3   :  { %v5885_v61 = vld [vmem:[%s10128_s11 + $0x6e0] sm:$0xf]  ;;  %v6501_v48 = vld [vmem:[%s10128_s11 + $0x6cc] sm:$0xf0]  ;;  %v5758_v43 = vor.u32 %v6473_v21, %v5757_v56 }
 0x3c4   :  { %v5886_v15 = vor.u32 %v6505_v54, %v5885_v61  ;;  %v5613_v38 = vld [vmem:[%s10128_s11 + $0x4c0] sm:$0xf]  ;;  %3853 = vmatpush.bf16.msrb.mxu2 %v5630_v12  ;;  %v6433_v36 = vld [vmem:[%s10128_s11 + $0x4ac] sm:$0xf0] }
 0x3c5   :  { %3831 = vmatpush.bf16.msrb.mxu3 %v5310_v46  ;;  %v5614_v6 = vor.u32 %v6437_v47, %v5613_v38  ;;  %v5869_v0 = vld [vmem:[%s10128_s11 + $0x6c0] sm:$0xf]  ;;  %v6469_v22 = vld [vmem:[%s10128_s11 + $0x5cc] sm:$0xf0]  ;;  %v6143_v46 = vld [vmem:[#allocation2 + $0xe8] sm:$0xf0] }
 0x3c6   :  { %3844 = vmatpush.bf16.msrb.mxu1 %v5438_v30  ;;  %v5870_v32 = vor.u32 %v6501_v48, %v5869_v0  ;;  %v5597_v52 = vld [vmem:[%s10128_s11 + $0x4a0] sm:$0xf]  ;;  %v6497_v2 = vld [vmem:[%s10128_s11 + $0x6ac] sm:$0xf0]  ;;  %v6146_v55 = vor.u32 %v6571_v44, %v6143_v46  ;;  %v2044_v38 = vperm.slane %v8510_v5, 3 }
 0x3c7   :  { %v5741_v57 = vld [vmem:[%s10128_s11 + $0x5c0] sm:$0xf]  ;;  %v5598_v18 = vor.u32 %v6433_v36, %v5597_v52  ;;  %v6429_v20 = vld [vmem:[%s10128_s11 + $0x48c] sm:$0xf0]  ;;  %v6343_v46 = vld [vmem:[%s10128_s11 + $0x1e4] sm:$0xf] }
 0x3c8   :  { %v5853_v8 = vld [vmem:[%s10128_s11 + $0x6a0] sm:$0xf]  ;;  %3854 = vmatpush.bf16.msrb.mxu2 %v5614_v6  ;;  %v5742_v49 = vor.u32 %v6469_v22, %v5741_v57  ;;  %4695 = vmatpush.bf16.msrb.mxu0 %v6146_v55  ;;  %v6493_v10 = vld [vmem:[%s10128_s11 + $0x68c] sm:$0xf0] }
 0x3c9   :  { %3832 = vmatpush.bf16.msrb.mxu3 %v5294_v19  ;;  %v5854_v50 = vor.u32 %v6497_v2, %v5853_v8  ;;  %v5581_v28 = vld [vmem:[%s10128_s11 + $0x480] sm:$0xf]  ;;  %v6465_v51 = vld [vmem:[%s10128_s11 + $0x5ac] sm:$0xf0] }
 0x3ca   :  { %1985 = vrot.lane.b32.xlu1 %v1984_v3, %s6937_s29  ;;  %3845 = vmatpush.bf16.msrb.mxu1 %v5422_v11  ;;  %v5837_v40 = vld [vmem:[%s10128_s11 + $0x680] sm:$0xf]  ;;  %v5582_v19 = vor.u32 %v6429_v20, %v5581_v28  ;;  %v6425_v41 = vld [vmem:[%s10128_s11 + $0x46c] sm:$0xf0] }
 0x3cb   :  { %v5725_v37 = vld [vmem:[%s10128_s11 + $0x5a0] sm:$0xf]  ;;  %v5838_v3 = vor.u32 %v6493_v10, %v5837_v40  ;;  %v6489_v7 = vld [vmem:[%s10128_s11 + $0x66c] sm:$0xf0] }
 0x3cc   :  { %3855 = vmatpush.bf16.msrb.mxu2 %v5598_v18  ;;  %v5565_v14 = vld [vmem:[%s10128_s11 + $0x460] sm:$0xf]  ;;  %v5726_v25 = vor.u32 %v6465_v51, %v5725_v37  ;;  %v6461_v4 = vld [vmem:[%s10128_s11 + $0x58c] sm:$0xf0]  ;;  %v5247_v18 = vld [vmem:[%s10128_s11 + $0x1f0] sm:$0xf0] }
 0x3cd   :  { %3833 = vmatpush.bf16.msrb.mxu3 %v5278_v29  ;;  %v5821_v29 = vld [vmem:[%s10128_s11 + $0x660] sm:$0xf]  ;;  %v6421_v42 = vld [vmem:[%s10128_s11 + $0x44c] sm:$0xf0]  ;;  %v6311_v37 = vld [vmem:[%s10128_s11 + $0xe4] sm:$0xf]  ;;  %v5250_v51 = vor.u32 %v6343_v46, %v5247_v18 }
 0x3ce   :  { %3846 = vmatpush.bf16.msrb.mxu1 %v5406_v13  ;;  %v5709_v60 = vld [vmem:[%s10128_s11 + $0x580] sm:$0xf]  ;;  %v5822_v9 = vor.u32 %v6489_v7, %v5821_v29  ;;  %v6485_v35 = vld [vmem:[%s10128_s11 + $0x64c] sm:$0xf0]  ;;  %v5167_v46 = vld [vmem:[%s10128_s11 + $0x150] sm:$0xf0] }
 0x3cf   :  { %v5549_v11 = vld [vmem:[%s10128_s11 + $0x440] sm:$0xf]  ;;  %v5710_v13 = vor.u32 %v6461_v4, %v5709_v60  ;;  %v6457_v34 = vld [vmem:[%s10128_s11 + $0x56c] sm:$0xf0]  ;;  %v5103_v60 = vld [vmem:[%s10128_s11 + $0xd0] sm:$0xf0] }
 0x3d0   :  { %3856 = vmatpush.bf16.msrb.mxu2 %v5582_v19  ;;  %v5550_v62 = vor.u32 %v6421_v42, %v5549_v11  ;;  %v5533_v56 = vld [vmem:[%s10128_s11 + $0x420] sm:$0xf]  ;;  %v6417_v61 = vld [vmem:[%s10128_s11 + $0x42c] sm:$0xf0]  ;;  %v5119_v19 = vld [vmem:[%s10128_s11 + $0xf0] sm:$0xf0] }
 0x3d1   :  { %3834 = vmatpush.bf16.msrb.mxu3 %v5262_v39  ;;  %v5566_v39 = vor.u32 %v6425_v41, %v5565_v14  ;;  %v6481_v21 = vld [vmem:[%s10128_s11 + $0x62c] sm:$0xf0]  ;;  %v5677_v47 = vld [vmem:[%s10128_s11 + $0x540] sm:$0xf]  ;;  %v5534_v0 = vor.u32 %v6417_v61, %v5533_v56  ;;  %v5122_v29 = vor.u32 %v6311_v37, %v5119_v19  ;;  %v5071_v61 = vld [vmem:[%s10128_s11 + $0x90] sm:$0xf0] }
 0x3d2   :  { %3847 = vmatpush.bf16.msrb.mxu1 %v5390_v33  ;;  %v5693_v33 = vld [vmem:[%s10128_s11 + $0x560] sm:$0xf]  ;;  %v6453_v6 = vld [vmem:[%s10128_s11 + $0x54c] sm:$0xf0]  ;;  %v5151_v37 = vld [vmem:[%s10128_s11 + $0x130] sm:$0xf0] }
 0x3d3   :  { %v5694_v54 = vor.u32 %v6457_v34, %v5693_v33  ;;  %v6413_v5 = vld [vmem:[%s10128_s11 + $0x40c] sm:$0xf0]  ;;  %v5661_v52 = vld [vmem:[%s10128_s11 + $0x520] sm:$0xf] }
 0x3d4   :  { %3857 = vmatpush.bf16.msrb.mxu2 %v5566_v39  ;;  %v6013_v36 = vld [vmem:[%s10128_s11 + $0x7e0] sm:$0xf]  ;;  %v6449_v22 = vld [vmem:[%s10128_s11 + $0x52c] sm:$0xf0] }
 0x3d5   :  { %v5773_v8 = vld [vmem:[%s10128_s11 + $0x600] sm:$0xf]  ;;  %v6477_v2 = vld [vmem:[%s10128_s11 + $0x60c] sm:$0xf0]  ;;  %v5662_v28 = vor.u32 %v6449_v22, %v5661_v52  ;;  %v6291_v22 = vld [vmem:[%s10128_s11 + $0x44] sm:$0xf] }
 0x3d6   :  { %3879 = vmatpush.bf16.msra.mxu1 %v5886_v15  ;;  %v5774_v20 = vor.u32 %v6477_v2, %v5773_v8  ;;  %v5645_v10 = vld [vmem:[%s10128_s11 + $0x500] sm:$0xf]  ;;  %v6529_v42 = vld [vmem:[%s10128_s11 + $0x7ac] sm:$0xf0]  ;;  %v5039_v2 = vld [vmem:[%s10128_s11 + $0x50] sm:$0xf0] }
 0x3d7   :  { %v2093_v58 = vpop.f32.mrf.mxu3  ;;  %v5981_v11 = vld [vmem:[%s10128_s11 + $0x7a0] sm:$0xf] }
 0x3d8   :  { %v2094_v53 = vadd.f32 %v2093_v58, %v2041_v26  ;;  %v5805_v26 = vld [vmem:[%s10128_s11 + $0x640] sm:$0xf]  ;;  %3858 = vmatpush.bf16.msrb.mxu2 %v5550_v62 }
 0x3d9   :  { %v5806_v12 = vor.u32 %v6485_v35, %v5805_v26  ;;  %v5087_v26 = vld [vmem:[%s10128_s11 + $0xb0] sm:$0xf0]  ;;  %v6335_v35 = vld [vmem:[%s10128_s11 + $0x1a4] sm:$0xf]  ;;  %v5965_v62 = vld [vmem:[%s10128_s11 + $0x780] sm:$0xf] }
 0x3da   :  { %v2156_v1 = vmax.f32 %v2094_v53, 0.0  ;;  %3880 = vmatpush.bf16.msra.mxu1 %v5870_v32  ;;  %v5789_v53 = vld [vmem:[%s10128_s11 + $0x620] sm:$0xf]  ;;  %v5678_v32 = vor.u32 %v6453_v6, %v5677_v47 }
 0x3db   :  { %v5790_v48 = vor.u32 %v6481_v21, %v5789_v53  ;;  %v5199_v53 = vld [vmem:[%s10128_s11 + $0x190] sm:$0xf0]  ;;  %v5949_v6 = vld [vmem:[%s10128_s11 + $0x760] sm:$0xf] }
 0x3dc   :  { %v8565_v63 = vpack.c.bf16 %v2156_v1, %v2156_v1  ;;  %v5517_v1 = vld [vmem:[%s10128_s11 + $0x400] sm:$0xf]  ;;  %3859 = vmatpush.bf16.msrb.mxu2 %v5534_v0  ;;  %v6521_v0 = vld [vmem:[%s10128_s11 + $0x76c] sm:$0xf0] }
 0x3dd   :  { %v5518_v44 = vor.u32 %v6413_v5, %v5517_v1  ;;  %v5950_v1 = vor.u32 %v6521_v0, %v5949_v6  ;;  %v5055_v5 = vld [vmem:[%s10128_s11 + $0x70] sm:$0xf0] }
 0x3de   :  { %3809 = vmatmul.bf16.vlgmr.msra.gmra.mxu3 %v8565_v63  ;;  %3881 = vmatpush.bf16.msra.mxu1 %v5854_v50 }
 0x3df   :  { %v2113_v24 = vpop.f32.mrf.mxu3  ;;  %3866 = vmatpush.bf16.msra.mxu3 %v5758_v43  ;;  %v6537_v43 = vld [vmem:[%s10128_s11 + $0x7ec] sm:$0xf0] }
 0x3e0   :  { %v2114_v16 = vadd.f32 %v2113_v24, %v2042_v59  ;;  %v6014_v50 = vor.u32 %v6537_v43, %v6013_v36  ;;  %v5997_v24 = vld [vmem:[%s10128_s11 + $0x7c0] sm:$0xf]  ;;  %3860 = vmatpush.bf16.msrb.mxu2 %v5518_v44  ;;  %v6323_v44 = vld [vmem:[%s10128_s11 + $0x144] sm:$0xf] }
 0x3e1   :  { %v5933_v43 = vld [vmem:[%s10128_s11 + $0x740] sm:$0xf] }
 0x3e2   :  { %v2157_v17 = vmax.f32 %v2114_v16, 0.0  ;;  %3882 = vmatpush.bf16.msra.mxu1 %v5838_v3  ;;  %v6445_v16 = vld [vmem:[%s10128_s11 + $0x50c] sm:$0xf0]  ;;  %v5231_v3 = vld [vmem:[%s10128_s11 + $0x1d0] sm:$0xf0] }
 0x3e3   :  { %3867 = vmatpush.bf16.msra.mxu3 %v5742_v49  ;;  %v6533_v49 = vld [vmem:[%s10128_s11 + $0x7cc] sm:$0xf0] }
 0x3e4   :  { %v8601_v30 = vpack.c.bf16 %v2157_v17, %v2157_v17  ;;  %v6339_v17 = vld [vmem:[%s10128_s11 + $0x1c4] sm:$0xf]  ;;  %v5998_v14 = vor.u32 %v6533_v49, %v5997_v24 }
 0x3e5   :  { %v5234_v7 = vor.u32 %v6339_v17, %v5231_v3  ;;  %v6287_v24 = vld [vmem:[%s10128_s11 + $0x24] sm:$0xf]  ;;  %v5901_v3 = vld [vmem:[%s10128_s11 + $0x700] sm:$0xf] }
 0x3e6   :  { %3822 = vmatmul.bf16.vlgmr.msra.gmra.mxu2 %v8601_v30  ;;  %3883 = vmatpush.bf16.msra.mxu1 %v5822_v9 }
 0x3e7   :  { %v2133_v27 = vpop.f32.mrf.mxu3  ;;  %3868 = vmatpush.bf16.msra.mxu3 %v5726_v25  ;;  %3892 = vmatpush.bf16.msra.mxu2 %v6014_v50  ;;  %v5646_v25 = vor.u32 %v6445_v16, %v5645_v10  ;;  %v5170_v50 = vor.u32 %v6323_v44, %v5167_v46  ;;  %v5023_v10 = vld [vmem:[%s10128_s11 + $0x30] sm:$0xf0]  ;;  %v6319_v16 = vld [vmem:[%s10128_s11 + $0x124] sm:$0xf] }
 0x3e8   :  { %v2134_v23 = vadd.f32 %v2133_v27, %v2043_v31  ;;  %v6307_v31 = vld [vmem:[%s10128_s11 + $0xc4] sm:$0xf]  ;;  %v5026_v19 = vor.u32 %v6287_v24, %v5023_v10  ;;  %v5154_v17 = vor.u32 %v6319_v16, %v5151_v37  ;;  %v5359_v44 = vld [vmem:[%s10128_s11 + $0x2d0] sm:$0xf0] }
 0x3e9   :  { %v5106_v4 = vor.u32 %v6307_v31, %v5103_v60  ;;  %v6303_v27 = vld [vmem:[%s10128_s11 + $0xa4] sm:$0xf]  ;;  %v5135_v60 = vld [vmem:[%s10128_s11 + $0x110] sm:$0xf0] }
 0x3ea   :  { %v2158_v58 = vmax.f32 %v2134_v23, 0.0  ;;  %3884 = vmatpush.bf16.msra.mxu1 %v5806_v12  ;;  %v5215_v23 = vld [vmem:[%s10128_s11 + $0x1b0] sm:$0xf0]  ;;  %v5090_v33 = vor.u32 %v6303_v27, %v5087_v26  ;;  %v6299_v12 = vld [vmem:[%s10128_s11 + $0x84] sm:$0xf] }
 0x3eb   :  { %3869 = vmatpush.bf16.msra.mxu3 %v5710_v13  ;;  %3893 = vmatpush.bf16.msra.mxu2 %v5998_v14  ;;  %v5982_v13 = vor.u32 %v6529_v42, %v5981_v11  ;;  %v5218_v34 = vor.u32 %v6335_v35, %v5215_v23  ;;  %v6509_v14 = vld [vmem:[%s10128_s11 + $0x70c] sm:$0xf0]  ;;  %v6315_v31 = vld [vmem:[%s10128_s11 + $0x104] sm:$0xf]  ;;  %v5343_v16 = vld [vmem:[%s10128_s11 + $0x2b0] sm:$0xf0] }
 0x3ec   :  { %v8641_v15 = vpack.c.bf16 %v2158_v58, %v2158_v58  ;;  %v6525_v58 = vld [vmem:[%s10128_s11 + $0x78c] sm:$0xf0]  ;;  %v6135_v35 = vld [vmem:[#allocation2 + $0xd8] sm:$0xf0] }
 0x3ed   :  { %v5966_v56 = vor.u32 %v6525_v58, %v5965_v62  ;;  %v6403_v46 = vld [vmem:[%s10128_s11 + $0x3c4] sm:$0xf] }
 0x3ee   :  { %3835 = vmatmul.bf16.vlgmr.msrb.gmra.mxu3 %v8641_v15  ;;  %3885 = vmatpush.bf16.msra.mxu1 %v5790_v48  ;;  %v6295_v48 = vld [vmem:[%s10128_s11 + $0x64] sm:$0xf] }
 0x3ef   :  { %v2153_v59 = vpop.f32.mrf.mxu3  ;;  %3870 = vmatpush.bf16.msra.mxu3 %v5694_v54  ;;  %3894 = vmatpush.bf16.msra.mxu2 %v5982_v13  ;;  %v6331_v54 = vld [vmem:[%s10128_s11 + $0x184] sm:$0xf]  ;;  %v5058_v52 = vor.u32 %v6295_v48, %v5055_v5  ;;  %v6569_v13 = vld [vmem:[#allocation2 + $0xd4] sm:$0xf] }
 0x3f0   :  { %v2154_v57 = vadd.f32 %v2153_v59, %v2044_v38  ;;  %v5074_v38 = vor.u32 %v6299_v12, %v5071_v61  ;;  %v5202_v47 = vor.u32 %v6331_v54, %v5199_v53  ;;  %v6327_v59 = vld [vmem:[%s10128_s11 + $0x164] sm:$0xf]  ;;  %v6138_v23 = vor.u32 %v6569_v13, %v6135_v35  ;;  %v5375_v61 = vld [vmem:[%s10128_s11 + $0x2f0] sm:$0xf0] }
 0x3f1   :  { %v6375_v12 = vld [vmem:[%s10128_s11 + $0x2e4] sm:$0xf] }
 0x3f2   :  { %v2159_v55 = vmax.f32 %v2154_v57, 0.0  ;;  %3886 = vmatpush.bf16.msra.mxu1 %v5774_v20  ;;  %v6517_v57 = vld [vmem:[%s10128_s11 + $0x74c] sm:$0xf0]  ;;  %4696 = vmatpush.bf16.msrb.mxu0 %v6138_v23  ;;  %v5378_v5 = vor.u32 %v6375_v12, %v5375_v61  ;;  %v6367_v10 = vld [vmem:[%s10128_s11 + $0x2a4] sm:$0xf] }
 0x3f3   :  { %3871 = vmatpush.bf16.msra.mxu3 %v5678_v32  ;;  %3895 = vmatpush.bf16.msra.mxu2 %v5966_v56  ;;  %v5183_v32 = vld [vmem:[%s10128_s11 + $0x170] sm:$0xf0]  ;;  %v5934_v8 = vor.u32 %v6517_v57, %v5933_v43  ;;  %v6513_v20 = vld [vmem:[%s10128_s11 + $0x72c] sm:$0xf0]  ;;  %v6399_v37 = vld [vmem:[%s10128_s11 + $0x3a4] sm:$0xf] }
 0x3f4   :  { %v8687_v40 = vpack.c.bf16 %v2159_v55, %v2159_v55  ;;  %v5186_v36 = vor.u32 %v6327_v59, %v5183_v32  ;;  %v5042_v55 = vor.u32 %v6291_v22, %v5039_v2  ;;  %v6371_v2 = vld [vmem:[%s10128_s11 + $0x2c4] sm:$0xf] }
 0x3f5   :  { %v6359_v23 = vld [vmem:[%s10128_s11 + $0x264] sm:$0xf] }
 0x3f6   :  { %3848 = vmatmul.bf16.vlgmr.msrb.gmra.mxu1 %v8687_v40  ;;  %v6423_v12 = vld [vmem:[%s10128_s11 + $0x464] sm:$0xf] }
 0x3f7   :  { %v8708_v41 = vpop.f32.mrf.mxu3  ;;  %3872 = vmatpush.bf16.msra.mxu3 %v5662_v28  ;;  %3918 = vmatpush.bf16.msrb.mxu1 %v5250_v51  ;;  %v5917_v28 = vld [vmem:[%s10128_s11 + $0x720] sm:$0xf] }
 0x3f8   :  { %3896 = vmatpush.bf16.msra.mxu2 %v5950_v1  ;;  %v5918_v49 = vor.u32 %v6513_v20, %v5917_v28  ;;  %v5631_v1 = vld [vmem:[%s10128_s11 + $0x4f0] sm:$0xf0]  ;;  %v5362_v20 = vor.u32 %v6371_v2, %v5359_v44  ;;  %v6415_v2 = vld [vmem:[%s10128_s11 + $0x424] sm:$0xf] }
 0x3f9   :  { %v5615_v28 = vld [vmem:[%s10128_s11 + $0x4d0] sm:$0xf0] }
 0x3fa   :  { %v5535_v44 = vld [vmem:[%s10128_s11 + $0x430] sm:$0xf0] }
 0x3fb   :  { %3873 = vmatpush.bf16.msra.mxu3 %v5646_v25  ;;  %3919 = vmatpush.bf16.msrb.mxu1 %v5234_v7  ;;  %v6283_v25 = vld [vmem:[%s10128_s11 + $0x4] sm:$0xf]  ;;  %v5007_v7 = vld [vmem:[%s10128_s11 + $0x10] sm:$0xf0] }
 0x3fc   :  { %3897 = vmatpush.bf16.msra.mxu2 %v5934_v8 }
 0x3ff   :  { %3905 = vmatpush.bf16.msrb.mxu3 %v5122_v29  ;;  %v2480_v39 = vpop.f32.mrf.mxu3  ;;  %3920 = vmatpush.bf16.msrb.mxu1 %v5218_v34  ;;  %v5902_v29 = vor.u32 %v6509_v14, %v5901_v3  ;;  %v5346_v3 = vor.u32 %v6367_v10, %v5343_v16  ;;  %v6363_v14 = vld [vmem:[%s10128_s11 + $0x284] sm:$0xf]  ;;  %v5519_v16 = vld [vmem:[%s10128_s11 + $0x410] sm:$0xf0] }
 0x400   :  { %3898 = vmatpush.bf16.msra.mxu2 %v5918_v49  ;;  %v5138_v39 = vor.u32 %v6315_v31, %v5135_v60  ;;  %v6395_v31 = vld [vmem:[%s10128_s11 + $0x384] sm:$0xf]  ;;  %v5455_v60 = vld [vmem:[%s10128_s11 + $0x390] sm:$0xf0] }
 0x401   :  { %v6411_v10 = vld [vmem:[%s10128_s11 + $0x404] sm:$0xf] }
 0x403   :  { %3906 = vmatpush.bf16.msrb.mxu3 %v5106_v4  ;;  %3921 = vmatpush.bf16.msrb.mxu1 %v5202_v47  ;;  %v5010_v4 = vor.u32 %v6283_v25, %v5007_v7  ;;  %v5327_v7 = vld [vmem:[%s10128_s11 + $0x290] sm:$0xf0] }
 0x404   :  { %3899 = vmatpush.bf16.msra.mxu2 %v5902_v29  ;;  %v5330_v13 = vor.u32 %v6363_v14, %v5327_v7  ;;  %v6535_v14 = vld [vmem:[%s10128_s11 + $0x7e4] sm:$0xf]  ;;  %v5522_v7 = vor.u32 %v6411_v10, %v5519_v16 }
 0x405   :  { %v6451_v16 = vld [vmem:[%s10128_s11 + $0x544] sm:$0xf] }
 0x407   :  { %v8716_v9 = vpop.f32.mrf.mxu3  ;;  %3907 = vmatpush.bf16.msrb.mxu3 %v5090_v33  ;;  %3922 = vmatpush.bf16.msrb.mxu1 %v5186_v36 }
 0x40b   :  { %3908 = vmatpush.bf16.msrb.mxu3 %v5074_v38  ;;  %3923 = vmatpush.bf16.msrb.mxu1 %v5170_v50  ;;  %v6439_v38 = vld [vmem:[%s10128_s11 + $0x4e4] sm:$0xf] }
 0x40c   :  { %v5634_v8 = vor.u32 %v6439_v38, %v5631_v1  ;;  %v6435_v50 = vld [vmem:[%s10128_s11 + $0x4c4] sm:$0xf]  ;;  %v5295_v38 = vld [vmem:[%s10128_s11 + $0x250] sm:$0xf0] }
 0x40d   :  { %v5618_v49 = vor.u32 %v6435_v50, %v5615_v28  ;;  %v5538_v28 = vor.u32 %v6415_v2, %v5535_v44 }
 0x40f   :  { %v2493_v21 = vpop.f32.mrf.mxu3  ;;  %3909 = vmatpush.bf16.msrb.mxu3 %v5058_v52  ;;  %3924 = vmatpush.bf16.msrb.mxu1 %v5154_v17  ;;  %v5599_v17 = vld [vmem:[%s10128_s11 + $0x4b0] sm:$0xf0] }
 0x410   :  { %v5503_v21 = vld [vmem:[%s10128_s11 + $0x3f0] sm:$0xf0] }
 0x413   :  { %3910 = vmatpush.bf16.msrb.mxu3 %v5042_v55  ;;  %3925 = vmatpush.bf16.msrb.mxu1 %v5138_v39  ;;  %v5487_v55 = vld [vmem:[%s10128_s11 + $0x3d0] sm:$0xf0] }
 0x414   :  { %v5490_v24 = vor.u32 %v6403_v46, %v5487_v55  ;;  %v5583_v39 = vld [vmem:[%s10128_s11 + $0x490] sm:$0xf0]  ;;  %v6347_v55 = vld [vmem:[%s10128_s11 + $0x204] sm:$0xf] }
 0x417   :  { %v8790_v18 = vpop.f32.mrf.mxu3  ;;  %3911 = vmatpush.bf16.msrb.mxu3 %v5026_v19  ;;  %v6431_v19 = vld [vmem:[%s10128_s11 + $0x4a4] sm:$0xf] }
 0x418   :  { %v5602_v29 = vor.u32 %v6431_v19, %v5599_v17  ;;  %v6503_v19 = vld [vmem:[%s10128_s11 + $0x6e4] sm:$0xf]  ;;  %v5887_v17 = vld [vmem:[%s10128_s11 + $0x6f0] sm:$0xf0] }
 0x41b   :  { %3912 = vmatpush.bf16.msrb.mxu3 %v5010_v4  ;;  %v6427_v4 = vld [vmem:[%s10128_s11 + $0x484] sm:$0xf] }
 0x41c   :  { %v5586_v35 = vor.u32 %v6427_v4, %v5583_v39  ;;  %v6467_v4 = vld [vmem:[%s10128_s11 + $0x5c4] sm:$0xf] }
 0x41f   :  { %v2506_v51 = vpop.f32.mrf.mxu3 }
 0x420   :  { %v5471_v51 = vld [vmem:[%s10128_s11 + $0x3b0] sm:$0xf0] }
 0x421   :  { %v5474_v25 = vor.u32 %v6399_v37, %v5471_v51  ;;  %v6471_v37 = vld [vmem:[%s10128_s11 + $0x5e4] sm:$0xf]  ;;  %v5759_v51 = vld [vmem:[%s10128_s11 + $0x5f0] sm:$0xf0] }
 0x427   :  { %v8828_v11 = vpop.f32.mrf.mxu3 }
 0x42c   :  { %v1934_v42 = vpop.permute.xlu1 %1933 }
 0x42d   :  { %v1988_v33 = vsel %vm1180_vm5, %v8381_v45, %v1934_v42  ;;  %v6407_v45 = vld [vmem:[%s10128_s11 + $0x3e4] sm:$0xf] }
 0x42e   :  { %v5506_v36 = vor.u32 %v6407_v45, %v5503_v21  ;;  %v6355_v21 = vld [vmem:[%s10128_s11 + $0x244] sm:$0xf] }
 0x42f   :  { %v2519_v27 = vpop.f32.mrf.mxu3  ;;  %v5298_v1 = vor.u32 %v6355_v21, %v5295_v38 }
 0x434   :  { %v1960_v26 = vpop.permute.xlu1 %1959 }
 0x435   :  { %v1989_v34 = vsel %vm1213_vm7, %v1988_v33, %v1960_v26  ;;  %v5458_v26 = vor.u32 %v6395_v31, %v5455_v60  ;;  %v5311_v33 = vld [vmem:[%s10128_s11 + $0x270] sm:$0xf0]  ;;  %v5762_v31 = vor.u32 %v6471_v37, %v5759_v51  ;;  %v5890_v60 = vor.u32 %v6503_v19, %v5887_v17  ;;  %v6483_v19 = vld [vmem:[%s10128_s11 + $0x644] sm:$0xf] }
 0x436   :  { %v5314_v61 = vor.u32 %v6359_v23, %v5311_v33  ;;  %v5679_v37 = vld [vmem:[%s10128_s11 + $0x550] sm:$0xf0] }
 0x437   :  { %v5807_v17 = vld [vmem:[%s10128_s11 + $0x650] sm:$0xf0] }
 0x43c   :  { %v1986_v62 = vpop.permute.xlu1 %1985 }
 0x43d   :  { %v8834_v58 = vsel %vm1247_vm9, %v1989_v34, %v1986_v62  ;;  %v6391_v34 = vld [vmem:[%s10128_s11 + $0x364] sm:$0xf] }
 0x43e   :  { %v8840_v56 = vrot.slane %v8834_v58, 4  ;;  %v1993_v54 = vperm.slane %v8834_v58, 0  ;;  %v1997_v53 = vperm.slane %v8834_v58, 1  ;;  %v2001_v47 = vperm.slane %v8834_v58, 2 }
 0x43f   :  { %v2005_v27 = vperm.slane %v8834_v58, 3  ;;  %v5439_v58 = vld [vmem:[%s10128_s11 + $0x370] sm:$0xf0] }
 0x440   :  { %v1994_v6 = vperm.slane %v8840_v56, 0  ;;  %v1998_v0 = vperm.slane %v8840_v56, 1  ;;  %v2002_v48 = vperm.slane %v8840_v56, 2  ;;  %v2006_v42 = vperm.slane %v8840_v56, 3  ;;  %v5567_v56 = vld [vmem:[%s10128_s11 + $0x470] sm:$0xf0] }
 0x442   :  { %v1995_v59 = vsel %vm1895_vm11, %v1994_v6, %v1993_v54  ;;  %v1999_v32 = vsel %vm1895_vm11, %v1998_v0, %v1997_v53  ;;  %v2003_v52 = vsel %vm1895_vm11, %v2002_v48, %v2001_v47  ;;  %v2007_v62 = vsel %vm1895_vm11, %v2006_v42, %v2005_v27  ;;  %v6387_v47 = vld [vmem:[%s10128_s11 + $0x344] sm:$0xf]  ;;  %v5423_v6 = vld [vmem:[%s10128_s11 + $0x350] sm:$0xf0] }
 0x443   :  { %v8866_v43 = vpack.c.bf16 %v1995_v59, %v1995_v59  ;;  %v8868_v57 = vpack.c.bf16 %v1999_v32, %v1999_v32  ;;  %v8870_v22 = vpack.c.bf16 %v2003_v52, %v2003_v52  ;;  %v8950_v45 = vpack.c.bf16 %v2007_v62, %v2007_v62  ;;  %v6419_v0 = vld [vmem:[%s10128_s11 + $0x444] sm:$0xf]  ;;  %v5551_v48 = vld [vmem:[%s10128_s11 + $0x450] sm:$0xf0] }
 0x444   :  { %v5442_v54 = vor.u32 %v6391_v34, %v5439_v58  ;;  %v5570_v53 = vor.u32 %v6423_v12, %v5567_v56  ;;  %v5554_v59 = vor.u32 %v6419_v0, %v5551_v48  ;;  %v6351_v32 = vld [vmem:[%s10128_s11 + $0x224] sm:$0xf]  ;;  %v5279_v52 = vld [vmem:[%s10128_s11 + $0x230] sm:$0xf0] }
 0x445   :  { %3861 = vmatmul.bf16.vlgmr.msrb.gmra.mxu2 %v8866_v43  ;;  %3874 = vmatmul.bf16.vlgmr.msra.gmra.mxu3 %v8868_v57  ;;  %v5282_v46 = vor.u32 %v6351_v32, %v5279_v52  ;;  %v5743_v42 = vld [vmem:[%s10128_s11 + $0x5d0] sm:$0xf0]  ;;  %v6499_v27 = vld [vmem:[%s10128_s11 + $0x6c4] sm:$0xf] }
 0x446   :  { %3887 = vmatmul.bf16.vlgmr.msra.gmra.mxu1 %v8870_v22  ;;  %3931 = vmatpush.bf16.msrb.mxu2 %v5378_v5  ;;  %v5426_v5 = vor.u32 %v6387_v47, %v5423_v6  ;;  %v5746_v33 = vor.u32 %v6467_v4, %v5743_v42  ;;  %v6463_v62 = vld [vmem:[%s10128_s11 + $0x5a4] sm:$0xf]  ;;  %v5727_v12 = vld [vmem:[%s10128_s11 + $0x5b0] sm:$0xf0] }
 0x447   :  { %3944 = vmatpush.bf16.msra.mxu3 %v5506_v36  ;;  %3957 = vmatpush.bf16.msra.mxu1 %v5634_v8  ;;  %v6383_v36 = vld [vmem:[%s10128_s11 + $0x324] sm:$0xf]  ;;  %v5407_v8 = vld [vmem:[%s10128_s11 + $0x330] sm:$0xf0]  ;;  %v5730_v21 = vor.u32 %v6463_v62, %v5727_v12 }
 0x448   :  { %v5410_v50 = vor.u32 %v6383_v36, %v5407_v8  ;;  %v6495_v56 = vld [vmem:[%s10128_s11 + $0x6a4] sm:$0xf]  ;;  %v5711_v0 = vld [vmem:[%s10128_s11 + $0x590] sm:$0xf0] }
 0x449   :  { %v6459_v47 = vld [vmem:[%s10128_s11 + $0x584] sm:$0xf]  ;;  %v5967_v32 = vld [vmem:[%s10128_s11 + $0x790] sm:$0xf0] }
 0x44a   :  { %3932 = vmatpush.bf16.msrb.mxu2 %v5362_v20  ;;  %v5263_v20 = vld [vmem:[%s10128_s11 + $0x210] sm:$0xf0]  ;;  %v6491_v48 = vld [vmem:[%s10128_s11 + $0x684] sm:$0xf]  ;;  %v5714_v2 = vor.u32 %v6459_v47, %v5711_v0  ;;  %v6314_v0 = vld [vmem:[%s10128_s11 + $0xf4] sm:$0xf0] }
 0x44b   :  { %3945 = vmatpush.bf16.msra.mxu3 %v5490_v24  ;;  %3958 = vmatpush.bf16.msra.mxu1 %v5618_v49  ;;  %v6379_v24 = vld [vmem:[%s10128_s11 + $0x304] sm:$0xf]  ;;  %v5391_v49 = vld [vmem:[%s10128_s11 + $0x310] sm:$0xf0] }
 0x44c   :  { %v6447_v42 = vld [vmem:[%s10128_s11 + $0x524] sm:$0xf]  ;;  %v5919_v62 = vld [vmem:[%s10128_s11 + $0x730] sm:$0xf0] }
 0x44d   :  { %v5903_v47 = vld [vmem:[%s10128_s11 + $0x710] sm:$0xf0] }
 0x44e   :  { %3933 = vmatpush.bf16.msrb.mxu2 %v5346_v3  ;;  %v5266_v3 = vor.u32 %v6347_v55, %v5263_v20  ;;  %v5695_v55 = vld [vmem:[%s10128_s11 + $0x570] sm:$0xf0]  ;;  %v6519_v20 = vld [vmem:[%s10128_s11 + $0x764] sm:$0xf] }
 0x44f   :  { %3946 = vmatpush.bf16.msra.mxu3 %v5474_v25  ;;  %3959 = vmatpush.bf16.msra.mxu1 %v5602_v29  ;;  %v6015_v25 = vld [vmem:[%s10128_s11 + $0x7f0] sm:$0xf0]  ;;  %v5394_v29 = vor.u32 %v6379_v24, %v5391_v49 }
 0x450   :  { %v6018_v39 = vor.u32 %v6535_v14, %v6015_v25  ;;  %v5951_v24 = vld [vmem:[%s10128_s11 + $0x770] sm:$0xf0]  ;;  %v6567_v25 = vld [vmem:[#allocation2 + $0xc4] sm:$0xf] }
 0x451   :  { %v5954_v51 = vor.u32 %v6519_v20, %v5951_v24  ;;  %v5935_v14 = vld [vmem:[%s10128_s11 + $0x750] sm:$0xf0]  ;;  %v6342_v20 = vld [vmem:[%s10128_s11 + $0x1d4] sm:$0xf0]  ;;  %v5365_v24 = vld [vmem:[%s10128_s11 + $0x2c8] sm:$0xf] }
 0x452   :  { %3934 = vmatpush.bf16.msrb.mxu2 %v5330_v13  ;;  %v5871_v13 = vld [vmem:[%s10128_s11 + $0x6d0] sm:$0xf0] }
 0x453   :  { %3947 = vmatpush.bf16.msra.mxu3 %v5458_v26  ;;  %3960 = vmatpush.bf16.msra.mxu1 %v5586_v35  ;;  %v6531_v26 = vld [vmem:[%s10128_s11 + $0x7c4] sm:$0xf]  ;;  %v5999_v35 = vld [vmem:[%s10128_s11 + $0x7d0] sm:$0xf0]  ;;  %v5874_v34 = vor.u32 %v6499_v27, %v5871_v13 }
 0x454   :  { %v6002_v58 = vor.u32 %v6531_v26, %v5999_v35  ;;  %v5663_v35 = vld [vmem:[%s10128_s11 + $0x530] sm:$0xf0] }
 0x455   :  { %3900 = vmatmul.bf16.vlgmr.msra.gmra.mxu2 %v8950_v45  ;;  %3913 = vmatmul.bf16.vlgmr.msrb.gmra.mxu3 %v8565_v63 }
 0x456   :  { %3926 = vmatmul.bf16.vlgmr.msrb.gmra.mxu1 %v8601_v30  ;;  %3935 = vmatpush.bf16.msrb.mxu2 %v5314_v61  ;;  %v5855_v61 = vld [vmem:[%s10128_s11 + $0x6b0] sm:$0xf0] }
 0x457   :  { %3948 = vmatpush.bf16.msra.mxu3 %v5442_v54  ;;  %3961 = vmatpush.bf16.msra.mxu1 %v5570_v53  ;;  %v6527_v54 = vld [vmem:[%s10128_s11 + $0x7a4] sm:$0xf]  ;;  %v5983_v53 = vld [vmem:[%s10128_s11 + $0x7b0] sm:$0xf0]  ;;  %v5858_v38 = vor.u32 %v6495_v56, %v5855_v61 }
 0x458   :  { %v5986_v6 = vor.u32 %v6527_v54, %v5983_v53  ;;  %v6443_v56 = vld [vmem:[%s10128_s11 + $0x504] sm:$0xf]  ;;  %v5647_v61 = vld [vmem:[%s10128_s11 + $0x510] sm:$0xf0] }
 0x459   :  { %v6475_v54 = vld [vmem:[%s10128_s11 + $0x604] sm:$0xf] }
 0x45a   :  { %3936 = vmatpush.bf16.msrb.mxu2 %v5298_v1  ;;  %v5839_v1 = vld [vmem:[%s10128_s11 + $0x690] sm:$0xf0] }
 0x45b   :  { %3949 = vmatpush.bf16.msra.mxu3 %v5426_v5  ;;  %3962 = vmatpush.bf16.msra.mxu1 %v5554_v59  ;;  %v6523_v59 = vld [vmem:[%s10128_s11 + $0x784] sm:$0xf]  ;;  %v5842_v44 = vor.u32 %v6491_v48, %v5839_v1  ;;  %v5253_v48 = vld [vmem:[%s10128_s11 + $0x1e8] sm:$0xf]  ;;  %v6346_v1 = vld [vmem:[%s10128_s11 + $0x1f4] sm:$0xf0] }
 0x45e   :  { %3937 = vmatpush.bf16.msrb.mxu2 %v5282_v46  ;;  %v6455_v46 = vld [vmem:[%s10128_s11 + $0x564] sm:$0xf] }
 0x45f   :  { %3950 = vmatpush.bf16.msra.mxu3 %v5410_v50  ;;  %3963 = vmatpush.bf16.msra.mxu1 %v5538_v28  ;;  %v6487_v50 = vld [vmem:[%s10128_s11 + $0x664] sm:$0xf]  ;;  %v5823_v28 = vld [vmem:[%s10128_s11 + $0x670] sm:$0xf0]  ;;  %v5698_v49 = vor.u32 %v6455_v46, %v5695_v55  ;;  %v5254_v46 = vor.u32 %v6346_v1, %v5253_v48  ;;  %v5109_v55 = vld [vmem:[%s10128_s11 + $0xc8] sm:$0xf] }
 0x460   :  { %v5826_v10 = vor.u32 %v6487_v50, %v5823_v28  ;;  %v6310_v50 = vld [vmem:[%s10128_s11 + $0xd4] sm:$0xf0]  ;;  %v5237_v28 = vld [vmem:[%s10128_s11 + $0x1c8] sm:$0xf] }
 0x461   :  { %v3810_v23 = vpop.f32.mrf.mxu3  ;;  %v6326_v48 = vld [vmem:[%s10128_s11 + $0x154] sm:$0xf0]  ;;  %v5301_v1 = vld [vmem:[%s10128_s11 + $0x248] sm:$0xf] }
 0x462   :  { %3938 = vmatpush.bf16.msrb.mxu2 %v5266_v3  ;;  %v3811_v5 = vadd.f32 %v3810_v23, %v8708_v41  ;;  %v5970_v41 = vor.u32 %v6523_v59, %v5967_v32  ;;  %v6515_v3 = vld [vmem:[%s10128_s11 + $0x744] sm:$0xf]  ;;  %v6378_v59 = vld [vmem:[%s10128_s11 + $0x2f4] sm:$0xf0] }
 0x463   :  { %3951 = vmatpush.bf16.msra.mxu3 %v5394_v29  ;;  %3964 = vmatpush.bf16.msra.mxu1 %v5522_v7  ;;  %v5682_v7 = vor.u32 %v6451_v16, %v5679_v37  ;;  %v5938_v26 = vor.u32 %v6515_v3, %v5935_v14  ;;  %v6479_v23 = vld [vmem:[%s10128_s11 + $0x624] sm:$0xf]  ;;  %v5238_v16 = vor.u32 %v6342_v20, %v5237_v28  ;;  %v6338_v3 = vld [vmem:[%s10128_s11 + $0x1b4] sm:$0xf0]  ;;  %v5349_v14 = vld [vmem:[%s10128_s11 + $0x2a8] sm:$0xf] }
 0x465   :  { %3939 = vmatmul.bf16.vlgmr.msrb.gmra.mxu2 %v8641_v15 }
 0x466   :  { %3970 = vmatpush.bf16.msra.mxu2 %v5762_v31  ;;  %3952 = vmatmul.bf16.vlgmr.msra.gmra.mxu3 %v8687_v40  ;;  %v6127_v31 = vld [vmem:[#allocation2 + $0xc8] sm:$0xf0] }
 0x467   :  { %3983 = vmatpush.bf16.msrb.mxu3 %v5890_v60  ;;  %3996 = vmatpush.bf16.msrb.mxu1 %v6018_v39  ;;  %v5810_v39 = vor.u32 %v6483_v19, %v5807_v17  ;;  %v6130_v27 = vor.u32 %v6567_v25, %v6127_v31  ;;  %v6306_v19 = vld [vmem:[%s10128_s11 + $0xb4] sm:$0xf0]  ;;  %v5221_v17 = vld [vmem:[%s10128_s11 + $0x1a8] sm:$0xf] }
 0x468   :  { %3965 = vmatmul.bf16.vlgmr.msra.gmra.mxu1 %v8866_v43  ;;  %v6370_v25 = vld [vmem:[%s10128_s11 + $0x2b4] sm:$0xf0] }
 0x469   :  { %v3812_v52 = vpop.f32.mrf.mxu3  ;;  %v3823_v36 = vpop.f32.mrf.mxu2  ;;  %4697 = vmatpush.bf16.msrb.mxu0 %v6130_v27  ;;  %v5350_v31 = vor.u32 %v6370_v25, %v5349_v14  ;;  %v6334_v27 = vld [vmem:[%s10128_s11 + $0x194] sm:$0xf0]  ;;  %v5765_v25 = vld [vmem:[%s10128_s11 + $0x5e8] sm:$0xf] }
 0x46a   :  { %3971 = vmatpush.bf16.msra.mxu2 %v5746_v33  ;;  %v3824_v8 = vadd.f32 %v3823_v36, %v3811_v5  ;;  %v5791_v33 = vld [vmem:[%s10128_s11 + $0x630] sm:$0xf0]  ;;  %v5381_v5 = vld [vmem:[%s10128_s11 + $0x2e8] sm:$0xf]  ;;  %v5650_v52 = vor.u32 %v6443_v56, %v5647_v61  ;;  %v6330_v56 = vld [vmem:[%s10128_s11 + $0x174] sm:$0xf0] }
 0x46b   :  { %3984 = vmatpush.bf16.msrb.mxu3 %v5874_v34  ;;  %3997 = vmatpush.bf16.msrb.mxu1 %v6002_v58  ;;  %v6511_v34 = vld [vmem:[%s10128_s11 + $0x724] sm:$0xf]  ;;  %v5666_v58 = vor.u32 %v6447_v42, %v5663_v35  ;;  %v5794_v12 = vor.u32 %v6479_v23, %v5791_v33  ;;  %v5205_v42 = vld [vmem:[%s10128_s11 + $0x188] sm:$0xf]  ;;  %v6366_v35 = vld [vmem:[%s10128_s11 + $0x294] sm:$0xf0] }
 0x46c   :  { %v5922_v53 = vor.u32 %v6511_v34, %v5919_v62  ;;  %v5206_v33 = vor.u32 %v6334_v27, %v5205_v42  ;;  %v5061_v62 = vld [vmem:[%s10128_s11 + $0x68] sm:$0xf] }
 0x46d   :  { %v5317_v61 = vld [vmem:[%s10128_s11 + $0x268] sm:$0xf] }
 0x46e   :  { %3972 = vmatpush.bf16.msra.mxu2 %v5730_v21  ;;  %v5775_v21 = vld [vmem:[%s10128_s11 + $0x610] sm:$0xf0]  ;;  %v5493_v42 = vld [vmem:[%s10128_s11 + $0x3c8] sm:$0xf] }
 0x46f   :  { %3985 = vmatpush.bf16.msrb.mxu3 %v5858_v38  ;;  %3998 = vmatpush.bf16.msrb.mxu1 %v5986_v6  ;;  %v6507_v38 = vld [vmem:[%s10128_s11 + $0x704] sm:$0xf]  ;;  %v5125_v6 = vld [vmem:[%s10128_s11 + $0xe8] sm:$0xf]  ;;  %v5778_v36 = vor.u32 %v6475_v54, %v5775_v21  ;;  %v6362_v54 = vld [vmem:[%s10128_s11 + $0x274] sm:$0xf0] }
 0x471   :  { %v3836_v29 = vpop.f32.mrf.mxu3  ;;  %v3825_v60 = vpop.f32.mrf.mxu2 }
 0x472   :  { %3973 = vmatpush.bf16.msra.mxu2 %v5714_v2  ;;  %v9121_v4 = vadd.f32 %v3836_v29, %v3824_v8  ;;  %v5906_v8 = vor.u32 %v6507_v38, %v5903_v47  ;;  %v5126_v2 = vor.u32 %v6314_v0, %v5125_v6  ;;  %v5077_v60 = vld [vmem:[%s10128_s11 + $0x88] sm:$0xf]  ;;  %v5318_v38 = vor.u32 %v6362_v54, %v5317_v61  ;;  %v6294_v6 = vld [vmem:[%s10128_s11 + $0x54] sm:$0xf0] }
 0x473   :  { %3986 = vmatpush.bf16.msrb.mxu3 %v5842_v44  ;;  %3999 = vmatpush.bf16.msrb.mxu1 %v5970_v41  ;;  %v9126_v13 = vpop.f32.mrf.mxu1  ;;  %v5382_v41 = vor.u32 %v6378_v59, %v5381_v5  ;;  %v5045_v47 = vld [vmem:[%s10128_s11 + $0x48] sm:$0xf]  ;;  %v6358_v5 = vld [vmem:[%s10128_s11 + $0x254] sm:$0xf0] }
 0x474   :  { %v5173_v0 = vld [vmem:[%s10128_s11 + $0x148] sm:$0xf]  ;;  %v5046_v59 = vor.u32 %v6294_v6, %v5045_v47  ;;  %v6402_v61 = vld [vmem:[%s10128_s11 + $0x3b4] sm:$0xf0] }
 0x475   :  { %v5605_v54 = vld [vmem:[%s10128_s11 + $0x4a8] sm:$0xf] }
 0x476   :  { %3974 = vmatpush.bf16.msra.mxu2 %v5698_v49  ;;  %v6374_v49 = vld [vmem:[%s10128_s11 + $0x2d4] sm:$0xf0] }
 0x477   :  { %3987 = vmatpush.bf16.msrb.mxu3 %v5826_v10  ;;  %4000 = vmatpush.bf16.msrb.mxu1 %v5954_v51  ;;  %v5110_v10 = vor.u32 %v6310_v50, %v5109_v55  ;;  %v5366_v37 = vor.u32 %v6374_v49, %v5365_v24  ;;  %v5093_v51 = vld [vmem:[%s10128_s11 + $0xa8] sm:$0xf]  ;;  %v6286_v24 = vld [vmem:[%s10128_s11 + $0x14] sm:$0xf0] }
 0x478   :  { %v5094_v29 = vor.u32 %v6306_v19, %v5093_v51  ;;  %v5013_v50 = vld [vmem:[%s10128_s11 + $0x8] sm:$0xf]  ;;  %v6410_v19 = vld [vmem:[%s10128_s11 + $0x3f4] sm:$0xf0] }
 0x479   :  { %v3838_v32 = vpop.f32.mrf.mxu3  ;;  %v5141_v49 = vld [vmem:[%s10128_s11 + $0x108] sm:$0xf]  ;;  %v5014_v14 = vor.u32 %v6286_v24, %v5013_v50 }
 0x47a   :  { %3975 = vmatpush.bf16.msra.mxu2 %v5682_v7  ;;  %v5222_v7 = vor.u32 %v6338_v3, %v5221_v17  ;;  %v5174_v32 = vor.u32 %v6326_v48, %v5173_v0  ;;  %v5509_v51 = vld [vmem:[%s10128_s11 + $0x3e8] sm:$0xf]  ;;  %v6442_v3 = vld [vmem:[%s10128_s11 + $0x4f4] sm:$0xf0] }
 0x47b   :  { %3988 = vmatpush.bf16.msrb.mxu3 %v5810_v39  ;;  %4001 = vmatpush.bf16.msrb.mxu1 %v5938_v26  ;;  %v3851_v44 = vpop.f32.mrf.mxu1  ;;  %v6302_v39 = vld [vmem:[%s10128_s11 + $0x94] sm:$0xf0]  ;;  %v5333_v26 = vld [vmem:[%s10128_s11 + $0x288] sm:$0xf] }
 0x47c   :  { %v5078_v23 = vor.u32 %v6302_v39, %v5077_v60  ;;  %v5334_v34 = vor.u32 %v6366_v35, %v5333_v26  ;;  %v6322_v44 = vld [vmem:[%s10128_s11 + $0x134] sm:$0xf0]  ;;  %v5637_v17 = vld [vmem:[%s10128_s11 + $0x4e8] sm:$0xf]  ;;  %v5510_v60 = vor.u32 %v6410_v19, %v5509_v51 }
 0x47d   :  { %v5638_v39 = vor.u32 %v6442_v3, %v5637_v17  ;;  %v6406_v26 = vld [vmem:[%s10128_s11 + $0x3d4] sm:$0xf0]  ;;  %v5621_v35 = vld [vmem:[%s10128_s11 + $0x4c8] sm:$0xf] }
 0x47e   :  { %3976 = vmatpush.bf16.msra.mxu2 %v5666_v58  ;;  %v6298_v58 = vld [vmem:[%s10128_s11 + $0x74] sm:$0xf0]  ;;  %v5461_v0 = vld [vmem:[%s10128_s11 + $0x388] sm:$0xf] }
 0x47f   :  { %3989 = vmatpush.bf16.msrb.mxu3 %v5794_v12  ;;  %4002 = vmatpush.bf16.msrb.mxu1 %v5922_v53  ;;  %v5189_v12 = vld [vmem:[%s10128_s11 + $0x168] sm:$0xf]  ;;  %v5062_v53 = vor.u32 %v6298_v58, %v5061_v62  ;;  %v5494_v62 = vor.u32 %v6406_v26, %v5493_v42  ;;  %v6422_v51 = vld [vmem:[%s10128_s11 + $0x454] sm:$0xf0] }
 0x480   :  { %v5190_v21 = vor.u32 %v6330_v56, %v5189_v12  ;;  %v5477_v12 = vld [vmem:[%s10128_s11 + $0x3a8] sm:$0xf]  ;;  %v6454_v17 = vld [vmem:[%s10128_s11 + $0x554] sm:$0xf0] }
 0x481   :  { %v5478_v47 = vor.u32 %v6402_v61, %v5477_v12  ;;  %v5701_v50 = vld [vmem:[%s10128_s11 + $0x568] sm:$0xf]  ;;  %v6450_v42 = vld [vmem:[%s10128_s11 + $0x534] sm:$0xf0] }
 0x482   :  { %3977 = vmatpush.bf16.msra.mxu2 %v5650_v52  ;;  %v5302_v52 = vor.u32 %v6358_v5, %v5301_v1  ;;  %v6398_v1 = vld [vmem:[%s10128_s11 + $0x394] sm:$0xf0]  ;;  %v5589_v5 = vld [vmem:[%s10128_s11 + $0x488] sm:$0xf] }
 0x483   :  { %3990 = vmatpush.bf16.msrb.mxu3 %v5778_v36  ;;  %4003 = vmatpush.bf16.msrb.mxu1 %v5906_v8  ;;  %v5029_v36 = vld [vmem:[%s10128_s11 + $0x28] sm:$0xf]  ;;  %v6290_v8 = vld [vmem:[%s10128_s11 + $0x34] sm:$0xf0] }
 0x484   :  { %v5030_v55 = vor.u32 %v6290_v8, %v5029_v36  ;;  %v5462_v36 = vor.u32 %v6398_v1, %v5461_v0  ;;  %v5685_v19 = vld [vmem:[%s10128_s11 + $0x548] sm:$0xf]  ;;  %v6382_v26 = vld [vmem:[%s10128_s11 + $0x314] sm:$0xf0] }
 0x485   :  { %3978 = vmatmul.bf16.vlgmr.msra.gmra.mxu2 %v8868_v57  ;;  %v6446_v12 = vld [vmem:[%s10128_s11 + $0x514] sm:$0xf0] }
 0x486   :  { %4009 = vmatpush.bf16.msrb.mxu2 %v5126_v2  ;;  %3991 = vmatmul.bf16.vlgmr.msrb.gmra.mxu3 %v8870_v22  ;;  %v5157_v2 = vld [vmem:[%s10128_s11 + $0x128] sm:$0xf]  ;;  %v6506_v61 = vld [vmem:[%s10128_s11 + $0x6f4] sm:$0xf0] }
 0x487   :  { %4022 = vmatpush.bf16.msra.mxu3 %v5254_v46  ;;  %4035 = vmatpush.bf16.msra.mxu1 %v5382_v41  ;;  %v5285_v46 = vld [vmem:[%s10128_s11 + $0x228] sm:$0xf]  ;;  %v6354_v41 = vld [vmem:[%s10128_s11 + $0x234] sm:$0xf0]  ;;  %v5158_v28 = vor.u32 %v6322_v44, %v5157_v2 }
 0x488   :  { %4004 = vmatmul.bf16.vlgmr.msrb.gmra.mxu1 %v8950_v45  ;;  %v5286_v20 = vor.u32 %v6354_v41, %v5285_v46  ;;  %v5445_v2 = vld [vmem:[%s10128_s11 + $0x368] sm:$0xf]  ;;  %v6394_v46 = vld [vmem:[%s10128_s11 + $0x374] sm:$0xf0] }
 0x489   :  { %v5573_v41 = vld [vmem:[%s10128_s11 + $0x468] sm:$0xf] }
 0x48a   :  { %4010 = vmatpush.bf16.msrb.mxu2 %v5110_v10  ;;  %v6318_v10 = vld [vmem:[%s10128_s11 + $0x114] sm:$0xf0] }
 0x48b   :  { %4023 = vmatpush.bf16.msra.mxu3 %v5238_v16  ;;  %4036 = vmatpush.bf16.msra.mxu1 %v5366_v37  ;;  %v5269_v16 = vld [vmem:[%s10128_s11 + $0x208] sm:$0xf]  ;;  %v6350_v37 = vld [vmem:[%s10128_s11 + $0x214] sm:$0xf0] }
 0x48e   :  { %4011 = vmatpush.bf16.msrb.mxu2 %v5094_v29  ;;  %v6474_v29 = vld [vmem:[%s10128_s11 + $0x5f4] sm:$0xf0] }
 0x48f   :  { %4024 = vmatpush.bf16.msra.mxu3 %v5222_v7  ;;  %4037 = vmatpush.bf16.msra.mxu1 %v5350_v31  ;;  %v5142_v7 = vor.u32 %v6318_v10, %v5141_v49  ;;  %v5270_v31 = vor.u32 %v6350_v37, %v5269_v16  ;;  %v5766_v27 = vor.u32 %v6474_v29, %v5765_v25  ;;  %v5429_v49 = vld [vmem:[%s10128_s11 + $0x348] sm:$0xf]  ;;  %v6390_v16 = vld [vmem:[%s10128_s11 + $0x354] sm:$0xf0] }
 0x490   :  { %v5557_v37 = vld [vmem:[%s10128_s11 + $0x448] sm:$0xf]  ;;  %v5430_v3 = vor.u32 %v6390_v16, %v5429_v49  ;;  %v5686_v29 = vor.u32 %v6454_v17, %v5685_v19  ;;  %v6304_v16 = vld [vmem:[%s10128_s11 + $0xac] sm:$0xf] }
 0x491   :  { %v5413_v25 = vld [vmem:[%s10128_s11 + $0x328] sm:$0xf] }
 0x492   :  { %4012 = vmatpush.bf16.msrb.mxu2 %v5078_v23  ;;  %v6438_v23 = vld [vmem:[%s10128_s11 + $0x4d4] sm:$0xf0]  ;;  %v5989_v49 = vld [vmem:[%s10128_s11 + $0x7a8] sm:$0xf] }
 0x493   :  { %4025 = vmatpush.bf16.msra.mxu3 %v5206_v33  ;;  %4038 = vmatpush.bf16.msra.mxu1 %v5334_v34  ;;  %v5749_v33 = vld [vmem:[%s10128_s11 + $0x5c8] sm:$0xf]  ;;  %v6470_v34 = vld [vmem:[%s10128_s11 + $0x5d4] sm:$0xf0]  ;;  %v5622_v58 = vor.u32 %v6438_v23, %v5621_v35 }
 0x494   :  { %v5750_v56 = vor.u32 %v6470_v34, %v5749_v33  ;;  %v5525_v33 = vld [vmem:[%s10128_s11 + $0x408] sm:$0xf]  ;;  %v6414_v34 = vld [vmem:[%s10128_s11 + $0x414] sm:$0xf0] }
 0x496   :  { %4013 = vmatpush.bf16.msrb.mxu2 %v5062_v53  ;;  %v6434_v53 = vld [vmem:[%s10128_s11 + $0x4b4] sm:$0xf0] }
 0x497   :  { %4026 = vmatpush.bf16.msra.mxu3 %v5190_v21  ;;  %4039 = vmatpush.bf16.msra.mxu1 %v5318_v38  ;;  %v5733_v21 = vld [vmem:[%s10128_s11 + $0x5a8] sm:$0xf]  ;;  %v6466_v38 = vld [vmem:[%s10128_s11 + $0x5b4] sm:$0xf0]  ;;  %v5606_v6 = vor.u32 %v6434_v53, %v5605_v54 }
 0x498   :  { %v5734_v48 = vor.u32 %v6466_v38, %v5733_v21  ;;  %v6021_v54 = vld [vmem:[%s10128_s11 + $0x7e8] sm:$0xf]  ;;  %v6538_v53 = vld [vmem:[%s10128_s11 + $0x7f4] sm:$0xf0]  ;;  %v6565_v21 = vld [vmem:[#allocation2 + $0xb4] sm:$0xf] }
 0x499   :  { %v6312_v38 = vld [vmem:[%s10128_s11 + $0xec] sm:$0xf] }
 0x49a   :  { %4014 = vmatpush.bf16.msrb.mxu2 %v5046_v59  ;;  %v6430_v59 = vld [vmem:[%s10128_s11 + $0x494] sm:$0xf0] }
 0x49b   :  { %4027 = vmatpush.bf16.msra.mxu3 %v5174_v32  ;;  %4040 = vmatpush.bf16.msra.mxu1 %v5302_v52  ;;  %v5717_v32 = vld [vmem:[%s10128_s11 + $0x588] sm:$0xf]  ;;  %v6462_v52 = vld [vmem:[%s10128_s11 + $0x594] sm:$0xf0]  ;;  %v5590_v8 = vor.u32 %v6430_v59, %v5589_v5 }
 0x49c   :  { %v5718_v44 = vor.u32 %v6462_v52, %v5717_v32  ;;  %v6022_v32 = vor.u32 %v6538_v53, %v6021_v54 }
 0x49e   :  { %4015 = vmatpush.bf16.msrb.mxu2 %v5030_v55  ;;  %v6426_v55 = vld [vmem:[%s10128_s11 + $0x474] sm:$0xf0] }
 0x49f   :  { %4028 = vmatpush.bf16.msra.mxu3 %v5158_v28  ;;  %4041 = vmatpush.bf16.msra.mxu1 %v5286_v20  ;;  %v6458_v28 = vld [vmem:[%s10128_s11 + $0x574] sm:$0xf0]  ;;  %v5446_v20 = vor.u32 %v6394_v46, %v5445_v2  ;;  %v5574_v24 = vor.u32 %v6426_v55, %v5573_v41  ;;  %v6005_v2 = vld [vmem:[%s10128_s11 + $0x7c8] sm:$0xf]  ;;  %v6308_v46 = vld [vmem:[%s10128_s11 + $0xcc] sm:$0xf] }
 0x4a0   :  { %v5702_v10 = vor.u32 %v6458_v28, %v5701_v50  ;;  %v5111_v41 = vld [vmem:[%s10128_s11 + $0xd8] sm:$0xf0] }
 0x4a1   :  { %v5114_v28 = vor.u32 %v6308_v46, %v5111_v41  ;;  %v6288_v46 = vld [vmem:[%s10128_s11 + $0x2c] sm:$0xf]  ;;  %v5031_v41 = vld [vmem:[%s10128_s11 + $0x38] sm:$0xf0] }
 0x4a2   :  { %4016 = vmatpush.bf16.msrb.mxu2 %v5014_v14  ;;  %v5558_v14 = vor.u32 %v6422_v51, %v5557_v37  ;;  %v5095_v37 = vld [vmem:[%s10128_s11 + $0xb8] sm:$0xf0] }
 0x4a3   :  { %4029 = vmatpush.bf16.msra.mxu3 %v5142_v7  ;;  %4042 = vmatpush.bf16.msra.mxu1 %v5270_v31  ;;  %v6386_v7 = vld [vmem:[%s10128_s11 + $0x334] sm:$0xf0]  ;;  %v5541_v31 = vld [vmem:[%s10128_s11 + $0x428] sm:$0xf]  ;;  %v5098_v17 = vor.u32 %v6304_v16, %v5095_v37 }
 0x4a4   :  { %v5414_v35 = vor.u32 %v6386_v7, %v5413_v25  ;;  %v5973_v25 = vld [vmem:[%s10128_s11 + $0x788] sm:$0xf]  ;;  %v6300_v7 = vld [vmem:[%s10128_s11 + $0x8c] sm:$0xf]  ;;  %v6510_v37 = vld [vmem:[%s10128_s11 + $0x714] sm:$0xf0] }
 0x4a5   :  { %4017 = vmatmul.bf16.vlgmr.msrb.gmra.mxu2 %v8565_v63  ;;  %v5909_v16 = vld [vmem:[%s10128_s11 + $0x708] sm:$0xf] }
 0x4a6   :  { %4048 = vmatpush.bf16.msra.mxu2 %v5510_v60  ;;  %4030 = vmatmul.bf16.vlgmr.msra.gmra.mxu3 %v8601_v30  ;;  %v6418_v60 = vld [vmem:[%s10128_s11 + $0x434] sm:$0xf0] }
 0x4a7   :  { %4061 = vmatpush.bf16.msrb.mxu3 %v5638_v39  ;;  %4074 = vmatpush.bf16.msrb.mxu1 %v5766_v27  ;;  %v5669_v39 = vld [vmem:[%s10128_s11 + $0x528] sm:$0xf]  ;;  %v5542_v23 = vor.u32 %v6418_v60, %v5541_v31  ;;  %v5079_v31 = vld [vmem:[%s10128_s11 + $0x98] sm:$0xf0] }
 0x4a8   :  { %4043 = vmatmul.bf16.vlgmr.msra.gmra.mxu1 %v8641_v15  ;;  %v5397_v27 = vld [vmem:[%s10128_s11 + $0x308] sm:$0xf] }
 0x4a9   :  { %v5398_v0 = vor.u32 %v6382_v26, %v5397_v27  ;;  %v5082_v27 = vor.u32 %v6300_v7, %v5079_v31  ;;  %v5829_v26 = vld [vmem:[%s10128_s11 + $0x668] sm:$0xf]  ;;  %v6408_v31 = vld [vmem:[%s10128_s11 + $0x3ec] sm:$0xf] }
 0x4aa   :  { %4049 = vmatpush.bf16.msra.mxu2 %v5494_v62  ;;  %v5653_v62 = vld [vmem:[%s10128_s11 + $0x508] sm:$0xf] }
 0x4ab   :  { %4062 = vmatpush.bf16.msrb.mxu3 %v5622_v58  ;;  %4075 = vmatpush.bf16.msrb.mxu1 %v5750_v56  ;;  %v5670_v58 = vor.u32 %v6450_v42, %v5669_v39  ;;  %v5893_v56 = vld [vmem:[%s10128_s11 + $0x6e8] sm:$0xf]  ;;  %v5654_v5 = vor.u32 %v6446_v12, %v5653_v62  ;;  %v5063_v62 = vld [vmem:[%s10128_s11 + $0x78] sm:$0xf0] }
 0x4ac   :  { %v5894_v59 = vor.u32 %v6506_v61, %v5893_v56 }
 0x4ae   :  { %4050 = vmatpush.bf16.msra.mxu2 %v5478_v47  ;;  %v5127_v47 = vld [vmem:[%s10128_s11 + $0xf8] sm:$0xf0] }
 0x4af   :  { %4063 = vmatpush.bf16.msrb.mxu3 %v5606_v6  ;;  %4076 = vmatpush.bf16.msrb.mxu1 %v5734_v48  ;;  %v6119_v6 = vld [vmem:[#allocation2 + $0xb8] sm:$0xf0]  ;;  %v5526_v48 = vor.u32 %v6414_v34, %v5525_v33  ;;  %v5130_v52 = vor.u32 %v6312_v38, %v5127_v47  ;;  %v6522_v33 = vld [vmem:[%s10128_s11 + $0x774] sm:$0xf0]  ;;  %v6296_v34 = vld [vmem:[%s10128_s11 + $0x6c] sm:$0xf] }
 0x4b0   :  { %v6122_v1 = vor.u32 %v6565_v21, %v6119_v6  ;;  %v5066_v21 = vor.u32 %v6296_v34, %v5063_v62  ;;  %v5813_v38 = vld [vmem:[%s10128_s11 + $0x648] sm:$0xf]  ;;  %v6486_v47 = vld [vmem:[%s10128_s11 + $0x654] sm:$0xf0]  ;;  %v6292_v6 = vld [vmem:[%s10128_s11 + $0x4c] sm:$0xf] }
 0x4b1   :  { %v6372_v34 = vld [vmem:[%s10128_s11 + $0x2cc] sm:$0xf]  ;;  %v5367_v62 = vld [vmem:[%s10128_s11 + $0x2d8] sm:$0xf0] }
 0x4b2   :  { %4051 = vmatpush.bf16.msra.mxu2 %v5462_v36  ;;  %v5877_v36 = vld [vmem:[%s10128_s11 + $0x6c8] sm:$0xf]  ;;  %4698 = vmatpush.bf16.msrb.mxu0 %v6122_v1 }
 0x4b3   :  { %4064 = vmatpush.bf16.msrb.mxu3 %v5590_v8  ;;  %4077 = vmatpush.bf16.msrb.mxu1 %v5718_v44  ;;  %v6502_v8 = vld [vmem:[%s10128_s11 + $0x6d4] sm:$0xf0] }
 0x4b4   :  { %v6534_v44 = vld [vmem:[%s10128_s11 + $0x7d4] sm:$0xf0]  ;;  %v5878_v55 = vor.u32 %v6502_v8, %v5877_v36  ;;  %v5925_v8 = vld [vmem:[%s10128_s11 + $0x728] sm:$0xf] }
 0x4b5   :  { %v6006_v50 = vor.u32 %v6534_v44, %v6005_v2  ;;  %v6482_v36 = vld [vmem:[%s10128_s11 + $0x634] sm:$0xf0] }
 0x4b6   :  { %4052 = vmatpush.bf16.msra.mxu2 %v5446_v20  ;;  %v5861_v20 = vld [vmem:[%s10128_s11 + $0x6a8] sm:$0xf]  ;;  %v6514_v44 = vld [vmem:[%s10128_s11 + $0x734] sm:$0xf0] }
 0x4b7   :  { %4065 = vmatpush.bf16.msrb.mxu3 %v5574_v24  ;;  %4078 = vmatpush.bf16.msrb.mxu1 %v5702_v10  ;;  %v6498_v24 = vld [vmem:[%s10128_s11 + $0x6b4] sm:$0xf0] }
 0x4b8   :  { %v6530_v10 = vld [vmem:[%s10128_s11 + $0x7b4] sm:$0xf0]  ;;  %v5862_v51 = vor.u32 %v6498_v24, %v5861_v20  ;;  %v5781_v20 = vld [vmem:[%s10128_s11 + $0x608] sm:$0xf]  ;;  %v5926_v24 = vor.u32 %v6514_v44, %v5925_v8  ;;  %v5335_v8 = vld [vmem:[%s10128_s11 + $0x298] sm:$0xf0] }
 0x4b9   :  { %v5990_v19 = vor.u32 %v6530_v10, %v5989_v49  ;;  %v5034_v49 = vor.u32 %v6288_v46, %v5031_v41  ;;  %v6478_v10 = vld [vmem:[%s10128_s11 + $0x614] sm:$0xf0]  ;;  %v6396_v46 = vld [vmem:[%s10128_s11 + $0x38c] sm:$0xf]  ;;  %v5463_v41 = vld [vmem:[%s10128_s11 + $0x398] sm:$0xf0] }
 0x4ba   :  { %4053 = vmatpush.bf16.msra.mxu2 %v5430_v3  ;;  %v5845_v3 = vld [vmem:[%s10128_s11 + $0x688] sm:$0xf]  ;;  %v5782_v7 = vor.u32 %v6478_v10, %v5781_v20  ;;  %v6360_v10 = vld [vmem:[%s10128_s11 + $0x26c] sm:$0xf] }
 0x4bb   :  { %4066 = vmatpush.bf16.msrb.mxu3 %v5558_v14  ;;  %4079 = vmatpush.bf16.msrb.mxu1 %v5686_v29  ;;  %v6494_v14 = vld [vmem:[%s10128_s11 + $0x694] sm:$0xf0] }
 0x4bc   :  { %v6526_v29 = vld [vmem:[%s10128_s11 + $0x794] sm:$0xf0]  ;;  %v5846_v39 = vor.u32 %v6494_v14, %v5845_v3  ;;  %v5255_v14 = vld [vmem:[%s10128_s11 + $0x1f8] sm:$0xf0] }
 0x4bd   :  { %v5974_v42 = vor.u32 %v6526_v29, %v5973_v25  ;;  %v6376_v25 = vld [vmem:[%s10128_s11 + $0x2ec] sm:$0xf]  ;;  %v5383_v29 = vld [vmem:[%s10128_s11 + $0x2f8] sm:$0xf0] }
 0x4be   :  { %4054 = vmatpush.bf16.msra.mxu2 %v5414_v35  ;;  %v6490_v35 = vld [vmem:[%s10128_s11 + $0x674] sm:$0xf0] }
 0x4bf   :  { %4067 = vmatpush.bf16.msrb.mxu3 %v5542_v23  ;;  %4080 = vmatpush.bf16.msrb.mxu1 %v5670_v58  ;;  %v5957_v23 = vld [vmem:[%s10128_s11 + $0x768] sm:$0xf]  ;;  %v3850_v58 = vadd.f32 %v9126_v13, %v9121_v4  ;;  %v5830_v61 = vor.u32 %v6490_v35, %v5829_v26  ;;  %v6518_v13 = vld [vmem:[%s10128_s11 + $0x754] sm:$0xf0]  ;;  %v5386_v26 = vor.u32 %v6376_v25, %v5383_v29  ;;  %v6340_v35 = vld [vmem:[%s10128_s11 + $0x1cc] sm:$0xf] }
 0x4c0   :  { %v5958_v53 = vor.u32 %v6522_v33, %v5957_v23  ;;  %v5941_v4 = vld [vmem:[%s10128_s11 + $0x748] sm:$0xf]  ;;  %v5239_v33 = vld [vmem:[%s10128_s11 + $0x1d8] sm:$0xf0] }
 0x4c1   :  { %v5175_v29 = vld [vmem:[%s10128_s11 + $0x158] sm:$0xf0] }
 0x4c2   :  { %4055 = vmatpush.bf16.msra.mxu2 %v5398_v0  ;;  %v5047_v0 = vld [vmem:[%s10128_s11 + $0x58] sm:$0xf0] }
 0x4c3   :  { %4068 = vmatpush.bf16.msrb.mxu3 %v5526_v48  ;;  %4081 = vmatpush.bf16.msrb.mxu1 %v5654_v5  ;;  %v3888_v60 = vpop.f32.mrf.mxu1  ;;  %v5814_v5 = vor.u32 %v6486_v47, %v5813_v38  ;;  %v6336_v38 = vld [vmem:[%s10128_s11 + $0x1ac] sm:$0xf] }
 0x4c5   :  { %4056 = vmatmul.bf16.vlgmr.msra.gmra.mxu2 %v8687_v40 }
 0x4c6   :  { %4087 = vmatpush.bf16.msrb.mxu2 %v5894_v59  ;;  %4069 = vmatmul.bf16.vlgmr.msrb.gmra.mxu3 %v8866_v43  ;;  %v5942_v59 = vor.u32 %v6518_v13, %v5941_v4  ;;  %v5223_v13 = vld [vmem:[%s10128_s11 + $0x1b8] sm:$0xf0] }
 0x4c7   :  { %4100 = vmatpush.bf16.msra.mxu3 %v6022_v32  ;;  %4113 = vmatpush.bf16.msra.mxu1 %v5130_v52  ;;  %v5050_v32 = vor.u32 %v6292_v6, %v5047_v0  ;;  %v5797_v52 = vld [vmem:[%s10128_s11 + $0x628] sm:$0xf]  ;;  %v6368_v6 = vld [vmem:[%s10128_s11 + $0x2ac] sm:$0xf]  ;;  %v5351_v0 = vld [vmem:[%s10128_s11 + $0x2b8] sm:$0xf0] }
 0x4c8   :  { %4082 = vmatmul.bf16.vlgmr.msrb.gmra.mxu1 %v8868_v57  ;;  %v3862_v12 = vpop.f32.mrf.mxu2  ;;  %v3875_v56 = vpop.f32.mrf.mxu3 }
 0x4c9   :  { %v3863_v54 = vadd.f32 %v3862_v12, %v3850_v58 }
 0x4ca   :  { %4088 = vmatpush.bf16.msrb.mxu2 %v5878_v55 }
 0x4cb   :  { %4101 = vmatpush.bf16.msra.mxu3 %v6006_v50  ;;  %4114 = vmatpush.bf16.msra.mxu1 %v5114_v28  ;;  %v3876_v48 = vadd.f32 %v3875_v56, %v3863_v54  ;;  %v3890_v1 = vpop.f32.mrf.mxu1  ;;  %v5798_v28 = vor.u32 %v6482_v36, %v5797_v52  ;;  %v6404_v56 = vld [vmem:[%s10128_s11 + $0x3cc] sm:$0xf] }
 0x4cc   :  { %v5479_v1 = vld [vmem:[%s10128_s11 + $0x3b8] sm:$0xf0]  ;;  %v6364_v36 = vld [vmem:[%s10128_s11 + $0x28c] sm:$0xf] }
 0x4cd   :  { %v3889_v2 = vadd.f32 %v3888_v60, %v3876_v48  ;;  %v5511_v60 = vld [vmem:[%s10128_s11 + $0x3f8] sm:$0xf0]  ;;  %v6400_v48 = vld [vmem:[%s10128_s11 + $0x3ac] sm:$0xf] }
 0x4ce   :  { %4089 = vmatpush.bf16.msrb.mxu2 %v5862_v51  ;;  %v6284_v51 = vld [vmem:[%s10128_s11 + $0xc] sm:$0xf]  ;;  %v5514_v23 = vor.u32 %v6408_v31, %v5511_v60  ;;  %v5482_v52 = vor.u32 %v6400_v48, %v5479_v1  ;;  %v5303_v31 = vld [vmem:[%s10128_s11 + $0x258] sm:$0xf0] }
 0x4cf   :  { %4102 = vmatpush.bf16.msra.mxu3 %v5990_v19  ;;  %4115 = vmatpush.bf16.msra.mxu1 %v5098_v17  ;;  %v5015_v19 = vld [vmem:[%s10128_s11 + $0x18] sm:$0xf0]  ;;  %v6344_v17 = vld [vmem:[%s10128_s11 + $0x1ec] sm:$0xf] }
 0x4d0   :  { %v3864_v55 = vpop.f32.mrf.mxu2  ;;  %v3877_v50 = vpop.f32.mrf.mxu3 }
 0x4d1   :  { %v5338_v50 = vor.u32 %v6364_v36, %v5335_v8  ;;  %v6440_v36 = vld [vmem:[%s10128_s11 + $0x4ec] sm:$0xf]  ;;  %v5639_v8 = vld [vmem:[%s10128_s11 + $0x4f8] sm:$0xf0] }
 0x4d2   :  { %4090 = vmatpush.bf16.msrb.mxu2 %v5846_v39  ;;  %v5910_v39 = vor.u32 %v6510_v37, %v5909_v16  ;;  %v5319_v16 = vld [vmem:[%s10128_s11 + $0x278] sm:$0xf0]  ;;  %v6392_v37 = vld [vmem:[%s10128_s11 + $0x36c] sm:$0xf] }
 0x4d3   :  { %4103 = vmatpush.bf16.msra.mxu3 %v5974_v42  ;;  %4116 = vmatpush.bf16.msra.mxu1 %v5082_v27  ;;  %v9607_v3 = vpop.f32.mrf.mxu1  ;;  %v5018_v42 = vor.u32 %v6284_v51, %v5015_v19  ;;  %v5258_v27 = vor.u32 %v6344_v17, %v5255_v14  ;;  %v5447_v51 = vld [vmem:[%s10128_s11 + $0x378] sm:$0xf0]  ;;  %v5322_v17 = vor.u32 %v6360_v10, %v5319_v16  ;;  %v6324_v14 = vld [vmem:[%s10128_s11 + $0x14c] sm:$0xf] }
 0x4d4   :  { %v5450_v25 = vor.u32 %v6392_v37, %v5447_v51 }
 0x4d6   :  { %4091 = vmatpush.bf16.msrb.mxu2 %v5830_v61  ;;  %v5495_v61 = vld [vmem:[%s10128_s11 + $0x3d8] sm:$0xf0] }
 0x4d7   :  { %4104 = vmatpush.bf16.msra.mxu3 %v5958_v53  ;;  %4117 = vmatpush.bf16.msra.mxu1 %v5066_v21  ;;  %v5242_v53 = vor.u32 %v6340_v35, %v5239_v33  ;;  %v5370_v21 = vor.u32 %v6372_v34, %v5367_v62  ;;  %v5498_v4 = vor.u32 %v6404_v56, %v5495_v61  ;;  %v6563_v33 = vld [vmem:[#allocation2 + $0xa4] sm:$0xf]  ;;  %v6111_v34 = vld [vmem:[#allocation2 + $0xa8] sm:$0xf0]  ;;  %v5159_v56 = vld [vmem:[%s10128_s11 + $0x138] sm:$0xf0] }
 0x4d8   :  { %v3901_v58 = vpop.f32.mrf.mxu2  ;;  %v9636_v12 = vpop.f32.mrf.mxu3  ;;  %v6352_v61 = vld [vmem:[%s10128_s11 + $0x22c] sm:$0xf] }
 0x4d9   :  { %v9644_v54 = vadd.f32 %v3901_v58, %v3889_v2 }
 0x4da   :  { %4092 = vmatpush.bf16.msrb.mxu2 %v5814_v5  ;;  %v5226_v5 = vor.u32 %v6336_v38, %v5223_v13  ;;  %v6384_v38 = vld [vmem:[%s10128_s11 + $0x32c] sm:$0xf]  ;;  %v5143_v13 = vld [vmem:[%s10128_s11 + $0x118] sm:$0xf0] }
 0x4db   :  { %4105 = vmatpush.bf16.msra.mxu3 %v5942_v59  ;;  %4118 = vmatpush.bf16.msra.mxu1 %v5050_v32  ;;  %v3929_v47 = vpop.f32.mrf.mxu1  ;;  %v5354_v59 = vor.u32 %v6368_v6, %v5351_v0  ;;  %v6332_v32 = vld [vmem:[%s10128_s11 + $0x18c] sm:$0xf]  ;;  %v5271_v0 = vld [vmem:[%s10128_s11 + $0x218] sm:$0xf0] }
 0x4dc   :  { %v5415_v47 = vld [vmem:[%s10128_s11 + $0x338] sm:$0xf0]  ;;  %v6348_v6 = vld [vmem:[%s10128_s11 + $0x20c] sm:$0xf] }
 0x4dd   :  { %v5274_v16 = vor.u32 %v6348_v6, %v5271_v0 }
 0x4de   :  { %4093 = vmatpush.bf16.msrb.mxu2 %v5798_v28  ;;  %v6328_v28 = vld [vmem:[%s10128_s11 + $0x16c] sm:$0xf] }
 0x4df   :  { %4106 = vmatpush.bf16.msra.mxu3 %v5926_v24  ;;  %4119 = vmatpush.bf16.msra.mxu1 %v5034_v49  ;;  %v5466_v24 = vor.u32 %v6396_v46, %v5463_v41  ;;  %v5191_v49 = vld [vmem:[%s10128_s11 + $0x178] sm:$0xf0]  ;;  %v6472_v46 = vld [vmem:[%s10128_s11 + $0x5ec] sm:$0xf] }
 0x4e0   :  { %v3903_v2 = vpop.f32.mrf.mxu2  ;;  %v3916_v44 = vpop.f32.mrf.mxu3  ;;  %v5194_v19 = vor.u32 %v6328_v28, %v5191_v49  ;;  %v5767_v41 = vld [vmem:[%s10128_s11 + $0x5f8] sm:$0xf0]  ;;  %v6095_v49 = vld [vmem:[#allocation2 + $0x88] sm:$0xf0] }
 0x4e1   :  { %v5895_v28 = vld [vmem:[%s10128_s11 + $0x6f8] sm:$0xf0] }
 0x4e2   :  { %4094 = vmatpush.bf16.msrb.mxu2 %v5782_v7  ;;  %v6356_v7 = vld [vmem:[%s10128_s11 + $0x24c] sm:$0xf] }
 0x4e3   :  { %4107 = vmatpush.bf16.msra.mxu3 %v5910_v39  ;;  %4120 = vmatpush.bf16.msra.mxu1 %v5018_v42  ;;  %v6388_v39 = vld [vmem:[%s10128_s11 + $0x34c] sm:$0xf]  ;;  %v5431_v42 = vld [vmem:[%s10128_s11 + $0x358] sm:$0xf0]  ;;  %v5306_v35 = vor.u32 %v6356_v7, %v5303_v31 }
 0x4e4   :  { %v5434_v58 = vor.u32 %v6388_v39, %v5431_v42  ;;  %v6468_v7 = vld [vmem:[%s10128_s11 + $0x5cc] sm:$0xf]  ;;  %v5751_v31 = vld [vmem:[%s10128_s11 + $0x5d8] sm:$0xf0] }
 0x4e5   :  { %4095 = vmatmul.bf16.vlgmr.msrb.gmra.mxu2 %v8870_v22  ;;  %v9688_v20 = vpop.f32.mrf.mxu1  ;;  %v6500_v39 = vld [vmem:[%s10128_s11 + $0x6cc] sm:$0xf]  ;;  %v5879_v42 = vld [vmem:[%s10128_s11 + $0x6d8] sm:$0xf0] }
 0x4e6   :  { %4126 = vmatpush.bf16.msra.mxu2 %v5258_v27  ;;  %4108 = vmatmul.bf16.vlgmr.msra.gmra.mxu3 %v8950_v45 }
 0x4e7   :  { %4139 = vmatpush.bf16.msrb.mxu3 %v5386_v26  ;;  %4152 = vmatpush.bf16.msrb.mxu1 %v5514_v23  ;;  %v5178_v26 = vor.u32 %v6324_v14, %v5175_v29  ;;  %v6320_v23 = vld [vmem:[%s10128_s11 + $0x12c] sm:$0xf]  ;;  %v5623_v29 = vld [vmem:[%s10128_s11 + $0x4d8] sm:$0xf0] }
 0x4e8   :  { %4121 = vmatmul.bf16.vlgmr.msra.gmra.mxu1 %v8565_v63  ;;  %v5207_v63 = vld [vmem:[%s10128_s11 + $0x198] sm:$0xf0]  ;;  %v9717_v60 = vpop.f32.mrf.mxu2  ;;  %v5162_v48 = vor.u32 %v6320_v23, %v5159_v56  ;;  %v5754_v23 = vor.u32 %v6468_v7, %v5751_v31 }
 0x4e9   :  { %v5210_v55 = vor.u32 %v6332_v32, %v5207_v63  ;;  %v9725_v27 = vpop.f32.mrf.mxu3  ;;  %v6103_v32 = vld [vmem:[#allocation2 + $0x98] sm:$0xf0]  ;;  %v5399_v63 = vld [vmem:[%s10128_s11 + $0x318] sm:$0xf0] }
 0x4ea   :  { %4127 = vmatpush.bf16.msra.mxu2 %v5242_v53  ;;  %v5287_v53 = vld [vmem:[%s10128_s11 + $0x238] sm:$0xf0] }
 0x4eb   :  { %4140 = vmatpush.bf16.msrb.mxu3 %v5370_v21  ;;  %4153 = vmatpush.bf16.msrb.mxu1 %v5498_v4  ;;  %v6114_v21 = vor.u32 %v6563_v33, %v6111_v34  ;;  %v6316_v4 = vld [vmem:[%s10128_s11 + $0x10c] sm:$0xf]  ;;  %v5290_v1 = vor.u32 %v6352_v61, %v5287_v53  ;;  %v5882_v33 = vor.u32 %v6500_v39, %v5879_v42  ;;  %v5863_v56 = vld [vmem:[%s10128_s11 + $0x6b8] sm:$0xf0] }
 0x4ec   :  { %v5146_v10 = vor.u32 %v6316_v4, %v5143_v13  ;;  %v6432_v34 = vld [vmem:[%s10128_s11 + $0x4ac] sm:$0xf]  ;;  %v5847_v13 = vld [vmem:[%s10128_s11 + $0x698] sm:$0xf0] }
 0x4ed   :  { %v3968_v62 = vpop.f32.mrf.mxu1  ;;  %4699 = vmatpush.bf16.msrb.mxu0 %v6114_v21  ;;  %v6428_v21 = vld [vmem:[%s10128_s11 + $0x48c] sm:$0xf]  ;;  %v5671_v39 = vld [vmem:[%s10128_s11 + $0x538] sm:$0xf0] }
 0x4ee   :  { %4128 = vmatpush.bf16.msra.mxu2 %v5226_v5  ;;  %v6380_v5 = vld [vmem:[%s10128_s11 + $0x30c] sm:$0xf]  ;;  %v5607_v62 = vld [vmem:[%s10128_s11 + $0x4b8] sm:$0xf0] }
 0x4ef   :  { %4141 = vmatpush.bf16.msrb.mxu3 %v5354_v59  ;;  %4154 = vmatpush.bf16.msrb.mxu1 %v5482_v52  ;;  %v6561_v59 = vld [vmem:[#allocation2 + $0x94] sm:$0xf]  ;;  %v5418_v52 = vor.u32 %v6384_v38, %v5415_v47  ;;  %v5402_v51 = vor.u32 %v6380_v5, %v5399_v63  ;;  %v6492_v4 = vld [vmem:[%s10128_s11 + $0x68c] sm:$0xf] }
 0x4f0   :  { %v6106_v2 = vor.u32 %v6561_v59, %v6103_v32  ;;  %v3942_v44 = vpop.f32.mrf.mxu2  ;;  %v5591_v38 = vld [vmem:[%s10128_s11 + $0x498] sm:$0xf0]  ;;  %v6456_v5 = vld [vmem:[%s10128_s11 + $0x56c] sm:$0xf] }
 0x4f1   :  { %v5719_v47 = vld [vmem:[%s10128_s11 + $0x598] sm:$0xf0]  ;;  %v5594_v6 = vor.u32 %v6428_v21, %v5591_v38  ;;  %v6488_v63 = vld [vmem:[%s10128_s11 + $0x66c] sm:$0xf] }
 0x4f2   :  { %4129 = vmatpush.bf16.msra.mxu2 %v5210_v55  ;;  %v6504_v55 = vld [vmem:[%s10128_s11 + $0x6ec] sm:$0xf]  ;;  %4700 = vmatpush.bf16.msrb.mxu0 %v6106_v2  ;;  %v6023_v38 = vld [vmem:[%s10128_s11 + $0x7f8] sm:$0xf0] }
 0x4f3   :  { %4142 = vmatpush.bf16.msrb.mxu3 %v5338_v50  ;;  %4155 = vmatpush.bf16.msrb.mxu1 %v5466_v24  ;;  %v3955_v50 = vpop.f32.mrf.mxu3  ;;  %v6559_v24 = vld [vmem:[#allocation2 + $0x84] sm:$0xf]  ;;  %v5898_v14 = vor.u32 %v6504_v55, %v5895_v28 }
 0x4f4   :  { %v6098_v37 = vor.u32 %v6559_v24, %v6095_v49  ;;  %v5687_v50 = vld [vmem:[%s10128_s11 + $0x558] sm:$0xf0]  ;;  %v6484_v28 = vld [vmem:[%s10128_s11 + $0x64c] sm:$0xf]  ;;  %v9883_v49 = vld [vmem:[%s10130_s13] sm:$0xf] }
 0x4f5   :  { %v5815_v24 = vld [vmem:[%s10128_s11 + $0x658] sm:$0xf0]  ;;  %v6480_v42 = vld [vmem:[%s10128_s11 + $0x62c] sm:$0xf] }
 0x4f6   :  { %4130 = vmatpush.bf16.msra.mxu2 %v5194_v19  ;;  %v5642_v19 = vor.u32 %v6440_v36, %v5639_v8  ;;  %4701 = vmatpush.bf16.msrb.mxu0 %v6098_v37  ;;  %v5831_v36 = vld [vmem:[%s10128_s11 + $0x678] sm:$0xf0]  ;;  %v4220_v37 = vperm.slane %v9883_v49, 1 }
 0x4f7   :  { %4143 = vmatpush.bf16.msrb.mxu3 %v5322_v17  ;;  %4156 = vmatpush.bf16.msrb.mxu1 %v5450_v25  ;;  %v5770_v17 = vor.u32 %v6472_v46, %v5767_v41  ;;  %v6436_v25 = vld [vmem:[%s10128_s11 + $0x4cc] sm:$0xf]  ;;  %v5834_v44 = vor.u32 %v6488_v63, %v5831_v36  ;;  %v5559_v46 = vld [vmem:[%s10128_s11 + $0x458] sm:$0xf0]  ;;  %v6077_v63 = vld [vmem:[#allocation2 + $0x60] sm:$0xf] }
 0x4f8   :  { %v6452_v41 = vld [vmem:[%s10128_s11 + $0x54c] sm:$0xf]  ;;  %v6556_v36 = vld [vmem:[#allocation2 + $0x64] sm:$0xf0] }
 0x4fa   :  { %4131 = vmatpush.bf16.msra.mxu2 %v5178_v26  ;;  %v3915_v26 = vadd.f32 %v9636_v12, %v8716_v9  ;;  %v5735_v9 = vld [vmem:[%s10128_s11 + $0x5b8] sm:$0xf0]  ;;  %v6496_v12 = vld [vmem:[%s10128_s11 + $0x6ac] sm:$0xf] }
 0x4fb   :  { %4144 = vmatpush.bf16.msrb.mxu3 %v5306_v35  ;;  %4157 = vmatpush.bf16.msrb.mxu1 %v5434_v58  ;;  %v5626_v35 = vor.u32 %v6436_v25, %v5623_v29  ;;  %v6464_v58 = vld [vmem:[%s10128_s11 + $0x5ac] sm:$0xf]  ;;  %v5866_v53 = vor.u32 %v6496_v12, %v5863_v56  ;;  %v5543_v25 = vld [vmem:[%s10128_s11 + $0x438] sm:$0xf0] }
 0x4fc   :  { %v3928_v61 = vadd.f32 %v9607_v3, %v3915_v26  ;;  %v6448_v29 = vld [vmem:[%s10128_s11 + $0x52c] sm:$0xf]  ;;  %v5799_v26 = vld [vmem:[%s10128_s11 + $0x638] sm:$0xf0] }
 0x4fd   :  { %v5655_v12 = vld [vmem:[%s10128_s11 + $0x518] sm:$0xf0] }
 0x4fe   :  { %4132 = vmatpush.bf16.msra.mxu2 %v5162_v48  ;;  %v3941_v3 = vadd.f32 %v9717_v60, %v3928_v61  ;;  %v5850_v48 = vor.u32 %v6492_v4, %v5847_v13  ;;  %v6424_v60 = vld [vmem:[%s10128_s11 + $0x46c] sm:$0xf]  ;;  %v6149_v13 = vld [vmem:[#allocation2 + $0xf0] sm:$0xf] }
 0x4ff   :  { %4145 = vmatpush.bf16.msrb.mxu3 %v5290_v1  ;;  %4158 = vmatpush.bf16.msrb.mxu1 %v5418_v52  ;;  %v5575_v1 = vld [vmem:[%s10128_s11 + $0x478] sm:$0xf0]  ;;  %v6476_v61 = vld [vmem:[%s10128_s11 + $0x60c] sm:$0xf] }
 0x500   :  { %v3954_v59 = vadd.f32 %v9725_v27, %v3941_v3  ;;  %v5703_v52 = vld [vmem:[%s10128_s11 + $0x578] sm:$0xf0]  ;;  %v5578_v8 = vor.u32 %v6424_v60, %v5575_v1  ;;  %v6420_v27 = vld [vmem:[%s10128_s11 + $0x44c] sm:$0xf]  ;;  %v6558_v3 = vld [vmem:[#allocation2 + $0x74] sm:$0xf0] }
 0x501   :  { %v5706_v2 = vor.u32 %v6456_v5, %v5703_v52  ;;  %v6007_v52 = vld [vmem:[%s10128_s11 + $0x7d8] sm:$0xf0] }
 0x502   :  { %4133 = vmatpush.bf16.msra.mxu2 %v5146_v10  ;;  %v3967_v55 = vadd.f32 %v9688_v20, %v3954_v59  ;;  %v6532_v59 = vld [vmem:[%s10128_s11 + $0x7cc] sm:$0xf] }
 0x503   :  { %4146 = vmatpush.bf16.msrb.mxu3 %v5274_v16  ;;  %4159 = vmatpush.bf16.msrb.mxu1 %v5402_v51  ;;  %v5562_v51 = vor.u32 %v6420_v27, %v5559_v46  ;;  %v6078_v27 = vor.u32 %v6556_v36, %v6077_v63  ;;  %v6528_v46 = vld [vmem:[%s10128_s11 + $0x7ac] sm:$0xf] }
 0x505   :  { %4134 = vmatmul.bf16.vlgmr.msra.gmra.mxu2 %v8601_v30  ;;  %v5610_v30 = vor.u32 %v6432_v34, %v5607_v62  ;;  %v4005_v32 = vpop.f32.mrf.mxu1  ;;  %v5674_v34 = vor.u32 %v6448_v29, %v5671_v39  ;;  %v5802_v62 = vor.u32 %v6480_v42, %v5799_v26  ;;  %v6520_v29 = vld [vmem:[%s10128_s11 + $0x76c] sm:$0xf]  ;;  %v5959_v39 = vld [vmem:[%s10128_s11 + $0x778] sm:$0xf0]  ;;  %v6053_v42 = vld [vmem:[#allocation2 + $0x30] sm:$0xf] }
 0x506   :  { %4165 = vmatpush.bf16.msrb.mxu2 %v5642_v19  ;;  %4147 = vmatmul.bf16.vlgmr.msrb.gmra.mxu3 %v8641_v15  ;;  %v5738_v15 = vor.u32 %v6464_v58, %v5735_v9  ;;  %v5690_v19 = vor.u32 %v6452_v41, %v5687_v50  ;;  %v5527_v58 = vld [vmem:[%s10128_s11 + $0x418] sm:$0xf0]  ;;  %v6444_v9 = vld [vmem:[%s10128_s11 + $0x50c] sm:$0xf]  ;;  %v6069_v50 = vld [vmem:[#allocation2 + $0x50] sm:$0xf] }
 0x507   :  { %4178 = vmatpush.bf16.msra.mxu3 %v5770_v17  ;;  %4191 = vmatpush.bf16.msra.mxu1 %v5898_v14  ;;  %v5818_v17 = vor.u32 %v6484_v28, %v5815_v24  ;;  %v6416_v14 = vld [vmem:[%s10128_s11 + $0x42c] sm:$0xf]  ;;  %v6554_v28 = vld [vmem:[#allocation2 + $0x54] sm:$0xf0]  ;;  %v6133_v24 = vld [vmem:[#allocation2 + $0xd0] sm:$0xf] }
 0x508   :  { %4160 = vmatmul.bf16.vlgmr.msrb.gmra.mxu1 %v8687_v40  ;;  %v6460_v40 = vld [vmem:[%s10128_s11 + $0x58c] sm:$0xf]  ;;  %v3979_v10 = vpop.f32.mrf.mxu2  ;;  %v6550_v26 = vld [vmem:[#allocation2 + $0x34] sm:$0xf0] }
 0x509   :  { %v5722_v0 = vor.u32 %v6460_v40, %v5719_v47  ;;  %v3992_v16 = vpop.f32.mrf.mxu3  ;;  %v3980_v20 = vadd.f32 %v3979_v10, %v3967_v55  ;;  %v6085_v40 = vld [vmem:[#allocation2 + $0x70] sm:$0xf]  ;;  %v5991_v55 = vld [vmem:[%s10128_s11 + $0x7b8] sm:$0xf0]  ;;  %v6570_v10 = vld [vmem:[#allocation2 + $0xd4] sm:$0xf0] }
 0x50a   :  { %4166 = vmatpush.bf16.msrb.mxu2 %v5626_v35  ;;  %v6086_v5 = vor.u32 %v6558_v3, %v6085_v40  ;;  %v6512_v3 = vld [vmem:[%s10128_s11 + $0x72c] sm:$0xf] }
 0x50b   :  { %4179 = vmatpush.bf16.msra.mxu3 %v5754_v23  ;;  %4192 = vmatpush.bf16.msra.mxu1 %v5882_v33  ;;  %v3993_v7 = vadd.f32 %v3992_v16, %v3980_v20  ;;  %v5546_v23 = vor.u32 %v6416_v14, %v5543_v25  ;;  %v6412_v33 = vld [vmem:[%s10128_s11 + $0x40c] sm:$0xf]  ;;  %v5994_v16 = vor.u32 %v6528_v46, %v5991_v55  ;;  %v6560_v46 = vld [vmem:[#allocation2 + $0x84] sm:$0xf0]  ;;  %v6590_v55 = vld [vmem:[#allocation2 + $0x174] sm:$0xf0] }
 0x50c   :  { %v5530_v4 = vor.u32 %v6412_v33, %v5527_v58  ;;  %v6070_v20 = vor.u32 %v6554_v28, %v6069_v50  ;;  %v5962_v33 = vor.u32 %v6520_v29, %v5959_v39  ;;  %v6557_v28 = vld [vmem:[#allocation2 + $0x74] sm:$0xf]  ;;  %v6197_v29 = vld [vmem:[#allocation2 + $0x150] sm:$0xf] }
 0x50d   :  { %v4007_v31 = vpop.f32.mrf.mxu1  ;;  %v4006_v35 = vadd.f32 %v4005_v32, %v3993_v7  ;;  %v6553_v39 = vld [vmem:[#allocation2 + $0x54] sm:$0xf] }
 0x50e   :  { %4167 = vmatpush.bf16.msrb.mxu2 %v5610_v30  ;;  %v5783_v30 = vld [vmem:[%s10128_s11 + $0x618] sm:$0xf0] }
 0x50f   :  { %4180 = vmatpush.bf16.msra.mxu3 %v5738_v15  ;;  %4193 = vmatpush.bf16.msra.mxu1 %v5866_v53  ;;  %v4228_v56 = vadd.f32 %v4220_v37, %v4006_v35  ;;  %v6536_v15 = vld [vmem:[%s10128_s11 + $0x7ec] sm:$0xf]  ;;  %v6134_v37 = vor.u32 %v6570_v10, %v6133_v24  ;;  %v6117_v35 = vld [vmem:[#allocation2 + $0xb0] sm:$0xf]  ;;  %v6087_v24 = vld [vmem:[#allocation2 + $0x78] sm:$0xf0] }
 0x510   :  { %v3981_v53 = vpop.f32.mrf.mxu2  ;;  %v6026_v1 = vor.u32 %v6536_v15, %v6023_v38  ;;  %v6564_v15 = vld [vmem:[#allocation2 + $0xa4] sm:$0xf0] }
 0x511   :  { %v3994_v21 = vpop.f32.mrf.mxu3  ;;  %v4232_v47 = vmax.f32 %v4228_v56, 0.0  ;;  %v6548_v56 = vld [vmem:[#allocation2 + $0x24] sm:$0xf0] }
 0x512   :  { %4168 = vmatpush.bf16.msrb.mxu2 %v5594_v6  ;;  %v6574_v6 = vld [vmem:[#allocation2 + $0xf4] sm:$0xf0]  ;;  %v4219_v21 = vperm.slane %v9883_v49, 0 }
 0x513   :  { %4181 = vmatpush.bf16.msra.mxu3 %v5722_v0  ;;  %4194 = vmatpush.bf16.msra.mxu1 %v5850_v48  ;;  %v5658_v0 = vor.u32 %v6444_v9, %v5655_v12  ;;  %v5786_v48 = vor.u32 %v6476_v61, %v5783_v30  ;;  %v9928_v60 = vpack.c.bf16 %v4232_v47, %v4232_v47  ;;  %v5943_v9 = vld [vmem:[%s10128_s11 + $0x758] sm:$0xf0]  ;;  %v6045_v12 = vld [vmem:[#allocation2 + $0x20] sm:$0xf] }
 0x514   :  { %v6150_v32 = vor.u32 %v6574_v6, %v6149_v13  ;;  %v6109_v30 = vld [vmem:[#allocation2 + $0xa0] sm:$0xf]  ;;  %v6046_v40 = vor.u32 %v6548_v56, %v6045_v12  ;;  %v5927_v13 = vld [vmem:[%s10128_s11 + $0x738] sm:$0xf0]  ;;  %v6037_v6 = vld [vmem:[#allocation2 + $0x10] sm:$0xf]  ;;  %v4227_v63 = vadd.f32 %v4219_v21, %v9644_v54 }
 0x515   :  { %4702 = vmatmul.bf16.vlgmr.msrb.gmra.mxu0 %v9928_v60  ;;  %v6181_v12 = vld [vmem:[#allocation2 + $0x130] sm:$0xf] }
 0x516   :  { %4169 = vmatpush.bf16.msrb.mxu2 %v5578_v8  ;;  %v6141_v8 = vld [vmem:[#allocation2 + $0xe0] sm:$0xf] }
 0x517   :  { %4182 = vmatpush.bf16.msra.mxu3 %v5706_v2  ;;  %4195 = vmatpush.bf16.msra.mxu1 %v5834_v44  ;;  %v6572_v2 = vld [vmem:[#allocation2 + $0xe4] sm:$0xf0]  ;;  %v6010_v44 = vor.u32 %v6532_v59, %v6007_v52  ;;  %v5911_v52 = vld [vmem:[%s10128_s11 + $0x718] sm:$0xf0] }
 0x518   :  { %v6142_v41 = vor.u32 %v6572_v2, %v6141_v8  ;;  %v6029_v8 = vld [vmem:[#allocation2] sm:$0xf]  ;;  %v6544_v2 = vld [vmem:[#allocation2 + $0x4] sm:$0xf0] }
 0x51a   :  { %4170 = vmatpush.bf16.msrb.mxu2 %v5562_v51  ;;  %v5975_v51 = vld [vmem:[%s10128_s11 + $0x798] sm:$0xf0] }
 0x51b   :  { %4183 = vmatpush.bf16.msra.mxu3 %v5690_v19  ;;  %4196 = vmatpush.bf16.msra.mxu1 %v5818_v17  ;;  %v6061_v19 = vld [vmem:[#allocation2 + $0x40] sm:$0xf] }
 0x51c   :  { %v6125_v17 = vld [vmem:[#allocation2 + $0xc0] sm:$0xf] }
 0x51e   :  { %4171 = vmatpush.bf16.msrb.mxu2 %v5546_v23  ;;  %v6566_v23 = vld [vmem:[#allocation2 + $0xb4] sm:$0xf0] }
 0x51f   :  { %4184 = vmatpush.bf16.msra.mxu3 %v5674_v34  ;;  %4197 = vmatpush.bf16.msra.mxu1 %v5802_v62  ;;  %v6054_v34 = vor.u32 %v6550_v26, %v6053_v42  ;;  %v6516_v62 = vld [vmem:[%s10128_s11 + $0x74c] sm:$0xf]  ;;  %v6118_v58 = vor.u32 %v6566_v23, %v6117_v35  ;;  %v6071_v42 = vld [vmem:[#allocation2 + $0x58] sm:$0xf0]  ;;  %v6189_v23 = vld [vmem:[#allocation2 + $0x140] sm:$0xf] }
 0x520   :  { %v5946_v38 = vor.u32 %v6516_v62, %v5943_v9  ;;  %v6074_v35 = vor.u32 %v6553_v39, %v6071_v42  ;;  %v6063_v62 = vld [vmem:[#allocation2 + $0x48] sm:$0xf0]  ;;  %v6579_v42 = vld [vmem:[#allocation2 + $0x124] sm:$0xf] }
 0x522   :  { %4172 = vmatpush.bf16.msrb.mxu2 %v5530_v4  ;;  %v6110_v4 = vor.u32 %v6564_v15, %v6109_v30  ;;  %v6549_v30 = vld [vmem:[#allocation2 + $0x34] sm:$0xf]  ;;  %v6055_v15 = vld [vmem:[#allocation2 + $0x38] sm:$0xf0] }
 0x523   :  { %4185 = vmatpush.bf16.msra.mxu3 %v5658_v0  ;;  %4198 = vmatpush.bf16.msra.mxu1 %v5786_v48  ;;  %v6546_v0 = vld [vmem:[#allocation2 + $0x14] sm:$0xf0]  ;;  %v6101_v48 = vld [vmem:[#allocation2 + $0x90] sm:$0xf]  ;;  %v6058_v21 = vor.u32 %v6549_v30, %v6055_v15  ;;  %v6575_v15 = vld [vmem:[#allocation2 + $0x104] sm:$0xf] }
 0x524   :  { %v6038_v59 = vor.u32 %v6546_v0, %v6037_v6 }
 0x525   :  { %4173 = vmatmul.bf16.vlgmr.msrb.gmra.mxu2 %v8866_v43  ;;  %v6524_v43 = vld [vmem:[%s10128_s11 + $0x78c] sm:$0xf]  ;;  %v9955_v7 = vpop.f32.mrf.mxu1 }
 0x526   :  { %4204 = vmatpush.bf16.msra.mxu2 %v6026_v1  ;;  %4186 = vmatmul.bf16.vlgmr.msra.gmra.mxu3 %v8868_v57  ;;  %v6552_v57 = vld [vmem:[#allocation2 + $0x44] sm:$0xf0]  ;;  %v5978_v14 = vor.u32 %v6524_v43, %v5975_v51  ;;  %v6562_v1 = vld [vmem:[#allocation2 + $0x94] sm:$0xf0]  ;;  %v6205_v51 = vld [vmem:[#allocation2 + $0x160] sm:$0xf] }
 0x527   :  { %4629 = vmatpush.bf16.msrb.mxu3 %v6086_v5  ;;  %4642 = vmatpush.bf16.msrb.mxu1 %v6150_v32  ;;  %v6062_v25 = vor.u32 %v6552_v57, %v6061_v19  ;;  %v5930_v5 = vor.u32 %v6512_v3, %v5927_v13  ;;  %v6508_v32 = vld [vmem:[%s10128_s11 + $0x70c] sm:$0xf]  ;;  %v6102_v36 = vor.u32 %v6562_v1, %v6101_v48  ;;  %v6588_v19 = vld [vmem:[#allocation2 + $0x164] sm:$0xf0]  ;;  %v6165_v48 = vld [vmem:[#allocation2 + $0x110] sm:$0xf] }
 0x528   :  { %4199 = vmatmul.bf16.vlgmr.msra.gmra.mxu1 %v8870_v22  ;;  %v6568_v22 = vld [vmem:[#allocation2 + $0xc4] sm:$0xf0]  ;;  %v9966_v61 = vpop.f32.mrf.mxu2  ;;  %v5914_v10 = vor.u32 %v6508_v32, %v5911_v52  ;;  %v6555_v57 = vld [vmem:[#allocation2 + $0x64] sm:$0xf]  ;;  %v6578_v1 = vld [vmem:[#allocation2 + $0x114] sm:$0xf0] }
 0x529   :  { %v6126_v31 = vor.u32 %v6568_v22, %v6125_v17  ;;  %v9968_v53 = vpop.f32.mrf.mxu3  ;;  %v6079_v17 = vld [vmem:[#allocation2 + $0x68] sm:$0xf0]  ;;  %v6547_v3 = vld [vmem:[#allocation2 + $0x24] sm:$0xf]  ;;  %v6039_v32 = vld [vmem:[#allocation2 + $0x18] sm:$0xf0]  ;;  %v6166_v52 = vor.u32 %v6578_v1, %v6165_v48 }
 0x52a   :  { %4205 = vmatpush.bf16.msra.mxu2 %v6010_v44  ;;  %v6093_v44 = vld [vmem:[#allocation2 + $0x80] sm:$0xf] }
 0x52b   :  { %4630 = vmatpush.bf16.msrb.mxu3 %v6078_v27  ;;  %4643 = vmatpush.bf16.msrb.mxu1 %v6142_v41  ;;  %v6213_v41 = vld [vmem:[#allocation2 + $0x170] sm:$0xf]  ;;  %v6094_v43 = vor.u32 %v6560_v46, %v6093_v44  ;;  %v6031_v44 = vld [vmem:[#allocation2 + $0x8] sm:$0xf0]  ;;  %v6215_v46 = vld [vmem:[#allocation2 + $0x178] sm:$0xf0] }
 0x52c   :  { %v6214_v54 = vor.u32 %v6590_v55, %v6213_v41 }
 0x52d   :  { %v4046_v47 = vpop.f32.mrf.mxu1 }
 0x52e   :  { %4206 = vmatpush.bf16.msra.mxu2 %v5994_v16  ;;  %v6030_v16 = vor.u32 %v6544_v2, %v6029_v8  ;;  %v6047_v47 = vld [vmem:[#allocation2 + $0x28] sm:$0xf0]  ;;  %v6157_v8 = vld [vmem:[#allocation2 + $0x100] sm:$0xf]  ;;  %v6576_v2 = vld [vmem:[#allocation2 + $0x104] sm:$0xf0] }
 0x52f   :  { %4631 = vmatpush.bf16.msrb.mxu3 %v6070_v20  ;;  %4644 = vmatpush.bf16.msrb.mxu1 %v6134_v37  ;;  %v4231_v20 = vmax.f32 %v4227_v63, 0.0  ;;  %v6090_v37 = vor.u32 %v6557_v28, %v6087_v24  ;;  %v6050_v0 = vor.u32 %v6547_v3, %v6047_v47  ;;  %v4019_v28 = vadd.f32 %v9966_v61, %v8790_v18  ;;  %v6583_v18 = vld [vmem:[#allocation2 + $0x144] sm:$0xf]  ;;  %v6191_v61 = vld [vmem:[#allocation2 + $0x148] sm:$0xf0] }
 0x530   :  { %v4020_v27 = vpop.f32.mrf.mxu2  ;;  %v6277_v47 = vld [vmem:[#allocation2 + $0x1f0] sm:$0xf] }
 0x531   :  { %v4033_v50 = vpop.f32.mrf.mxu3  ;;  %v9984_v22 = vpack.c.bf16 %v4231_v20, %v4231_v20  ;;  %v6589_v27 = vld [vmem:[#allocation2 + $0x174] sm:$0xf]  ;;  %v6207_v20 = vld [vmem:[#allocation2 + $0x168] sm:$0xf0] }
 0x532   :  { %4207 = vmatpush.bf16.msra.mxu2 %v5978_v14  ;;  %v6206_v14 = vor.u32 %v6588_v19, %v6205_v51  ;;  %v6158_v50 = vor.u32 %v6576_v2, %v6157_v8  ;;  %v6199_v51 = vld [vmem:[#allocation2 + $0x158] sm:$0xf0]  ;;  %v6600_v8 = vld [vmem:[#allocation2 + $0x1c4] sm:$0xf0] }
 0x533   :  { %4632 = vmatpush.bf16.msrb.mxu3 %v6062_v25  ;;  %4645 = vmatpush.bf16.msrb.mxu1 %v6126_v31  ;;  %v6082_v25 = vor.u32 %v6555_v57, %v6079_v17  ;;  %v6586_v31 = vld [vmem:[#allocation2 + $0x154] sm:$0xf0] }
 0x534   :  { %v6198_v26 = vor.u32 %v6586_v31, %v6197_v29  ;;  %v6183_v29 = vld [vmem:[#allocation2 + $0x138] sm:$0xf0] }
 0x536   :  { %4208 = vmatpush.bf16.msra.mxu2 %v5962_v33  ;;  %v6584_v33 = vld [vmem:[#allocation2 + $0x144] sm:$0xf0] }
 0x537   :  { %4633 = vmatpush.bf16.msrb.mxu3 %v6054_v34  ;;  %4646 = vmatpush.bf16.msrb.mxu1 %v6118_v58  ;;  %v6551_v34 = vld [vmem:[#allocation2 + $0x44] sm:$0xf]  ;;  %v6190_v58 = vor.u32 %v6584_v33, %v6189_v23  ;;  %v4221_v33 = vperm.slane %v9883_v49, 2 }
 0x538   :  { %v6066_v9 = vor.u32 %v6551_v34, %v6063_v62  ;;  %v6577_v62 = vld [vmem:[#allocation2 + $0x114] sm:$0xf] }
 0x53a   :  { %4209 = vmatpush.bf16.msra.mxu2 %v5946_v38  ;;  %v6173_v38 = vld [vmem:[#allocation2 + $0x120] sm:$0xf] }
 0x53b   :  { %4634 = vmatpush.bf16.msrb.mxu3 %v6046_v40  ;;  %4647 = vmatpush.bf16.msrb.mxu1 %v6110_v4  ;;  %v6580_v40 = vld [vmem:[#allocation2 + $0x124] sm:$0xf0] }
 0x53c   :  { %v6174_v6 = vor.u32 %v6580_v40, %v6173_v38 }
 0x53e   :  { %4210 = vmatpush.bf16.msra.mxu2 %v5930_v5 }
 0x53f   :  { %4635 = vmatpush.bf16.msrb.mxu3 %v6038_v59  ;;  %4648 = vmatpush.bf16.msrb.mxu1 %v6102_v36  ;;  %v6545_v59 = vld [vmem:[#allocation2 + $0x14] sm:$0xf]  ;;  %v6543_v36 = vld [vmem:[#allocation2 + $0x4] sm:$0xf] }
 0x540   :  { %v6042_v63 = vor.u32 %v6545_v59, %v6039_v32  ;;  %v6034_v24 = vor.u32 %v6543_v36, %v6031_v44  ;;  %v6602_v59 = vld [vmem:[#allocation2 + $0x1d4] sm:$0xf0]  ;;  %v6253_v36 = vld [vmem:[#allocation2 + $0x1c0] sm:$0xf] }
 0x541   :  { %v6254_v2 = vor.u32 %v6600_v8, %v6253_v36 }
 0x542   :  { %4211 = vmatpush.bf16.msra.mxu2 %v5914_v10  ;;  %v6218_v10 = vor.u32 %v6589_v27, %v6215_v46  ;;  %v6245_v27 = vld [vmem:[#allocation2 + $0x1b0] sm:$0xf]  ;;  %v6598_v46 = vld [vmem:[#allocation2 + $0x1b4] sm:$0xf0] }
 0x543   :  { %4636 = vmatpush.bf16.msrb.mxu3 %v6030_v16  ;;  %4649 = vmatpush.bf16.msrb.mxu1 %v6094_v43  ;;  %v6587_v16 = vld [vmem:[#allocation2 + $0x164] sm:$0xf]  ;;  %v4032_v43 = vadd.f32 %v9968_v53, %v4019_v28 }
 0x545   :  { %4212 = vmatmul.bf16.vlgmr.msra.gmra.mxu2 %v8950_v45  ;;  %v6582_v45 = vld [vmem:[#allocation2 + $0x134] sm:$0xf0]  ;;  %v9989_v56 = vpop.f32.mrf.mxu1  ;;  %v4045_v19 = vadd.f32 %v9955_v7, %v4032_v43 }
 0x546   :  { %4655 = vmatpush.bf16.msrb.mxu2 %v6214_v54  ;;  %4637 = vmatmul.bf16.vlgmr.msrb.gmra.mxu3 %v9984_v22  ;;  %v6210_v54 = vor.u32 %v6587_v16, %v6207_v20  ;;  %v6229_v16 = vld [vmem:[#allocation2 + $0x190] sm:$0xf]  ;;  %v6594_v20 = vld [vmem:[#allocation2 + $0x194] sm:$0xf0] }
 0x547   :  { %4681 = vmatpush.bf16.msra.mxu1 %v6090_v37  ;;  %v6585_v37 = vld [vmem:[#allocation2 + $0x154] sm:$0xf]  ;;  %v6230_v43 = vor.u32 %v6594_v20, %v6229_v16 }
 0x548   :  { %4650 = vmatmul.bf16.vlgmr.msrb.gmra.mxu1 %v9928_v60  ;;  %v6182_v60 = vor.u32 %v6582_v45, %v6181_v12  ;;  %v4057_v4 = vpop.f32.mrf.mxu2  ;;  %v6202_v57 = vor.u32 %v6585_v37, %v6199_v51  ;;  %v6592_v37 = vld [vmem:[#allocation2 + $0x184] sm:$0xf0] }
 0x549   :  { %v4070_v13 = vpop.f32.mrf.mxu3  ;;  %v4058_v17 = vadd.f32 %v4057_v4, %v4045_v19  ;;  %v6606_v4 = vld [vmem:[#allocation2 + $0x1f4] sm:$0xf0] }
 0x54a   :  { %4656 = vmatpush.bf16.msrb.mxu2 %v6206_v14  ;;  %v6194_v14 = vor.u32 %v6583_v18, %v6191_v61  ;;  %v6279_v18 = vld [vmem:[#allocation2 + $0x1f8] sm:$0xf0] }
 0x54b   :  { %4682 = vmatpush.bf16.msra.mxu1 %v6082_v25  ;;  %v6581_v25 = vld [vmem:[#allocation2 + $0x134] sm:$0xf]  ;;  %v4071_v31 = vadd.f32 %v4070_v13, %v4058_v17  ;;  %v6278_v13 = vor.u32 %v6606_v4, %v6277_v47  ;;  %v6603_v17 = vld [vmem:[#allocation2 + $0x1e4] sm:$0xf] }
 0x54c   :  { %v6186_v39 = vor.u32 %v6581_v25, %v6183_v29  ;;  %v6591_v4 = vld [vmem:[#allocation2 + $0x184] sm:$0xf] }
 0x54d   :  { %v4085_v5 = vpop.f32.mrf.mxu1  ;;  %4668 = vmatpush.bf16.msra.mxu3 %v6278_v13  ;;  %v6223_v13 = vld [vmem:[#allocation2 + $0x188] sm:$0xf0] }
 0x54e   :  { %4657 = vmatpush.bf16.msrb.mxu2 %v6198_v26  ;;  %v6175_v26 = vld [vmem:[#allocation2 + $0x128] sm:$0xf0]  ;;  %v6261_v5 = vld [vmem:[#allocation2 + $0x1d0] sm:$0xf] }
 0x54f   :  { %4683 = vmatpush.bf16.msra.mxu1 %v6074_v35  ;;  %v6178_v34 = vor.u32 %v6579_v42, %v6175_v26  ;;  %v6263_v42 = vld [vmem:[#allocation2 + $0x1d8] sm:$0xf0] }
 0x550   :  { %v4059_v41 = vpop.f32.mrf.mxu2 }
 0x551   :  { %v4072_v55 = vpop.f32.mrf.mxu3  ;;  %v6246_v41 = vor.u32 %v6598_v46, %v6245_v27 }
 0x552   :  { %4658 = vmatpush.bf16.msrb.mxu2 %v6190_v58  ;;  %v6167_v58 = vld [vmem:[#allocation2 + $0x118] sm:$0xf0]  ;;  %v6237_v55 = vld [vmem:[#allocation2 + $0x1a0] sm:$0xf] }
 0x553   :  { %4684 = vmatpush.bf16.msra.mxu1 %v6066_v9  ;;  %v6170_v30 = vor.u32 %v6577_v62, %v6167_v58  ;;  %v6597_v62 = vld [vmem:[#allocation2 + $0x1b4] sm:$0xf]  ;;  %v6247_v58 = vld [vmem:[#allocation2 + $0x1b8] sm:$0xf0] }
 0x556   :  { %4659 = vmatpush.bf16.msrb.mxu2 %v6182_v60  ;;  %v6159_v60 = vld [vmem:[#allocation2 + $0x108] sm:$0xf0] }
 0x557   :  { %4685 = vmatpush.bf16.msra.mxu1 %v6058_v21  ;;  %v6162_v3 = vor.u32 %v6575_v15, %v6159_v60 }
 0x55a   :  { %4660 = vmatpush.bf16.msrb.mxu2 %v6174_v6  ;;  %v6269_v6 = vld [vmem:[#allocation2 + $0x1e0] sm:$0xf] }
 0x55b   :  { %4686 = vmatpush.bf16.msra.mxu1 %v6050_v0  ;;  %v6604_v0 = vld [vmem:[#allocation2 + $0x1e4] sm:$0xf0] }
 0x55c   :  { %v6270_v48 = vor.u32 %v6604_v0, %v6269_v6  ;;  %v6226_v6 = vor.u32 %v6591_v4, %v6223_v13  ;;  %v4751_v4 = vld [vmem:[%s10133_s16 + $0x80] sm:$0xff] }
 0x55e   :  { %4661 = vmatpush.bf16.msrb.mxu2 %v6166_v52  ;;  %4669 = vmatpush.bf16.msra.mxu3 %v6270_v48 }
 0x55f   :  { %4687 = vmatpush.bf16.msra.mxu1 %v6042_v63  ;;  %v6262_v63 = vor.u32 %v6602_v59, %v6261_v5 }
 0x562   :  { %4662 = vmatpush.bf16.msrb.mxu2 %v6158_v50  ;;  %4670 = vmatpush.bf16.msra.mxu3 %v6262_v63  ;;  %v6596_v50 = vld [vmem:[#allocation2 + $0x1a4] sm:$0xf0]  ;;  %v4222_v63 = vperm.slane %v9883_v49, 3  ;;  %v4750_v49 = vld [vmem:[%s10133_s16 + $0x78] sm:$0xff] }
 0x563   :  { %4688 = vmatpush.bf16.msra.mxu1 %v6034_v24 }
 0x565   :  { %v9996_v53 = vpop.f32.mrf.mxu1 }
 0x566   :  { %4707 = vmatpush.bf16.msra.mxu2 %v6218_v10  ;;  %4689 = vmatmul.bf16.vlgmr.msra.gmra.mxu1 %v9984_v22  ;;  %v4084_v22 = vadd.f32 %v9989_v56, %v4071_v31  ;;  %v6238_v10 = vor.u32 %v6596_v50, %v6237_v55  ;;  %v4123_v15 = vadd.f32 %v9996_v53, %v8828_v11  ;;  %v4303_v11 = vld [vmem:[%s10132_s15] sm:$0x3] }
 0x567   :  { %4671 = vmatpush.bf16.msra.mxu3 %v6254_v2  ;;  %v4305_v59 = vperm.slane %v4303_v11, 0  ;;  %4771 = vmatpush.msrb.mxu1 %v4750_v49 }
 0x568   :  { %v4096_v35 = vpop.f32.mrf.mxu2 }
 0x569   :  { %v4097_v7 = vadd.f32 %v4096_v35, %v4084_v22  ;;  %v4109_v23 = vpop.f32.mrf.mxu3 }
 0x56a   :  { %4708 = vmatpush.bf16.msra.mxu2 %v6210_v54  ;;  %v6221_v54 = vld [vmem:[#allocation2 + $0x180] sm:$0xf] }
 0x56b   :  { %v4110_v9 = vadd.f32 %v4109_v23, %v4097_v7  ;;  %4672 = vmatpush.bf16.msra.mxu3 %v6246_v41  ;;  %v6222_v51 = vor.u32 %v6592_v37, %v6221_v54  ;;  %v6599_v23 = vld [vmem:[#allocation2 + $0x1c4] sm:$0xf]  ;;  %v4766_v37 = vld [vmem:[%s10133_s16 + $0xf8] sm:$0xff] }
 0x56c   :  { %v4748_v54 = vld [vmem:[%s10133_s16 + $0x68] sm:$0xff]  ;;  %4791 = vmatpush.msra.mxu0 %v4766_v37 }
 0x56d   :  { %v4124_v12 = vpop.f32.mrf.mxu1  ;;  %v4229_v45 = vadd.f32 %v4221_v33, %v4110_v9  ;;  %v6255_v33 = vld [vmem:[#allocation2 + $0x1c8] sm:$0xf0]  ;;  %v6595_v9 = vld [vmem:[#allocation2 + $0x1a4] sm:$0xf] }
 0x56e   :  { %4709 = vmatpush.bf16.msra.mxu2 %v6202_v57  ;;  %v6605_v57 = vld [vmem:[#allocation2 + $0x1f4] sm:$0xf] }
 0x56f   :  { %v4233_v21 = vmax.f32 %v4229_v45, 0.0  ;;  %4673 = vmatpush.bf16.msra.mxu3 %v6238_v10  ;;  %v6282_v61 = vor.u32 %v6605_v57, %v6279_v18  ;;  %v6250_v45 = vor.u32 %v6597_v62, %v6247_v58  ;;  %v4764_v57 = vld [vmem:[%s10133_s16 + $0xe8] sm:$0xff]  ;;  %v4746_v18 = vld [vmem:[%s10133_s16 + $0x58] sm:$0xff]  ;;  %v4737_v58 = vld [vmem:[%s10133_s16 + $0x10] sm:$0xff] }
 0x570   :  { %v4098_v38 = vpop.f32.mrf.mxu2 }
 0x571   :  { %v4237_v40 = vpack.c.bf16 %v4233_v21, %v4233_v21  ;;  %v4111_v56 = vpop.f32.mrf.mxu3 }
 0x572   :  { %4710 = vmatpush.bf16.msra.mxu2 %v6194_v14  ;;  %v6271_v14 = vld [vmem:[#allocation2 + $0x1e8] sm:$0xf0]  ;;  %v6231_v56 = vld [vmem:[#allocation2 + $0x198] sm:$0xf0] }
 0x573   :  { %4663 = vmatmul.bf16.vlgmr.msrb.gmra.mxu2 %v4237_v40  ;;  %4674 = vmatpush.bf16.msra.mxu3 %v6230_v43  ;;  %v6274_v25 = vor.u32 %v6603_v17, %v6271_v14  ;;  %v4749_v43 = vld [vmem:[%s10133_s16 + $0x70] sm:$0xff] }
 0x574   :  { %4772 = vmatpush.msrb.mxu1 %v4749_v43  ;;  %v4745_v14 = vld [vmem:[%s10133_s16 + $0x50] sm:$0xff] }
 0x576   :  { %4711 = vmatpush.bf16.msra.mxu2 %v6186_v39  ;;  %v6601_v39 = vld [vmem:[#allocation2 + $0x1d4] sm:$0xf]  ;;  %4773 = vmatpush.msrb.mxu1 %v4748_v54 }
 0x577   :  { %4675 = vmatpush.bf16.msra.mxu3 %v6222_v51  ;;  %v6266_v22 = vor.u32 %v6601_v39, %v6263_v42  ;;  %v4765_v51 = vld [vmem:[%s10133_s16 + $0xf0] sm:$0xff]  ;;  %v4743_v39 = vld [vmem:[%s10133_s16 + $0x40] sm:$0xff]  ;;  %v4742_v42 = vld [vmem:[%s10133_s16 + $0x38] sm:$0xff] }
 0x578   :  { %4792 = vmatpush.msra.mxu0 %v4765_v51 }
 0x57a   :  { %4712 = vmatpush.bf16.msra.mxu2 %v6178_v34  ;;  %v6258_v34 = vor.u32 %v6599_v23, %v6255_v33  ;;  %4793 = vmatpush.msra.mxu0 %v4764_v57  ;;  %v4738_v23 = vld [vmem:[%s10133_s16 + $0x18] sm:$0xff] }
 0x57b   :  { %4720 = vmatpush.bf16.msrb.mxu3 %v6282_v61  ;;  %v4763_v61 = vld [vmem:[%s10133_s16 + $0xe0] sm:$0xff] }
 0x57c   :  { %4794 = vmatpush.msra.mxu0 %v4763_v61 }
 0x57e   :  { %4713 = vmatpush.bf16.msra.mxu2 %v6170_v30  ;;  %v6239_v30 = vld [vmem:[#allocation2 + $0x1a8] sm:$0xf0] }
 0x57f   :  { %4721 = vmatpush.bf16.msrb.mxu3 %v6274_v25  ;;  %v6242_v21 = vor.u32 %v6595_v9, %v6239_v30  ;;  %v4761_v9 = vld [vmem:[%s10133_s16 + $0xd0] sm:$0xff]  ;;  %v4735_v30 = vld [vmem:[%s10133_s16] sm:$0xff] }
 0x582   :  { %4714 = vmatpush.bf16.msra.mxu2 %v6162_v3 }
 0x583   :  { %4722 = vmatpush.bf16.msrb.mxu3 %v6266_v22  ;;  %v4741_v22 = vld [vmem:[%s10133_s16 + $0x30] sm:$0xff] }
 0x585   :  { %v10000_v1 = vpop.f32.mrf.mxu1  ;;  %4715 = vmatmul.bf16.vlgmr.msra.gmra.mxu2 %v4237_v40  ;;  %v6593_v40 = vld [vmem:[#allocation2 + $0x194] sm:$0xf] }
 0x586   :  { %v6234_v3 = vor.u32 %v6593_v40, %v6231_v56  ;;  %v4755_v40 = vld [vmem:[%s10133_s16 + $0xa0] sm:$0xff]  ;;  %v4754_v56 = vld [vmem:[%s10133_s16 + $0x98] sm:$0xff] }
 0x587   :  { %4723 = vmatpush.bf16.msrb.mxu3 %v6258_v34 }
 0x588   :  { %v4135_v32 = vpop.f32.mrf.mxu2 }
 0x589   :  { %v10002_v52 = vpop.f32.mrf.mxu3  ;;  %v4136_v38 = vadd.f32 %v4135_v32, %v4123_v15  ;;  %v4759_v15 = vld [vmem:[%s10133_s16 + $0xc0] sm:$0xff] }
 0x58b   :  { %4724 = vmatpush.bf16.msrb.mxu3 %v6250_v45  ;;  %v4149_v47 = vadd.f32 %v10002_v52, %v4136_v38  ;;  %v4760_v45 = vld [vmem:[%s10133_s16 + $0xc8] sm:$0xff] }
 0x58c   :  { %v4756_v38 = vld [vmem:[%s10133_s16 + $0xa8] sm:$0xff] }
 0x58d   :  { %v4163_v44 = vpop.f32.mrf.mxu1  ;;  %v4162_v0 = vadd.f32 %v10000_v1, %v4149_v47  ;;  %v4752_v47 = vld [vmem:[%s10133_s16 + $0x88] sm:$0xff] }
 0x58f   :  { %4725 = vmatpush.bf16.msrb.mxu3 %v6242_v21  ;;  %v4757_v21 = vld [vmem:[%s10133_s16 + $0xb0] sm:$0xff] }
 0x590   :  { %v4137_v28 = vpop.f32.mrf.mxu2 }
 0x591   :  { %v4150_v24 = vpop.f32.mrf.mxu3  ;;  %v4306_v28 = vperm.slane %v4303_v11, 1 }
 0x592   :  { %v10004_v19 = vpop.f32.mrf.mxu0 }
 0x593   :  { %4726 = vmatpush.bf16.msrb.mxu3 %v6234_v3  ;;  %v4753_v3 = vld [vmem:[%s10133_s16 + $0x90] sm:$0xff] }
 0x597   :  { %4727 = vmatpush.bf16.msrb.mxu3 %v6226_v6 }
 0x59a   :  { %v4705_v31 = vpop.f32.mrf.mxu0 }
 0x59b   :  { %v4744_v31 = vld [vmem:[%s10133_s16 + $0x48] sm:$0xff] }
 0x5a5   :  { %v4200_v29 = vpop.f32.mrf.mxu1 }
 0x5a8   :  { %v4174_v26 = vpop.f32.mrf.mxu2 }
 0x5a9   :  { %v4187_v35 = vpop.f32.mrf.mxu3  ;;  %v4175_v48 = vadd.f32 %v4174_v26, %v4162_v0 }
 0x5ab   :  { %v4188_v53 = vadd.f32 %v4187_v35, %v4175_v48  ;;  %v4740_v35 = vld [vmem:[%s10133_s16 + $0x28] sm:$0xff] }
 0x5ad   :  { %v4202_v7 = vpop.f32.mrf.mxu1  ;;  %v4201_v32 = vadd.f32 %v4200_v29, %v4188_v53  ;;  %v4762_v29 = vld [vmem:[%s10133_s16 + $0xd8] sm:$0xff] }
 0x5ae   :  { %4795 = vmatpush.msra.mxu0 %v4762_v29  ;;  %v4739_v7 = vld [vmem:[%s10133_s16 + $0x20] sm:$0xff] }
 0x5b0   :  { %v4176_v12 = vpop.f32.mrf.mxu2  ;;  %4796 = vmatpush.msra.mxu0 %v4761_v9 }
 0x5b1   :  { %v4189_v60 = vpop.f32.mrf.mxu3  ;;  %v4736_v12 = vld [vmem:[%s10133_s16 + $0x8] sm:$0xff] }
 0x5b2   :  { %4797 = vmatpush.msra.mxu0 %v4760_v45  ;;  %v4758_v60 = vld [vmem:[%s10133_s16 + $0xb8] sm:$0xff] }
 0x5b4   :  { %4798 = vmatpush.msra.mxu0 %v4759_v15 }
 0x5b6   :  { %4799 = vmatpush.msra.mxu0 %v4758_v60 }
 0x5b8   :  { %4800 = vmatpush.msra.mxu0 %v4757_v21 }
 0x5ba   :  { %4801 = vmatpush.msra.mxu0 %v4756_v38 }
 0x5bc   :  { %4802 = vmatpush.msra.mxu0 %v4755_v40 }
 0x5be   :  { %4803 = vmatpush.msra.mxu0 %v4754_v56 }
 0x5c0   :  { %4804 = vmatpush.msra.mxu0 %v4753_v3 }
 0x5c2   :  { %4805 = vmatpush.msra.mxu0 %v4752_v47 }
 0x5c4   :  { %4806 = vmatpush.msra.mxu0 %v4751_v4 }
 0x5c5   :  { %v4651_v5 = vpop.f32.mrf.mxu1 }
 0x5c8   :  { %v4213_v36 = vpop.f32.mrf.mxu2 }
 0x5c9   :  { %v4638_v52 = vpop.f32.mrf.mxu3  ;;  %v4214_v8 = vadd.f32 %v4213_v36, %v4201_v32  ;;  %v6873_v32 = vld [vmem:[%s10134_s17] ss:$0 sm:$0xff] }
 0x5ca   :  { %v4639_v2 = vadd.f32 %v4638_v52, %v4305_v59 }
 0x5cb   :  { %v4230_v44 = vadd.f32 %v4222_v63, %v4214_v8 }
 0x5cc   :  { %v4652_v46 = vadd.f32 %v4651_v5, %v4639_v2 }
 0x5cd   :  { %v4653_v27 = vpop.f32.mrf.mxu1  ;;  %v4234_v1 = vmax.f32 %v4230_v44, 0.0 }
 0x5cf   :  { %v4238_v41 = vpack.c.bf16 %v4234_v1, %v4234_v1 }
 0x5d0   :  { %v4215_v55 = vpop.f32.mrf.mxu2 }
 0x5d1   :  { %v4640_v50 = vpop.f32.mrf.mxu3  ;;  %4676 = vmatmul.bf16.vlgmr.msra.gmra.mxu3 %v4238_v41 }
 0x5e1   :  { %4728 = vmatmul.bf16.vlgmr.msrb.gmra.mxu3 %v4238_v41 }
 0x5e3   :  { %v4690_v24 = vpop.f32.mrf.mxu1 }
 0x5e4   :  { %v4691_v10 = vadd.f32 %v4690_v24, %v4306_v28 }
 0x5e6   :  { %v4704_v16 = vadd.f32 %v10004_v19, %v4691_v10  ;;  %v4747_v19 = vld [vmem:[%s10133_s16 + $0x60] sm:$0xff] }
 0x5e7   :  { %4774 = vmatpush.msrb.mxu1 %v4747_v19 }
 0x5e9   :  { %4775 = vmatpush.msrb.mxu1 %v4746_v18 }
 0x5eb   :  { %v4692_v20 = vpop.f32.mrf.mxu1  ;;  %4776 = vmatpush.msrb.mxu1 %v4745_v14 }
 0x5ed   :  { %4777 = vmatpush.msrb.mxu1 %v4744_v31 }
 0x5ef   :  { %4778 = vmatpush.msrb.mxu1 %v4743_v39 }
 0x5f1   :  { %4779 = vmatpush.msrb.mxu1 %v4742_v42 }
 0x5f3   :  { %4780 = vmatpush.msrb.mxu1 %v4741_v22 }
 0x5f5   :  { %4781 = vmatpush.msrb.mxu1 %v4740_v35 }
 0x5f6   :  { %v4664_v17 = vpop.f32.mrf.mxu2 }
 0x5f7   :  { %v4665_v25 = vadd.f32 %v4664_v17, %v4652_v46  ;;  %4782 = vmatpush.msrb.mxu1 %v4739_v7 }
 0x5f9   :  { %4783 = vmatpush.msrb.mxu1 %v4738_v23 }
 0x5fb   :  { %4784 = vmatpush.msrb.mxu1 %v4737_v58 }
 0x5fd   :  { %4785 = vmatpush.msrb.mxu1 %v4736_v12 }
 0x5fe   :  { %v4666_v26 = vpop.f32.mrf.mxu2 }
 0x5ff   :  { %4786 = vmatpush.msrb.mxu1 %v4735_v30 }
 0x608   :  { %v4716_v33 = vpop.f32.mrf.mxu2 }
 0x609   :  { %v4717_v34 = vadd.f32 %v4716_v33, %v4704_v16 }
 0x610   :  { %v4718_v62 = vpop.f32.mrf.mxu2 }
 0x654   :  { %v4677_v13 = vpop.f32.mrf.mxu3 }
 0x655   :  { %v4678_v6 = vadd.f32 %v4677_v13, %v4665_v25 }
 0x657   :  { %v4733_v0 = vmax.f32 %v4678_v6, 0.0 }
 0x659   :  { %4787 = vmatmul.f32.vlgmr.msrb.gmra.mxu1 %v4733_v0 }
 0x65c   :  { %v4679_v48 = vpop.f32.mrf.mxu3 }
 0x664   :  { %v4729_v11 = vpop.f32.mrf.mxu3 }
 0x665   :  { %v4730_v53 = vadd.f32 %v4729_v11, %v4717_v34 }
 0x667   :  { %v4734_v5 = vmax.f32 %v4730_v53, 0.0 }
 0x669   :  { %4807 = vmatmul.f32.vlgmr.msra.gmra.mxu0 %v4734_v5 }
 0x66c   :  { %v4731_v59 = vpop.f32.mrf.mxu3 }
 0x6d6   :  { %v4788_v63 = vpop.f32.mrf.mxu1 }
 0x6d7   :  { %v4789_v36 = vadd.f32 %v6873_v32, %v4788_v63 }
 0x6e6   :  { %v4808_v52 = vpop.f32.mrf.mxu0 }
 0x6e7   :  { %v4809_v8 = vadd.f32 %v4808_v52, %v4789_v36 }
 0x6e9   :  { %4812 = vst.msk [vmem:[#allocation5] sm:$0x3] %vm4811_vm4, %v4809_v8 }
 0x6ea   :  { %4823 = dma.vmem_to_hbm [thread:$0]  %s4819_s3, 32, %s4821_s14, [#allocation4]  }
 0x6eb   :  { %6926 = dma.done.wait [#allocation4], 32  }
 0x6ec   :  { %6927 = vsyncadd [#allocation4], 4294967264 }
 0x6ed   :  { %4828 = vsyncpa [#allocation3], 1 }
 0x6ee   :  { %4829 = vsyncpa [#allocation4], 1 }

</bundles_post_ra>
